<compile_context>
chip_gen: v7x
topology: tpu7x:2x2x1
jax: 0.10.0
libtpu: 0.0.40
codegen_flags: <defaults>
</compile_context>

<pallas_src>
import functools

import jax
import jax.numpy as jnp
from jax.experimental import pallas as pl
from jax.experimental.pallas import tpu as pltpu

_LANE = 128


def _pick_block_rows(dtype):
    """Rows per block so each input block is ~2 MiB regardless of dtype."""
    itemsize = jnp.dtype(dtype).itemsize
    target_bytes = 2 * 1024 * 1024
    rows = target_bytes // (itemsize * _LANE)   # 4096 for f32, 8192 for bf16
    return int(max(8, (rows // 8) * 8))         # keep a multiple of 8 (sublanes)


def _num_parallel_cores():
    """2 on v7x (2 TensorCores/chip share one Pallas grid), else 1."""
    # TODO(synk): switch to pltpu.get_tpu_info() once a stable core-count field exists.
    try:
        kind = jax.devices()[0].device_kind.lower()
    except Exception:
        return 1
    return 2 if ("v7" in kind or "tpu7" in kind) else 1


def _mse_sum_kernel(o_ref, t_ref, acc_ref, *, block_rows, blocks_per_core,
                    total_rows, mask_needed):
    """Accumulates sum((o - t)^2) lane-parallel into a resident (1, 128) row."""
    i = pl.program_id(1)

    @pl.when(i == 0)
    def _():
        acc_ref[...] = jnp.zeros_like(acc_ref)

    # Upcast inside the kernel (inputs may be bf16); accumulate in f32.
    d = o_ref[...].astype(jnp.float32) - t_ref[...].astype(jnp.float32)
    sq = d * d

    if mask_needed:
        c = pl.program_id(0)
        block_start = (c * blocks_per_core + i) * block_rows
        is_tail = block_start + block_rows > total_rows

        @pl.when(jnp.logical_not(is_tail))
        def _():
            acc_ref[...] += jnp.sum(sq, axis=0, keepdims=True)

        @pl.when(is_tail)
        def _():
            # (block_rows, 1) iota; the select broadcasts it across lanes.
            row = block_start + jax.lax.broadcasted_iota(
                jnp.int32, (block_rows, 1), 0)
            # Keep this a select (NOT a multiply): out-of-range rows may hold
            # garbage (possibly NaN/Inf) bit patterns.
            sq_m = jnp.where(row < total_rows, sq, 0.0)
            acc_ref[...] += jnp.sum(sq_m, axis=0, keepdims=True)
    else:
        acc_ref[...] += jnp.sum(sq, axis=0, keepdims=True)


def _mse_sum_pallas(o2d, t2d, total_rows, block_rows, num_cores):
    """Returns sum((o2d - t2d)^2) over the first `total_rows` rows (f32 scalar)."""
    num_blocks = int(pl.cdiv(total_rows, block_rows))
    num_cores = max(1, min(int(num_cores), num_blocks))
    blocks_per_core = int(pl.cdiv(num_blocks, num_cores))
    padded_rows = num_cores * blocks_per_core * block_rows
    mask_needed = padded_rows != total_rows

    kernel = functools.partial(
        _mse_sum_kernel,
        block_rows=block_rows,
        blocks_per_core=blocks_per_core,
        total_rows=total_rows,
        mask_needed=mask_needed,
    )

    last_block = num_blocks - 1
    if num_blocks % num_cores == 0:
        def in_map(c, i):
            return (c * blocks_per_core + i, 0)
    else:
        # Padding blocks past the real range re-read the last block; the in-kernel
        # row mask (built from the *unclamped* index) zeroes their contribution.
        def in_map(c, i):
            return (jnp.minimum(c * blocks_per_core + i, last_block), 0)

    itemsize = jnp.dtype(o2d.dtype).itemsize
    block_bytes = block_rows * _LANE * itemsize
    # Double-buffered inputs (2 x 2 x block) plus slack for f32 elementwise temps.
    vmem_limit = int(2 * 2 * block_bytes + (24 << 20))

    n_elems = total_rows * _LANE
    cost = pl.CostEstimate(
        flops=3 * n_elems,
        transcendentals=0,
        bytes_accessed=2 * n_elems * itemsize + num_cores * _LANE * 4,
    )

    out = pl.pallas_call(
        kernel,
        out_shape=jax.ShapeDtypeStruct((num_cores, _LANE), jnp.float32),
        grid_spec=pltpu.PrefetchScalarGridSpec(
            num_scalar_prefetch=0,
            grid=(num_cores, blocks_per_core),
            in_specs=[
                pl.BlockSpec((block_rows, _LANE), in_map),
                pl.BlockSpec((block_rows, _LANE), in_map),
            ],
            # Per-core accumulator row: same block across the inner (reduction)
            # axis -> stays resident in VMEM; written back once per core slice.
            out_specs=pl.BlockSpec((1, _LANE), lambda c, i: (c, 0)),
        ),
        compiler_params=pltpu.CompilerParams(
            dimension_semantics=("parallel", "arbitrary"),
            vmem_limit_bytes=vmem_limit,
        ),
        cost_estimate=cost,
    )(o2d, t2d)
    return jnp.sum(out)


def mse_regression_loss(targets, *outputs, force_cores=None):
    """JAX/Pallas equivalent of the module's forward with an MSE 'mean' loss."""
    out = outputs[0]
    # Mirror the original behaviour: flatten outputs when targets are 1-D.
    if out.ndim != 1 and targets.ndim == 1:
        out = out.reshape(-1)
    o = out.reshape(-1)
    t = targets.reshape(-1)
    n = o.shape[0]

    block_rows = _pick_block_rows(o.dtype)
    block_elems = block_rows * _LANE

    if n < block_elems or (n % _LANE) != 0:
        # Small N: launch overhead dominates. Lane-unaligned N: the fused XLA
        # reduction reads each array exactly once (no pad copy, same bytes as the
        # kernel path), so it is the zero-copy choice.
        # TODO(synk): a copy-free Pallas path for lane-unaligned large N would need
        # manual 1-D HBM DMA (memory_space=pl.ANY) of the ragged tail.
        d = o.astype(jnp.float32) - t.astype(jnp.float32)
        return jnp.mean(d * d)

    total_rows = n // _LANE
    o2d = o.reshape(total_rows, _LANE)        # row-major reshape: free bitcast
    t2d = t.reshape(total_rows, _LANE)

    num_cores = force_cores if force_cores is not None else _num_parallel_cores()
    sq_sum = _mse_sum_pallas(o2d, t2d, total_rows, block_rows, num_cores)
    return sq_sum / jnp.float32(n)


if __name__ == "__main__":
    key = jax.random.PRNGKey(0)
    keys = jax.random.split(key, 10)
    f32 = jnp.float32

    # 1) Small case matching the module's typical use: (batch, 1) outputs vs
    #    1-D targets. Exercises the flatten + small-N fallback path.
    batch = 16
    t_s = jax.random.normal(keys[0], (batch,), dtype=f32)
    o_s = jax.random.normal(keys[1], (batch, 1), dtype=f32)
    loss_s = jax.block_until_ready(mse_regression_loss(t_s, o_s))
    ref_s = jnp.mean((o_s.reshape(-1) - t_s) ** 2)
    assert jnp.allclose(loss_s, ref_s, rtol=1e-5, atol=1e-6), (loss_s, ref_s)

    # 2) f32 block-aligned case -> Pallas kernel path, no tail mask.
    br_f32 = _pick_block_rows(jnp.float32)
    n_a = 2 * br_f32 * _LANE
    t_a = jax.random.normal(keys[2], (n_a,), dtype=f32)
    o_a = jax.random.normal(keys[3], (n_a,), dtype=f32)
    loss_a = jax.block_until_ready(mse_regression_loss(t_a, o_a))
    ref_a = jnp.mean((o_a - t_a) ** 2)
    assert jnp.allclose(loss_a, ref_a, rtol=1e-4, atol=1e-6), (loss_a, ref_a)

    # 3) f32 lane-aligned ragged block tail + forced 2-core split: exercises the
    #    v7x-style parallel axis, per-core accumulator rows and the tail row mask
    #    on any chip (serialized on 1-TC chips, correctness identical).
    n_b = br_f32 * _LANE + 3 * _LANE
    t_b = jax.random.normal(keys[4], (n_b,), dtype=f32)
    o_b = jax.random.normal(keys[5], (n_b,), dtype=f32)
    loss_b = jax.block_until_ready(mse_regression_loss(t_b, o_b, force_cores=2))
    ref_b = jnp.mean((o_b - t_b) ** 2)
    assert jnp.allclose(loss_b, ref_b, rtol=1e-4, atol=1e-6), (loss_b, ref_b)

    # 4) bf16 ragged block tail -> kernel path with in-kernel upcast + tail mask.
    br_bf16 = _pick_block_rows(jnp.bfloat16)
    n_c = br_bf16 * _LANE + 7 * _LANE
    t_c = jax.random.normal(keys[6], (n_c,), dtype=jnp.bfloat16)
    o_c = jax.random.normal(keys[7], (n_c,), dtype=jnp.bfloat16)
    loss_c = jax.block_until_ready(mse_regression_loss(t_c, o_c))
    ref_c = jnp.mean((o_c.astype(f32) - t_c.astype(f32)) ** 2)
    assert jnp.allclose(loss_c, ref_c, rtol=1e-3, atol=1e-5), (loss_c, ref_c)

    # 5) Lane-unaligned large N -> fused XLA fallback (no pad copy).
    n_d = br_f32 * _LANE + 77
    t_d = jax.random.normal(keys[8], (n_d,), dtype=f32)
    o_d = jax.random.normal(keys[9], (n_d,), dtype=f32)
    loss_d = jax.block_until_ready(mse_regression_loss(t_d, o_d))
    ref_d = jnp.mean((o_d - t_d) ** 2)
    assert jnp.allclose(loss_d, ref_d, rtol=1e-5, atol=1e-6), (loss_d, ref_d)

    print("KERNEL_OK")
</pallas_src>

<mosaic_0001>
module attributes {stable_mosaic.version = 11 : i64} {
  func.func @_mse_sum_kernel(%arg0: i32, %arg1: i32, %arg2: memref<4096x128xf32, #tpu.memory_space<vmem>>, %arg3: memref<4096x128xf32, #tpu.memory_space<vmem>>, %arg4: memref<1x128xf32, #tpu.memory_space<vmem>>) attributes {dimension_semantics = [#tpu.dimension_semantics<parallel>, #tpu.dimension_semantics<arbitrary>], iteration_bounds = array<i64: 1, 2>, scalar_prefetch = 0 : i64, scratch_operands = 0 : i64, tpu.core_type = #tpu.core_type<tc>, window_params = [{transform_indices = @transform_0, window_bounds = array<i64: 4096, 128>}, {transform_indices = @transform_1, window_bounds = array<i64: 4096, 128>}, {transform_indices = @transform_2, window_bounds = array<i64: 1, 128>}]} {
    %c0_i32 = arith.constant 0 : i32
    %0 = arith.cmpi eq, %arg1, %c0_i32 : i32
    %1 = arith.extui %0 : i1 to i32
    %c0_i32_0 = arith.constant 0 : i32
    %2 = arith.cmpi ne, %1, %c0_i32_0 : i32
    scf.if %2 {
      %cst_8 = arith.constant 0.000000e+00 : f32
      %12 = vector.broadcast %cst_8 : f32 to vector<1x128xf32>
      %c0_9 = arith.constant 0 : index
      %c0_10 = arith.constant 0 : index
      %13 = vector.load %arg4[%c0_9, %c0_10] : memref<1x128xf32, #tpu.memory_space<vmem>>, vector<1x128xf32>
      tpu.vector_store %arg4[%c0_9, %c0_10], %12 {strides = array<i32>} : memref<1x128xf32, #tpu.memory_space<vmem>>, vector<1x128xf32>,
    } else {
    }
    %c0 = arith.constant 0 : index
    %c0_1 = arith.constant 0 : index
    %3 = vector.load %arg2[%c0, %c0_1] : memref<4096x128xf32, #tpu.memory_space<vmem>>, vector<4096x128xf32>
    %c0_2 = arith.constant 0 : index
    %c0_3 = arith.constant 0 : index
    %4 = vector.load %arg3[%c0_2, %c0_3] : memref<4096x128xf32, #tpu.memory_space<vmem>>, vector<4096x128xf32>
    %5 = arith.subf %3, %4 : vector<4096x128xf32>
    %6 = arith.mulf %5, %5 : vector<4096x128xf32>
    %c0_4 = arith.constant 0 : index
    %c0_5 = arith.constant 0 : index
    %7 = vector.load %arg4[%c0_4, %c0_5] : memref<1x128xf32, #tpu.memory_space<vmem>>, vector<1x128xf32>
    %cst = arith.constant dense<0.000000e+00> : vector<128xf32>
    %8 = vector.multi_reduction <add>, %6, %cst [0] : vector<4096x128xf32> to vector<128xf32>
    %9 = vector.shape_cast %8 : vector<128xf32> to vector<1x128xf32>
    %10 = arith.addf %7, %9 : vector<1x128xf32>
    %c0_6 = arith.constant 0 : index
    %c0_7 = arith.constant 0 : index
    %11 = vector.load %arg4[%c0_6, %c0_7] : memref<1x128xf32, #tpu.memory_space<vmem>>, vector<1x128xf32>
    tpu.vector_store %arg4[%c0_6, %c0_7], %10 {strides = array<i32>} : memref<1x128xf32, #tpu.memory_space<vmem>>, vector<1x128xf32>,
    return
  }
  func.func @transform_0(%arg0: i32, %arg1: i32) -> (i32, i32) {
    %c2_i32 = arith.constant 2 : i32
    %0 = arith.muli %arg0, %c2_i32 : i32
    %1 = arith.addi %0, %arg1 : i32
    %c0_i32 = arith.constant 0 : i32
    %c0_i32_0 = arith.constant 0 : i32
    return %1, %c0_i32 : i32, i32
  }
  func.func @transform_1(%arg0: i32, %arg1: i32) -> (i32, i32) {
    %c2_i32 = arith.constant 2 : i32
    %0 = arith.muli %arg0, %c2_i32 : i32
    %1 = arith.addi %0, %arg1 : i32
    %c0_i32 = arith.constant 0 : i32
    %c0_i32_0 = arith.constant 0 : i32
    return %1, %c0_i32 : i32, i32
  }
  func.func @transform_2(%arg0: i32, %arg1: i32) -> (i32, i32) {
    %c0_i32 = arith.constant 0 : i32
    %c0_i32_0 = arith.constant 0 : i32
    return %arg0, %c0_i32 : i32, i32
  }
}

</mosaic_0001>

<bundles_post_ra>
// kernel: tpu_custom_call.1
= control target key start
LH: loop header
LB: loop body
LE: loop exit
PB: predicated region body
PF: predicated region fallthrough
CT: control target
= control target key end

     0   :  { %7 = vsyncpa [#allocation3], 0  ;;  %s4389_s0 = inlined_call_operand.hbm [shape: f32[8192,128], index: 0, kind: input, shape index: {}]   ;;  %s4390_s1 = inlined_call_operand.hbm [shape: f32[8192,128], index: 1, kind: input, shape index: {}]   ;;  %s4391_s2 = inlined_call_operand.hbm [shape: f32[1,128], index: 2, kind: output, shape index: {}]  }
   0x1   :  { %9 = vsyncpa [#allocation3 + $0x1], 0 }
   0x2   :  { %10 = vsyncpa [#allocation6], 0 }
   0x3   :  { %12 = vsyncpa [#allocation6 + $0x1], 0 }
   0x4   :  { %13 = vsyncpa [#allocation4], 0  ;;  %s3151_s9 = smov 0   ;;  %s3153_s10 = smov 0  }
   0x5   :  { %s3155_s11 = smov 0   ;;  %s3157_s12 = smov 0  }
   0x6   :  { %s3159_s13 = smov 0   ;;  %s3161_s14 = smov 0  }
   0x7 LB: > { %s2895_s15 = sadd.s32 4294967295, %s3128_s14   ;;  %s28_s16 = sadd.s32 1, %s3124_s13  ;;  %s3128_s14 = sphi %s3161_s14, %s19_s14   ;;  %s3124_s13 = sphi %s3159_s13, %s4403_s13   ;;  %s3120_s12 = sphi %s3157_s12, %s4402_s12   ;;  %s3116_s11 = sphi %s3155_s11, %s4401_s11   ;;  %s3112_s10 = sphi %s3153_s10, %s4400_s10   ;;  %s3108_s9 = sphi %s3151_s9, %s4399_s9  }
   0x8   : > { %p29_p0 = scmp.ge.s32.totalorder %s28_s16, 2  ;;  %s42_s17 = sadd.s32 1, %s3116_s11 }
   0x9   : > { %p49_p1 = scmp.ne.s32.totalorder %s3116_s11, %s3112_s10  ;;  %p50_p2 = scmp.eq.s32.totalorder %s3128_s14, 0 }
   0xa   : > { %s4405_s16 = smov (%p29_p0, %s28_s16), 0  ;;  %p55_p4 = scmp.ne.s32.totalorder %s3112_s10, %s3108_s9 }
   0xb   : > { %p3187_p3 = por %p50_p2, %p49_p1  ;;  %s39_s19 = ssub.s32 %s3124_s13, %s4405_s16 }
   0xc   : > { %p56_p5 = scmp.eq.s32.totalorder %s2895_s15, 0  ;;  %p40_p6 = scmp.eq.s32.totalorder %s39_s19, 0 }
   0xd   : > { %p2929_p8 = scmp.lt.s32.totalorder %s3128_s14, 2  ;;  %s3205_s22 = sand.u32 1, %s3116_s11  }
   0xe   : > { %p3196_p7 = por %p56_p5, %p55_p4  ;;  %s2912_s23 = sshll.u32 %s3124_s13, 16 }
   0xf   : > { %s3202_s21 = scalar_select %p40_p6, %s3116_s11, %s42_s17  }
  0x10   : > { %s4394_s20 = scalar_select %p3196_p7, 1, 0 }
  0x11   : > { %s2898_s24 = sshll.u32 %s3205_s22, 12  ;;  %s3214_s27 = scalar_lea.hbm %s4389_s0, %s2912_s23 }
  0x12   : > { %s139_s28 = scalar_lea.vmem [#allocation2], %s2898_s24  ;;  %p3220_p9 = pnand %p2929_p8, %p3187_p3 }
  0x13   : > { %s148_s29 = sshll.u32 %s139_s28, 4  ;;  %s136_s3 = scalar_lea.sflag [#allocation3], %s3205_s22  ;;  %s3224_s29 = int_to_ptr.vmem [resolvable:$true] %s148_s29 }
  0x14   : > { %s2984_s4 = scalar_lea.hbm %s3214_s27, 65536  ;;  %p2986_p11 = pneg %p3220_p9 }
  0x15   : > { %p2985_p10 = scmp.ne.s32.totalorder %s3214_s27, %s2984_s4  ;;  %s2989_s7 = scalar_lea.hbm %s4389_s0, 131072 }
  0x16   : > { %p2990_p0 = scmp.lt.u32.totalorder %s3214_s27, %s4389_s0  ;;  %p2991_p1 = scmp.lt.u32.totalorder %s2989_s7, %s2984_s4 }
  0x17   : > { %p2987_p12 = pnand %p2986_p11, %p2985_p10  ;;  %p2993_p3 = scmp.lt.u32.totalorder %s2984_s4, %s3214_s27 }
  0x18   : > { %p2992_p2 = por %p2991_p1, %p2990_p0 }
  0x19   : > { %p2988_p13 = pneg %p2987_p12 }
  0x1a   : > { %p2994_p4 = por %p2993_p3, %p2992_p2 }
  0x1c   : > { %p2995_p5 = pnand %p2994_p4, %p2988_p13 }
  0x1e   : > { %2998 = shalt.err (!%p2995_p5)
}
  0x1f   : > { %s2999_s17 = scalar_lea.vmem %s3224_s29, 65536  ;;  %s3130_s18 = smov [#allocation2]  }
  0x20   : > { %p3000_p6 = scmp.ne.s32.totalorder %s3224_s29, %s2999_s17  ;;  %s3004_s19 = sshll.u32 %s3130_s18, 4  ;;  %s3005_s19 = int_to_ptr.vmem [resolvable:$false] %s3004_s19 }
  0x21   : > { %s3006_s25 = scalar_lea.vmem %s3005_s19, 131072  ;;  %p3007_p12 = scmp.lt.s32.totalorder %s3224_s29, %s3005_s19 }
  0x22   : > { %p3002_p8 = pnand %p3000_p6, %p2986_p11  ;;  %p3008_p0 = scmp.lt.s32.totalorder %s3006_s25, %s2999_s17 }
  0x24   : > { %p3003_p10 = pneg %p3002_p8  ;;  %p3009_p1 = por %p3008_p0, %p3007_p12 }
  0x26   : > { %p3010_p2 = pnand %p3009_p1, %p3003_p10 }
  0x28   : > { %3013 = shalt.err (!%p3010_p2)
}
  0x29   : > { %s3131_s26 = smov 128   ;;  %s3132_s28 = smov 8  }
  0x2a   : > { %2925 = dma.hbm_to_vmem [thread:$0]  (!%p3220_p9), %s3214_s27, 65536, %s3224_s29, %s136_s3, %s3131_s26, %s3131_s26, %s3132_s28  }
  0x2b   : > { %p2904_p13 = scmp.ge.s32.totalorder %s3128_s14, 1  ;;  %p179_p3 = scmp.lt.s32.totalorder %s3128_s14, 3 }
  0x2c   : > { %s3268_s7 = scalar_lea.hbm %s4390_s1, %s2912_s23  ;;  %s162_s8 = scalar_lea.vmem [#allocation5], %s2898_s24 }
  0x2d   : > { %p3259_p4 = pnand %p2904_p13, %p179_p3  ;;  %s171_s9 = sshll.u32 %s162_s8, 4  ;;  %s3272_s9 = int_to_ptr.vmem [resolvable:$true] %s171_s9 }
  0x2e   : > { %s159_s27 = scalar_lea.sflag [#allocation6], %s3205_s22  ;;  %s3014_s29 = scalar_lea.hbm %s3268_s7, 65536 }
  0x2f   : > { %p3015_p5 = scmp.ne.s32.totalorder %s3268_s7, %s3014_s29  ;;  %s3019_s23 = scalar_lea.hbm %s4390_s1, 131072 }
  0x30   : > { %p3020_p10 = scmp.lt.u32.totalorder %s3268_s7, %s4390_s1  ;;  %p3021_p12 = scmp.lt.u32.totalorder %s3019_s23, %s3014_s29 }
  0x31   : > { %p3017_p6 = pnand %p3015_p5, %p2986_p11  ;;  %p3023_p1 = scmp.lt.u32.totalorder %s3014_s29, %s3268_s7 }
  0x32   : > { %p3022_p0 = por %p3021_p12, %p3020_p10 }
  0x33   : > { %p3018_p8 = pneg %p3017_p6 }
  0x34   : > { %p3024_p2 = por %p3023_p1, %p3022_p0 }
  0x36   : > { %p3025_p13 = pnand %p3024_p2, %p3018_p8 }
  0x38   : > { %3028 = shalt.err (!%p3025_p13)
}
  0x39   : > { %s3029_s24 = scalar_lea.vmem %s3272_s9, 65536  ;;  %s3133_s25 = smov [#allocation5]  }
  0x3a   : > { %p3030_p3 = scmp.ne.s32.totalorder %s3272_s9, %s3029_s24  ;;  %s3034_s5 = sshll.u32 %s3133_s25, 4  ;;  %s3035_s5 = int_to_ptr.vmem [resolvable:$false] %s3034_s5 }
  0x3b   : > { %s3036_s6 = scalar_lea.vmem %s3035_s5, 131072  ;;  %p3037_p7 = scmp.lt.s32.totalorder %s3272_s9, %s3035_s5 }
  0x3c   : > { %p3032_p5 = pnand %p3030_p3, %p2986_p11  ;;  %p3038_p10 = scmp.lt.s32.totalorder %s3036_s6, %s3029_s24 }
  0x3e   : > { %p3033_p6 = pneg %p3032_p5  ;;  %p3039_p12 = por %p3038_p10, %p3037_p7 }
  0x40   : > { %p3040_p0 = pnand %p3039_p12, %p3033_p6 }
  0x42   : > { %3043 = shalt.err (!%p3040_p0)
}
  0x43   : > { %2928 = dma.hbm_to_vmem [thread:$0]  (!%p3220_p9), %s3268_s7, 65536, %s3272_s9, %s159_s27, %s3131_s26, %s3131_s26, %s3132_s28  }
  0x44   : > { %183 = sbr.rel (%p3259_p4) target bundleno = 1144 (0x478), region = 28  ;;  %s185_s8 = sand.u32 (!%p3259_p4), 1, %s3112_s10  }
  0x45   : > { %s2905_s29 = sshll.u32 (!%p3259_p4), %s185_s8, 12  ;;  %s186_s3 = scalar_lea.sflag (!%p3259_p4), [#allocation3], %s185_s8 }
  0x46   : > { %s3306_s17 = scalar_lea.vmem (!%p3259_p4), [#allocation2], %s2905_s29  ;;  %p4397_p7 = scmp.ne.s32.totalorder (!%p3259_p4), %s4394_s20, 0 }
  0x4b   : > { %3095 = dma.done.wait (%p4397_p7), %s186_s3, 65536  }
  0x4c   : > { %3097 = vsyncadd (%p4397_p7), %s186_s3, 4294901760  ;;  %s195_s22 = scalar_lea.sflag [#allocation6], %s185_s8  ;;  %s3312_s30 = scalar_lea.vmem [#allocation5], %s2905_s29 }
  0x4d   : > { %3099 = dma.done.wait (%p4397_p7), %s195_s22, 65536  }
  0x4e   : > { %3101 = vsyncadd (%p4397_p7), %s195_s22, 4294901760  ;;  %p2907_p9 = scmp.ne.s32.totalorder %s3120_s12, 0 }
  0x4f   : > { %v3134_v0 = vmov (!%p2907_p9), 0.0  }
  0x50   : > { %228 = sbr.rel (%p2907_p9) target bundleno = 87 (0x57), region = 40  ;;  %229 = vst [vmem:[#allocation7] sm:$0x1] (!%p2907_p9), %v3134_v0 }
  0x57 PF: > { %v230_v1 = vld [vmem:[%s3306_s17] sm:$0xff]  ;;  %v231_v2 = vld [vmem:[%s3306_s17 + $0x8] sm:$0xff]  ;;  %v232_v5 = vld [vmem:[%s3306_s17 + $0x10] sm:$0xff]  ;;  %s3135_s12 = smov [#allocation7]   ;;  %p4345_p11 = scmp.eq.s32.totalorder %s2895_s15, 1 }
  0x58   : > { %v742_v3 = vld [vmem:[%s3312_s30] sm:$0xff]  ;;  %v743_v4 = vld [vmem:[%s3312_s30 + $0x8] sm:$0xff]  ;;  %v744_v6 = vld [vmem:[%s3312_s30 + $0x10] sm:$0xff]  ;;  %s2807_s20 = sshll.u32 %s3135_s12, 4  ;;  %s2808_s20 = int_to_ptr.vmem [resolvable:$true] %s2807_s20 }
  0x59   : > { %v1254_v7 = vsub.f32 %v230_v1, %v742_v3  ;;  %v1255_v8 = vsub.f32 %v231_v2, %v743_v4  ;;  %v233_v9 = vld [vmem:[%s3306_s17 + $0x18] sm:$0xff]  ;;  %v1256_v11 = vsub.f32 %v232_v5, %v744_v6  ;;  %v234_v12 = vld [vmem:[%s3306_s17 + $0x20] sm:$0xff]  ;;  %v235_v17 = vld [vmem:[%s3306_s17 + $0x28] sm:$0xff]  ;;  %s3044_s28 = scalar_lea.vmem %s2808_s20, 16  ;;  %s3050_s4 = scalar_lea.vmem %s2808_s20, 32 }
  0x5a   : > { %v745_v10 = vld [vmem:[%s3312_s30 + $0x18] sm:$0xff]  ;;  %v746_v13 = vld [vmem:[%s3312_s30 + $0x20] sm:$0xff]  ;;  %v747_v18 = vld [vmem:[%s3312_s30 + $0x28] sm:$0xff]  ;;  %p3045_p4 = scmp.ne.s32.totalorder %s2808_s20, %s3044_s28  ;;  %p3051_p2 = scmp.lt.s32.totalorder %s2808_s20, %s2808_s20 }
  0x5b   : > { %v1257_v14 = vsub.f32 %v233_v9, %v745_v10  ;;  %v1766_v15 = vmul.f32 %v1254_v7, %v1254_v7  ;;  %v1767_v16 = vmul.f32 %v1255_v8, %v1255_v8  ;;  %v1258_v19 = vsub.f32 %v234_v12, %v746_v13  ;;  %v236_v21 = vld [vmem:[%s3306_s17 + $0x30] sm:$0xff]  ;;  %v237_v26 = vld [vmem:[%s3306_s17 + $0x38] sm:$0xff]  ;;  %v238_v31 = vld [vmem:[%s3306_s17 + $0x40] sm:$0xff]  ;;  %p3052_p13 = scmp.lt.s32.totalorder %s3050_s4, %s3044_s28 }
  0x5c   : > { %v1768_v20 = vmul.f32 %v1256_v11, %v1256_v11  ;;  %v748_v22 = vld [vmem:[%s3312_s30 + $0x30] sm:$0xff]  ;;  %v1259_v23 = vsub.f32 %v235_v17, %v747_v18  ;;  %v749_v27 = vld [vmem:[%s3312_s30 + $0x38] sm:$0xff]  ;;  %v750_v32 = vld [vmem:[%s3312_s30 + $0x40] sm:$0xff]  ;;  %p3046_p8 = pnand %p3045_p4, %p4345_p11 }
  0x5d   : > { %v1769_v24 = vmul.f32 %v1257_v14, %v1257_v14  ;;  %v2279_v25 = vadd.f32 %v1767_v16, %v1766_v15  ;;  %v1260_v28 = vsub.f32 %v236_v21, %v748_v22  ;;  %v1770_v29 = vmul.f32 %v1258_v19, %v1258_v19  ;;  %v239_v36 = vld [vmem:[%s3306_s17 + $0x48] sm:$0xff]  ;;  %v240_v41 = vld [vmem:[%s3306_s17 + $0x50] sm:$0xff]  ;;  %v241_v46 = vld [vmem:[%s3306_s17 + $0x58] sm:$0xff]  ;;  %p3053_p3 = por %p3052_p13, %p3051_p2 }
  0x5e   : > { %v1261_v33 = vsub.f32 %v237_v26, %v749_v27  ;;  %v1771_v34 = vmul.f32 %v1259_v23, %v1259_v23  ;;  %v751_v37 = vld [vmem:[%s3312_s30 + $0x48] sm:$0xff]  ;;  %v1262_v38 = vsub.f32 %v238_v31, %v750_v32  ;;  %v752_v42 = vld [vmem:[%s3312_s30 + $0x50] sm:$0xff]  ;;  %v753_v47 = vld [vmem:[%s3312_s30 + $0x58] sm:$0xff]  ;;  %p3047_p1 = pneg %p3046_p8 }
  0x5f   : > { %v2280_v30 = vadd.f32 %v2279_v25, %v1768_v20  ;;  %v1772_v39 = vmul.f32 %v1260_v28, %v1260_v28  ;;  %v1263_v43 = vsub.f32 %v239_v36, %v751_v37  ;;  %v1264_v48 = vsub.f32 %v240_v41, %v752_v42  ;;  %v242_v51 = vld [vmem:[%s3306_s17 + $0x60] sm:$0xff]  ;;  %v243_v56 = vld [vmem:[%s3306_s17 + $0x68] sm:$0xff]  ;;  %v244_v61 = vld [vmem:[%s3306_s17 + $0x70] sm:$0xff] }
  0x60   : > { %v1773_v44 = vmul.f32 %v1261_v33, %v1261_v33  ;;  %v1774_v49 = vmul.f32 %v1262_v38, %v1262_v38  ;;  %v754_v52 = vld [vmem:[%s3312_s30 + $0x60] sm:$0xff]  ;;  %v1265_v53 = vsub.f32 %v241_v46, %v753_v47  ;;  %v755_v57 = vld [vmem:[%s3312_s30 + $0x68] sm:$0xff]  ;;  %v756_v62 = vld [vmem:[%s3312_s30 + $0x70] sm:$0xff]  ;;  %p3054_p5 = pnand %p3053_p3, %p3047_p1 }
  0x61   : > { %v2281_v35 = vadd.f32 %v2280_v30, %v1769_v24  ;;  %v1775_v54 = vmul.f32 %v1263_v43, %v1263_v43  ;;  %v1266_v58 = vsub.f32 %v242_v51, %v754_v52  ;;  %v1776_v59 = vmul.f32 %v1264_v48, %v1264_v48  ;;  %v245_v2 = vld [vmem:[%s3306_s17 + $0x78] sm:$0xff]  ;;  %v246_v7 = vld [vmem:[%s3306_s17 + $0x80] sm:$0xff]  ;;  %v247_v12 = vld [vmem:[%s3306_s17 + $0x88] sm:$0xff] }
  0x62   : > { %v1267_v63 = vsub.f32 %v243_v56, %v755_v57  ;;  %v1777_v0 = vmul.f32 %v1265_v53, %v1265_v53  ;;  %v757_v3 = vld [vmem:[%s3312_s30 + $0x78] sm:$0xff]  ;;  %v1268_v4 = vsub.f32 %v244_v61, %v756_v62  ;;  %v758_v8 = vld [vmem:[%s3312_s30 + $0x80] sm:$0xff]  ;;  %v759_v13 = vld [vmem:[%s3312_s30 + $0x88] sm:$0xff] }
  0x63   : > { %v2282_v40 = vadd.f32 %v2281_v35, %v1770_v29  ;;  %v1778_v5 = vmul.f32 %v1266_v58, %v1266_v58  ;;  %v1269_v9 = vsub.f32 %v245_v2, %v757_v3  ;;  %v1270_v14 = vsub.f32 %v246_v7, %v758_v8  ;;  %v248_v17 = vld [vmem:[%s3306_s17 + $0x90] sm:$0xff]  ;;  %v249_v22 = vld [vmem:[%s3306_s17 + $0x98] sm:$0xff]  ;;  %v250_v27 = vld [vmem:[%s3306_s17 + $0xa0] sm:$0xff] }
  0x64   : > { %v1779_v10 = vmul.f32 %v1267_v63, %v1267_v63  ;;  %v1780_v15 = vmul.f32 %v1268_v4, %v1268_v4  ;;  %v760_v18 = vld [vmem:[%s3312_s30 + $0x90] sm:$0xff]  ;;  %v1271_v19 = vsub.f32 %v247_v12, %v759_v13  ;;  %v761_v23 = vld [vmem:[%s3312_s30 + $0x98] sm:$0xff]  ;;  %v762_v28 = vld [vmem:[%s3312_s30 + $0xa0] sm:$0xff] }
  0x65   : > { %v2283_v45 = vadd.f32 %v2282_v40, %v1771_v34  ;;  %v1781_v20 = vmul.f32 %v1269_v9, %v1269_v9  ;;  %v1272_v24 = vsub.f32 %v248_v17, %v760_v18  ;;  %v1782_v25 = vmul.f32 %v1270_v14, %v1270_v14  ;;  %v251_v32 = vld [vmem:[%s3306_s17 + $0xa8] sm:$0xff]  ;;  %v252_v37 = vld [vmem:[%s3306_s17 + $0xb0] sm:$0xff]  ;;  %v253_v42 = vld [vmem:[%s3306_s17 + $0xb8] sm:$0xff] }
  0x66   : > { %v1273_v29 = vsub.f32 %v249_v22, %v761_v23  ;;  %v1783_v30 = vmul.f32 %v1271_v19, %v1271_v19  ;;  %v763_v33 = vld [vmem:[%s3312_s30 + $0xa8] sm:$0xff]  ;;  %v1274_v34 = vsub.f32 %v250_v27, %v762_v28  ;;  %v764_v38 = vld [vmem:[%s3312_s30 + $0xb0] sm:$0xff]  ;;  %v765_v43 = vld [vmem:[%s3312_s30 + $0xb8] sm:$0xff] }
  0x67   : > { %v2284_v50 = vadd.f32 %v2283_v45, %v1772_v39  ;;  %v1784_v35 = vmul.f32 %v1272_v24, %v1272_v24  ;;  %v1275_v39 = vsub.f32 %v251_v32, %v763_v33  ;;  %v254_v47 = vld [vmem:[%s3306_s17 + $0xc0] sm:$0xff]  ;;  %v255_v52 = vld [vmem:[%s3306_s17 + $0xc8] sm:$0xff]  ;;  %v256_v57 = vld [vmem:[%s3306_s17 + $0xd0] sm:$0xff] }
  0x68   : > { %v1785_v40 = vmul.f32 %v1273_v29, %v1273_v29  ;;  %v1786_v45 = vmul.f32 %v1274_v34, %v1274_v34  ;;  %v766_v48 = vld [vmem:[%s3312_s30 + $0xc0] sm:$0xff]  ;;  %v767_v53 = vld [vmem:[%s3312_s30 + $0xc8] sm:$0xff]  ;;  %v768_v58 = vld [vmem:[%s3312_s30 + $0xd0] sm:$0xff] }
  0x69   : > { %v2285_v55 = vadd.f32 %v2284_v50, %v1773_v44  ;;  %v1276_v44 = vsub.f32 %v252_v37, %v764_v38  ;;  %v1787_v50 = vmul.f32 %v1275_v39, %v1275_v39  ;;  %v257_v62 = vld [vmem:[%s3306_s17 + $0xd8] sm:$0xff]  ;;  %v258_v3 = vld [vmem:[%s3306_s17 + $0xe0] sm:$0xff]  ;;  %v259_v8 = vld [vmem:[%s3306_s17 + $0xe8] sm:$0xff] }
  0x6a   : > { %v769_v63 = vld [vmem:[%s3312_s30 + $0xd8] sm:$0xff]  ;;  %v770_v4 = vld [vmem:[%s3312_s30 + $0xe0] sm:$0xff]  ;;  %v771_v9 = vld [vmem:[%s3312_s30 + $0xe8] sm:$0xff] }
  0x6b   : > { %v2286_v60 = vadd.f32 %v2285_v55, %v1774_v49  ;;  %v1277_v49 = vsub.f32 %v253_v42, %v765_v43  ;;  %v1788_v55 = vmul.f32 %v1276_v44, %v1276_v44  ;;  %v260_v13 = vld [vmem:[%s3306_s17 + $0xf0] sm:$0xff]  ;;  %v261_v18 = vld [vmem:[%s3306_s17 + $0xf8] sm:$0xff]  ;;  %v262_v23 = vld [vmem:[%s3306_s17 + $0x100] sm:$0xff] }
  0x6c   : > { %v772_v14 = vld [vmem:[%s3312_s30 + $0xf0] sm:$0xff]  ;;  %v773_v19 = vld [vmem:[%s3312_s30 + $0xf8] sm:$0xff]  ;;  %v774_v24 = vld [vmem:[%s3312_s30 + $0x100] sm:$0xff] }
  0x6d   : > { %v2287_v1 = vadd.f32 %v2286_v60, %v1775_v54  ;;  %v1278_v54 = vsub.f32 %v254_v47, %v766_v48  ;;  %v1789_v60 = vmul.f32 %v1277_v49, %v1277_v49  ;;  %v263_v28 = vld [vmem:[%s3306_s17 + $0x108] sm:$0xff]  ;;  %v264_v33 = vld [vmem:[%s3306_s17 + $0x110] sm:$0xff]  ;;  %v265_v38 = vld [vmem:[%s3306_s17 + $0x118] sm:$0xff] }
  0x6e   : > { %v775_v29 = vld [vmem:[%s3312_s30 + $0x108] sm:$0xff]  ;;  %v776_v34 = vld [vmem:[%s3312_s30 + $0x110] sm:$0xff]  ;;  %v777_v39 = vld [vmem:[%s3312_s30 + $0x118] sm:$0xff] }
  0x6f   : > { %v2288_v6 = vadd.f32 %v2287_v1, %v1776_v59  ;;  %v1279_v59 = vsub.f32 %v255_v52, %v767_v53  ;;  %v1790_v1 = vmul.f32 %v1278_v54, %v1278_v54  ;;  %v266_v43 = vld [vmem:[%s3306_s17 + $0x120] sm:$0xff]  ;;  %v267_v48 = vld [vmem:[%s3306_s17 + $0x128] sm:$0xff]  ;;  %v268_v53 = vld [vmem:[%s3306_s17 + $0x130] sm:$0xff] }
  0x70   : > { %v778_v44 = vld [vmem:[%s3312_s30 + $0x120] sm:$0xff]  ;;  %v779_v49 = vld [vmem:[%s3312_s30 + $0x128] sm:$0xff]  ;;  %v780_v54 = vld [vmem:[%s3312_s30 + $0x130] sm:$0xff] }
  0x71   : > { %v2289_v11 = vadd.f32 %v2288_v6, %v1777_v0  ;;  %v1280_v0 = vsub.f32 %v256_v57, %v768_v58  ;;  %v1791_v6 = vmul.f32 %v1279_v59, %v1279_v59  ;;  %v269_v58 = vld [vmem:[%s3306_s17 + $0x138] sm:$0xff] }
  0x72   : > { %v781_v59 = vld [vmem:[%s3312_s30 + $0x138] sm:$0xff] }
  0x73   : > { %v2290_v16 = vadd.f32 %v2289_v11, %v1778_v5  ;;  %v1281_v5 = vsub.f32 %v257_v62, %v769_v63  ;;  %v1792_v11 = vmul.f32 %v1280_v0, %v1280_v0  ;;  %v270_v63 = vld [vmem:[%s3306_s17 + $0x140] sm:$0xff] }
  0x74   : > { %v782_v0 = vld [vmem:[%s3312_s30 + $0x140] sm:$0xff] }
  0x75   : > { %v2291_v21 = vadd.f32 %v2290_v16, %v1779_v10  ;;  %v1282_v10 = vsub.f32 %v258_v3, %v770_v4  ;;  %v1793_v16 = vmul.f32 %v1281_v5, %v1281_v5  ;;  %v271_v4 = vld [vmem:[%s3306_s17 + $0x148] sm:$0xff] }
  0x76   : > { %v783_v5 = vld [vmem:[%s3312_s30 + $0x148] sm:$0xff] }
  0x77   : > { %v2292_v26 = vadd.f32 %v2291_v21, %v1780_v15  ;;  %v1283_v15 = vsub.f32 %v259_v8, %v771_v9  ;;  %v1794_v21 = vmul.f32 %v1282_v10, %v1282_v10  ;;  %v272_v9 = vld [vmem:[%s3306_s17 + $0x150] sm:$0xff] }
  0x78   : > { %v784_v10 = vld [vmem:[%s3312_s30 + $0x150] sm:$0xff] }
  0x79   : > { %v2293_v31 = vadd.f32 %v2292_v26, %v1781_v20  ;;  %v1284_v20 = vsub.f32 %v260_v13, %v772_v14  ;;  %v1795_v26 = vmul.f32 %v1283_v15, %v1283_v15  ;;  %v273_v14 = vld [vmem:[%s3306_s17 + $0x158] sm:$0xff] }
  0x7a   : > { %v785_v15 = vld [vmem:[%s3312_s30 + $0x158] sm:$0xff] }
  0x7b   : > { %v2294_v36 = vadd.f32 %v2293_v31, %v1782_v25  ;;  %v1285_v25 = vsub.f32 %v261_v18, %v773_v19  ;;  %v1796_v31 = vmul.f32 %v1284_v20, %v1284_v20  ;;  %v274_v19 = vld [vmem:[%s3306_s17 + $0x160] sm:$0xff] }
  0x7c   : > { %v786_v20 = vld [vmem:[%s3312_s30 + $0x160] sm:$0xff] }
  0x7d   : > { %v2295_v41 = vadd.f32 %v2294_v36, %v1783_v30  ;;  %v1286_v30 = vsub.f32 %v262_v23, %v774_v24  ;;  %v1797_v36 = vmul.f32 %v1285_v25, %v1285_v25  ;;  %v275_v24 = vld [vmem:[%s3306_s17 + $0x168] sm:$0xff] }
  0x7e   : > { %v787_v25 = vld [vmem:[%s3312_s30 + $0x168] sm:$0xff] }
  0x7f   : > { %v2296_v46 = vadd.f32 %v2295_v41, %v1784_v35  ;;  %v1287_v35 = vsub.f32 %v263_v28, %v775_v29  ;;  %v1798_v41 = vmul.f32 %v1286_v30, %v1286_v30  ;;  %v276_v29 = vld [vmem:[%s3306_s17 + $0x170] sm:$0xff] }
  0x80   : > { %v788_v30 = vld [vmem:[%s3312_s30 + $0x170] sm:$0xff] }
  0x81   : > { %v2297_v51 = vadd.f32 %v2296_v46, %v1785_v40  ;;  %v1288_v40 = vsub.f32 %v264_v33, %v776_v34  ;;  %v1799_v46 = vmul.f32 %v1287_v35, %v1287_v35  ;;  %v277_v34 = vld [vmem:[%s3306_s17 + $0x178] sm:$0xff] }
  0x82   : > { %v789_v35 = vld [vmem:[%s3312_s30 + $0x178] sm:$0xff] }
  0x83   : > { %v2298_v56 = vadd.f32 %v2297_v51, %v1786_v45  ;;  %v1289_v45 = vsub.f32 %v265_v38, %v777_v39  ;;  %v1800_v51 = vmul.f32 %v1288_v40, %v1288_v40  ;;  %v278_v39 = vld [vmem:[%s3306_s17 + $0x180] sm:$0xff] }
  0x84   : > { %v790_v40 = vld [vmem:[%s3312_s30 + $0x180] sm:$0xff] }
  0x85   : > { %v2299_v61 = vadd.f32 %v2298_v56, %v1787_v50  ;;  %v1290_v50 = vsub.f32 %v266_v43, %v778_v44  ;;  %v1801_v56 = vmul.f32 %v1289_v45, %v1289_v45  ;;  %v279_v44 = vld [vmem:[%s3306_s17 + $0x188] sm:$0xff] }
  0x86   : > { %v791_v45 = vld [vmem:[%s3312_s30 + $0x188] sm:$0xff] }
  0x87   : > { %v2300_v2 = vadd.f32 %v2299_v61, %v1788_v55  ;;  %v1291_v55 = vsub.f32 %v267_v48, %v779_v49  ;;  %v1802_v61 = vmul.f32 %v1290_v50, %v1290_v50  ;;  %v280_v49 = vld [vmem:[%s3306_s17 + $0x190] sm:$0xff] }
  0x88   : > { %v792_v50 = vld [vmem:[%s3312_s30 + $0x190] sm:$0xff] }
  0x89   : > { %v2301_v7 = vadd.f32 %v2300_v2, %v1789_v60  ;;  %v1292_v60 = vsub.f32 %v268_v53, %v780_v54  ;;  %v1803_v2 = vmul.f32 %v1291_v55, %v1291_v55  ;;  %v281_v54 = vld [vmem:[%s3306_s17 + $0x198] sm:$0xff] }
  0x8a   : > { %v793_v55 = vld [vmem:[%s3312_s30 + $0x198] sm:$0xff] }
  0x8b   : > { %v2302_v12 = vadd.f32 %v2301_v7, %v1790_v1  ;;  %v1293_v1 = vsub.f32 %v269_v58, %v781_v59  ;;  %v1804_v7 = vmul.f32 %v1292_v60, %v1292_v60  ;;  %v282_v59 = vld [vmem:[%s3306_s17 + $0x1a0] sm:$0xff] }
  0x8c   : > { %v794_v60 = vld [vmem:[%s3312_s30 + $0x1a0] sm:$0xff] }
  0x8d   : > { %v2303_v17 = vadd.f32 %v2302_v12, %v1791_v6  ;;  %v1294_v6 = vsub.f32 %v270_v63, %v782_v0  ;;  %v1805_v12 = vmul.f32 %v1293_v1, %v1293_v1  ;;  %v283_v0 = vld [vmem:[%s3306_s17 + $0x1a8] sm:$0xff] }
  0x8e   : > { %v795_v1 = vld [vmem:[%s3312_s30 + $0x1a8] sm:$0xff] }
  0x8f   : > { %v2304_v22 = vadd.f32 %v2303_v17, %v1792_v11  ;;  %v1295_v11 = vsub.f32 %v271_v4, %v783_v5  ;;  %v1806_v17 = vmul.f32 %v1294_v6, %v1294_v6  ;;  %v284_v5 = vld [vmem:[%s3306_s17 + $0x1b0] sm:$0xff] }
  0x90   : > { %v796_v6 = vld [vmem:[%s3312_s30 + $0x1b0] sm:$0xff] }
  0x91   : > { %v2305_v27 = vadd.f32 %v2304_v22, %v1793_v16  ;;  %v1296_v16 = vsub.f32 %v272_v9, %v784_v10  ;;  %v1807_v22 = vmul.f32 %v1295_v11, %v1295_v11  ;;  %v285_v10 = vld [vmem:[%s3306_s17 + $0x1b8] sm:$0xff] }
  0x92   : > { %v797_v11 = vld [vmem:[%s3312_s30 + $0x1b8] sm:$0xff] }
  0x93   : > { %v2306_v32 = vadd.f32 %v2305_v27, %v1794_v21  ;;  %v1297_v21 = vsub.f32 %v273_v14, %v785_v15  ;;  %v1808_v27 = vmul.f32 %v1296_v16, %v1296_v16  ;;  %v286_v15 = vld [vmem:[%s3306_s17 + $0x1c0] sm:$0xff] }
  0x94   : > { %v798_v16 = vld [vmem:[%s3312_s30 + $0x1c0] sm:$0xff] }
  0x95   : > { %v2307_v37 = vadd.f32 %v2306_v32, %v1795_v26  ;;  %v1298_v26 = vsub.f32 %v274_v19, %v786_v20  ;;  %v1809_v32 = vmul.f32 %v1297_v21, %v1297_v21  ;;  %v287_v20 = vld [vmem:[%s3306_s17 + $0x1c8] sm:$0xff] }
  0x96   : > { %v799_v21 = vld [vmem:[%s3312_s30 + $0x1c8] sm:$0xff] }
  0x97   : > { %v2308_v42 = vadd.f32 %v2307_v37, %v1796_v31  ;;  %v1299_v31 = vsub.f32 %v275_v24, %v787_v25  ;;  %v1810_v37 = vmul.f32 %v1298_v26, %v1298_v26  ;;  %v288_v25 = vld [vmem:[%s3306_s17 + $0x1d0] sm:$0xff] }
  0x98   : > { %v800_v26 = vld [vmem:[%s3312_s30 + $0x1d0] sm:$0xff] }
  0x99   : > { %v2309_v47 = vadd.f32 %v2308_v42, %v1797_v36  ;;  %v1300_v36 = vsub.f32 %v276_v29, %v788_v30  ;;  %v1811_v42 = vmul.f32 %v1299_v31, %v1299_v31  ;;  %v289_v30 = vld [vmem:[%s3306_s17 + $0x1d8] sm:$0xff] }
  0x9a   : > { %v801_v31 = vld [vmem:[%s3312_s30 + $0x1d8] sm:$0xff] }
  0x9b   : > { %v2310_v52 = vadd.f32 %v2309_v47, %v1798_v41  ;;  %v1301_v41 = vsub.f32 %v277_v34, %v789_v35  ;;  %v1812_v47 = vmul.f32 %v1300_v36, %v1300_v36  ;;  %v290_v35 = vld [vmem:[%s3306_s17 + $0x1e0] sm:$0xff] }
  0x9c   : > { %v802_v36 = vld [vmem:[%s3312_s30 + $0x1e0] sm:$0xff] }
  0x9d   : > { %v2311_v57 = vadd.f32 %v2310_v52, %v1799_v46  ;;  %v1302_v46 = vsub.f32 %v278_v39, %v790_v40  ;;  %v1813_v52 = vmul.f32 %v1301_v41, %v1301_v41  ;;  %v291_v40 = vld [vmem:[%s3306_s17 + $0x1e8] sm:$0xff] }
  0x9e   : > { %v803_v41 = vld [vmem:[%s3312_s30 + $0x1e8] sm:$0xff] }
  0x9f   : > { %v2312_v62 = vadd.f32 %v2311_v57, %v1800_v51  ;;  %v1303_v51 = vsub.f32 %v279_v44, %v791_v45  ;;  %v1814_v57 = vmul.f32 %v1302_v46, %v1302_v46  ;;  %v292_v45 = vld [vmem:[%s3306_s17 + $0x1f0] sm:$0xff] }
  0xa0   : > { %v804_v46 = vld [vmem:[%s3312_s30 + $0x1f0] sm:$0xff] }
  0xa1   : > { %v2313_v3 = vadd.f32 %v2312_v62, %v1801_v56  ;;  %v1304_v56 = vsub.f32 %v280_v49, %v792_v50  ;;  %v1815_v62 = vmul.f32 %v1303_v51, %v1303_v51  ;;  %v293_v50 = vld [vmem:[%s3306_s17 + $0x1f8] sm:$0xff] }
  0xa2   : > { %v805_v51 = vld [vmem:[%s3312_s30 + $0x1f8] sm:$0xff] }
  0xa3   : > { %v2314_v8 = vadd.f32 %v2313_v3, %v1802_v61  ;;  %v1305_v61 = vsub.f32 %v281_v54, %v793_v55  ;;  %v1816_v3 = vmul.f32 %v1304_v56, %v1304_v56  ;;  %v294_v55 = vld [vmem:[%s3306_s17 + $0x200] sm:$0xff] }
  0xa4   : > { %v806_v56 = vld [vmem:[%s3312_s30 + $0x200] sm:$0xff] }
  0xa5   : > { %v2315_v13 = vadd.f32 %v2314_v8, %v1803_v2  ;;  %v1306_v2 = vsub.f32 %v282_v59, %v794_v60  ;;  %v1817_v8 = vmul.f32 %v1305_v61, %v1305_v61  ;;  %v295_v60 = vld [vmem:[%s3306_s17 + $0x208] sm:$0xff] }
  0xa6   : > { %v807_v61 = vld [vmem:[%s3312_s30 + $0x208] sm:$0xff] }
  0xa7   : > { %v2316_v18 = vadd.f32 %v2315_v13, %v1804_v7  ;;  %v1307_v7 = vsub.f32 %v283_v0, %v795_v1  ;;  %v1818_v13 = vmul.f32 %v1306_v2, %v1306_v2  ;;  %v296_v1 = vld [vmem:[%s3306_s17 + $0x210] sm:$0xff] }
  0xa8   : > { %v808_v2 = vld [vmem:[%s3312_s30 + $0x210] sm:$0xff] }
  0xa9   : > { %v2317_v23 = vadd.f32 %v2316_v18, %v1805_v12  ;;  %v1308_v12 = vsub.f32 %v284_v5, %v796_v6  ;;  %v1819_v18 = vmul.f32 %v1307_v7, %v1307_v7  ;;  %v297_v6 = vld [vmem:[%s3306_s17 + $0x218] sm:$0xff] }
  0xaa   : > { %v809_v7 = vld [vmem:[%s3312_s30 + $0x218] sm:$0xff] }
  0xab   : > { %v2318_v28 = vadd.f32 %v2317_v23, %v1806_v17  ;;  %v1309_v17 = vsub.f32 %v285_v10, %v797_v11  ;;  %v1820_v23 = vmul.f32 %v1308_v12, %v1308_v12  ;;  %v298_v11 = vld [vmem:[%s3306_s17 + $0x220] sm:$0xff] }
  0xac   : > { %v810_v12 = vld [vmem:[%s3312_s30 + $0x220] sm:$0xff] }
  0xad   : > { %v2319_v33 = vadd.f32 %v2318_v28, %v1807_v22  ;;  %v1310_v22 = vsub.f32 %v286_v15, %v798_v16  ;;  %v1821_v28 = vmul.f32 %v1309_v17, %v1309_v17  ;;  %v299_v16 = vld [vmem:[%s3306_s17 + $0x228] sm:$0xff] }
  0xae   : > { %v811_v17 = vld [vmem:[%s3312_s30 + $0x228] sm:$0xff] }
  0xaf   : > { %v2320_v38 = vadd.f32 %v2319_v33, %v1808_v27  ;;  %v1311_v27 = vsub.f32 %v287_v20, %v799_v21  ;;  %v1822_v33 = vmul.f32 %v1310_v22, %v1310_v22  ;;  %v300_v21 = vld [vmem:[%s3306_s17 + $0x230] sm:$0xff] }
  0xb0   : > { %v812_v22 = vld [vmem:[%s3312_s30 + $0x230] sm:$0xff] }
  0xb1   : > { %v2321_v43 = vadd.f32 %v2320_v38, %v1809_v32  ;;  %v1312_v32 = vsub.f32 %v288_v25, %v800_v26  ;;  %v1823_v38 = vmul.f32 %v1311_v27, %v1311_v27  ;;  %v301_v26 = vld [vmem:[%s3306_s17 + $0x238] sm:$0xff] }
  0xb2   : > { %v813_v27 = vld [vmem:[%s3312_s30 + $0x238] sm:$0xff] }
  0xb3   : > { %v2322_v48 = vadd.f32 %v2321_v43, %v1810_v37  ;;  %v1313_v37 = vsub.f32 %v289_v30, %v801_v31  ;;  %v1824_v43 = vmul.f32 %v1312_v32, %v1312_v32  ;;  %v302_v31 = vld [vmem:[%s3306_s17 + $0x240] sm:$0xff] }
  0xb4   : > { %v814_v32 = vld [vmem:[%s3312_s30 + $0x240] sm:$0xff] }
  0xb5   : > { %v2323_v53 = vadd.f32 %v2322_v48, %v1811_v42  ;;  %v1314_v42 = vsub.f32 %v290_v35, %v802_v36  ;;  %v1825_v48 = vmul.f32 %v1313_v37, %v1313_v37  ;;  %v303_v36 = vld [vmem:[%s3306_s17 + $0x248] sm:$0xff] }
  0xb6   : > { %v815_v37 = vld [vmem:[%s3312_s30 + $0x248] sm:$0xff] }
  0xb7   : > { %v2324_v58 = vadd.f32 %v2323_v53, %v1812_v47  ;;  %v1315_v47 = vsub.f32 %v291_v40, %v803_v41  ;;  %v1826_v53 = vmul.f32 %v1314_v42, %v1314_v42  ;;  %v304_v41 = vld [vmem:[%s3306_s17 + $0x250] sm:$0xff] }
  0xb8   : > { %v816_v42 = vld [vmem:[%s3312_s30 + $0x250] sm:$0xff] }
  0xb9   : > { %v2325_v63 = vadd.f32 %v2324_v58, %v1813_v52  ;;  %v1316_v52 = vsub.f32 %v292_v45, %v804_v46  ;;  %v1827_v58 = vmul.f32 %v1315_v47, %v1315_v47  ;;  %v305_v46 = vld [vmem:[%s3306_s17 + $0x258] sm:$0xff] }
  0xba   : > { %v817_v47 = vld [vmem:[%s3312_s30 + $0x258] sm:$0xff] }
  0xbb   : > { %v2326_v4 = vadd.f32 %v2325_v63, %v1814_v57  ;;  %v1317_v57 = vsub.f32 %v293_v50, %v805_v51  ;;  %v1828_v63 = vmul.f32 %v1316_v52, %v1316_v52  ;;  %v306_v51 = vld [vmem:[%s3306_s17 + $0x260] sm:$0xff] }
  0xbc   : > { %v818_v52 = vld [vmem:[%s3312_s30 + $0x260] sm:$0xff] }
  0xbd   : > { %v2327_v9 = vadd.f32 %v2326_v4, %v1815_v62  ;;  %v1318_v62 = vsub.f32 %v294_v55, %v806_v56  ;;  %v1829_v4 = vmul.f32 %v1317_v57, %v1317_v57  ;;  %v307_v56 = vld [vmem:[%s3306_s17 + $0x268] sm:$0xff] }
  0xbe   : > { %v819_v57 = vld [vmem:[%s3312_s30 + $0x268] sm:$0xff] }
  0xbf   : > { %v2328_v14 = vadd.f32 %v2327_v9, %v1816_v3  ;;  %v1319_v3 = vsub.f32 %v295_v60, %v807_v61  ;;  %v1830_v9 = vmul.f32 %v1318_v62, %v1318_v62  ;;  %v308_v61 = vld [vmem:[%s3306_s17 + $0x270] sm:$0xff] }
  0xc0   : > { %v820_v62 = vld [vmem:[%s3312_s30 + $0x270] sm:$0xff] }
  0xc1   : > { %v2329_v19 = vadd.f32 %v2328_v14, %v1817_v8  ;;  %v1320_v8 = vsub.f32 %v296_v1, %v808_v2  ;;  %v1831_v14 = vmul.f32 %v1319_v3, %v1319_v3  ;;  %v309_v2 = vld [vmem:[%s3306_s17 + $0x278] sm:$0xff] }
  0xc2   : > { %v821_v3 = vld [vmem:[%s3312_s30 + $0x278] sm:$0xff] }
  0xc3   : > { %v2330_v24 = vadd.f32 %v2329_v19, %v1818_v13  ;;  %v1321_v13 = vsub.f32 %v297_v6, %v809_v7  ;;  %v1832_v19 = vmul.f32 %v1320_v8, %v1320_v8  ;;  %v310_v7 = vld [vmem:[%s3306_s17 + $0x280] sm:$0xff] }
  0xc4   : > { %v822_v8 = vld [vmem:[%s3312_s30 + $0x280] sm:$0xff] }
  0xc5   : > { %v2331_v29 = vadd.f32 %v2330_v24, %v1819_v18  ;;  %v1322_v18 = vsub.f32 %v298_v11, %v810_v12  ;;  %v1833_v24 = vmul.f32 %v1321_v13, %v1321_v13  ;;  %v311_v12 = vld [vmem:[%s3306_s17 + $0x288] sm:$0xff] }
  0xc6   : > { %v823_v13 = vld [vmem:[%s3312_s30 + $0x288] sm:$0xff] }
  0xc7   : > { %v2332_v34 = vadd.f32 %v2331_v29, %v1820_v23  ;;  %v1323_v23 = vsub.f32 %v299_v16, %v811_v17  ;;  %v1834_v29 = vmul.f32 %v1322_v18, %v1322_v18  ;;  %v312_v17 = vld [vmem:[%s3306_s17 + $0x290] sm:$0xff] }
  0xc8   : > { %v824_v18 = vld [vmem:[%s3312_s30 + $0x290] sm:$0xff] }
  0xc9   : > { %v2333_v39 = vadd.f32 %v2332_v34, %v1821_v28  ;;  %v1324_v28 = vsub.f32 %v300_v21, %v812_v22  ;;  %v1835_v34 = vmul.f32 %v1323_v23, %v1323_v23  ;;  %v313_v22 = vld [vmem:[%s3306_s17 + $0x298] sm:$0xff] }
  0xca   : > { %v825_v23 = vld [vmem:[%s3312_s30 + $0x298] sm:$0xff] }
  0xcb   : > { %v2334_v44 = vadd.f32 %v2333_v39, %v1822_v33  ;;  %v1325_v33 = vsub.f32 %v301_v26, %v813_v27  ;;  %v1836_v39 = vmul.f32 %v1324_v28, %v1324_v28  ;;  %v314_v27 = vld [vmem:[%s3306_s17 + $0x2a0] sm:$0xff] }
  0xcc   : > { %v826_v28 = vld [vmem:[%s3312_s30 + $0x2a0] sm:$0xff] }
  0xcd   : > { %v2335_v49 = vadd.f32 %v2334_v44, %v1823_v38  ;;  %v1326_v38 = vsub.f32 %v302_v31, %v814_v32  ;;  %v1837_v44 = vmul.f32 %v1325_v33, %v1325_v33  ;;  %v315_v32 = vld [vmem:[%s3306_s17 + $0x2a8] sm:$0xff] }
  0xce   : > { %v827_v33 = vld [vmem:[%s3312_s30 + $0x2a8] sm:$0xff] }
  0xcf   : > { %v2336_v54 = vadd.f32 %v2335_v49, %v1824_v43  ;;  %v1327_v43 = vsub.f32 %v303_v36, %v815_v37  ;;  %v1838_v49 = vmul.f32 %v1326_v38, %v1326_v38  ;;  %v316_v37 = vld [vmem:[%s3306_s17 + $0x2b0] sm:$0xff] }
  0xd0   : > { %v828_v38 = vld [vmem:[%s3312_s30 + $0x2b0] sm:$0xff] }
  0xd1   : > { %v2337_v59 = vadd.f32 %v2336_v54, %v1825_v48  ;;  %v1328_v48 = vsub.f32 %v304_v41, %v816_v42  ;;  %v1839_v54 = vmul.f32 %v1327_v43, %v1327_v43  ;;  %v317_v42 = vld [vmem:[%s3306_s17 + $0x2b8] sm:$0xff] }
  0xd2   : > { %v829_v43 = vld [vmem:[%s3312_s30 + $0x2b8] sm:$0xff] }
  0xd3   : > { %v2338_v0 = vadd.f32 %v2337_v59, %v1826_v53  ;;  %v1329_v53 = vsub.f32 %v305_v46, %v817_v47  ;;  %v1840_v59 = vmul.f32 %v1328_v48, %v1328_v48  ;;  %v318_v47 = vld [vmem:[%s3306_s17 + $0x2c0] sm:$0xff] }
  0xd4   : > { %v830_v48 = vld [vmem:[%s3312_s30 + $0x2c0] sm:$0xff] }
  0xd5   : > { %v2339_v5 = vadd.f32 %v2338_v0, %v1827_v58  ;;  %v1330_v58 = vsub.f32 %v306_v51, %v818_v52  ;;  %v1841_v0 = vmul.f32 %v1329_v53, %v1329_v53  ;;  %v319_v52 = vld [vmem:[%s3306_s17 + $0x2c8] sm:$0xff] }
  0xd6   : > { %v831_v53 = vld [vmem:[%s3312_s30 + $0x2c8] sm:$0xff] }
  0xd7   : > { %v2340_v10 = vadd.f32 %v2339_v5, %v1828_v63  ;;  %v1331_v63 = vsub.f32 %v307_v56, %v819_v57  ;;  %v1842_v5 = vmul.f32 %v1330_v58, %v1330_v58  ;;  %v320_v57 = vld [vmem:[%s3306_s17 + $0x2d0] sm:$0xff] }
  0xd8   : > { %v832_v58 = vld [vmem:[%s3312_s30 + $0x2d0] sm:$0xff] }
  0xd9   : > { %v2341_v15 = vadd.f32 %v2340_v10, %v1829_v4  ;;  %v1332_v4 = vsub.f32 %v308_v61, %v820_v62  ;;  %v1843_v10 = vmul.f32 %v1331_v63, %v1331_v63  ;;  %v321_v62 = vld [vmem:[%s3306_s17 + $0x2d8] sm:$0xff] }
  0xda   : > { %v833_v63 = vld [vmem:[%s3312_s30 + $0x2d8] sm:$0xff] }
  0xdb   : > { %v2342_v20 = vadd.f32 %v2341_v15, %v1830_v9  ;;  %v1333_v9 = vsub.f32 %v309_v2, %v821_v3  ;;  %v1844_v15 = vmul.f32 %v1332_v4, %v1332_v4  ;;  %v322_v3 = vld [vmem:[%s3306_s17 + $0x2e0] sm:$0xff] }
  0xdc   : > { %v834_v4 = vld [vmem:[%s3312_s30 + $0x2e0] sm:$0xff] }
  0xdd   : > { %v2343_v25 = vadd.f32 %v2342_v20, %v1831_v14  ;;  %v1334_v14 = vsub.f32 %v310_v7, %v822_v8  ;;  %v1845_v20 = vmul.f32 %v1333_v9, %v1333_v9  ;;  %v323_v8 = vld [vmem:[%s3306_s17 + $0x2e8] sm:$0xff] }
  0xde   : > { %v835_v9 = vld [vmem:[%s3312_s30 + $0x2e8] sm:$0xff] }
  0xdf   : > { %v2344_v30 = vadd.f32 %v2343_v25, %v1832_v19  ;;  %v1335_v19 = vsub.f32 %v311_v12, %v823_v13  ;;  %v1846_v25 = vmul.f32 %v1334_v14, %v1334_v14  ;;  %v324_v13 = vld [vmem:[%s3306_s17 + $0x2f0] sm:$0xff] }
  0xe0   : > { %v836_v14 = vld [vmem:[%s3312_s30 + $0x2f0] sm:$0xff] }
  0xe1   : > { %v2345_v35 = vadd.f32 %v2344_v30, %v1833_v24  ;;  %v1336_v24 = vsub.f32 %v312_v17, %v824_v18  ;;  %v1847_v30 = vmul.f32 %v1335_v19, %v1335_v19  ;;  %v325_v18 = vld [vmem:[%s3306_s17 + $0x2f8] sm:$0xff] }
  0xe2   : > { %v837_v19 = vld [vmem:[%s3312_s30 + $0x2f8] sm:$0xff] }
  0xe3   : > { %v2346_v40 = vadd.f32 %v2345_v35, %v1834_v29  ;;  %v1337_v29 = vsub.f32 %v313_v22, %v825_v23  ;;  %v1848_v35 = vmul.f32 %v1336_v24, %v1336_v24  ;;  %v326_v23 = vld [vmem:[%s3306_s17 + $0x300] sm:$0xff] }
  0xe4   : > { %v838_v24 = vld [vmem:[%s3312_s30 + $0x300] sm:$0xff] }
  0xe5   : > { %v2347_v45 = vadd.f32 %v2346_v40, %v1835_v34  ;;  %v1338_v34 = vsub.f32 %v314_v27, %v826_v28  ;;  %v1849_v40 = vmul.f32 %v1337_v29, %v1337_v29  ;;  %v327_v28 = vld [vmem:[%s3306_s17 + $0x308] sm:$0xff] }
  0xe6   : > { %v839_v29 = vld [vmem:[%s3312_s30 + $0x308] sm:$0xff] }
  0xe7   : > { %v2348_v50 = vadd.f32 %v2347_v45, %v1836_v39  ;;  %v1339_v39 = vsub.f32 %v315_v32, %v827_v33  ;;  %v1850_v45 = vmul.f32 %v1338_v34, %v1338_v34  ;;  %v328_v33 = vld [vmem:[%s3306_s17 + $0x310] sm:$0xff] }
  0xe8   : > { %v840_v34 = vld [vmem:[%s3312_s30 + $0x310] sm:$0xff] }
  0xe9   : > { %v2349_v55 = vadd.f32 %v2348_v50, %v1837_v44  ;;  %v1340_v44 = vsub.f32 %v316_v37, %v828_v38  ;;  %v1851_v50 = vmul.f32 %v1339_v39, %v1339_v39  ;;  %v329_v38 = vld [vmem:[%s3306_s17 + $0x318] sm:$0xff] }
  0xea   : > { %v841_v39 = vld [vmem:[%s3312_s30 + $0x318] sm:$0xff] }
  0xeb   : > { %v2350_v60 = vadd.f32 %v2349_v55, %v1838_v49  ;;  %v1341_v49 = vsub.f32 %v317_v42, %v829_v43  ;;  %v1852_v55 = vmul.f32 %v1340_v44, %v1340_v44  ;;  %v330_v43 = vld [vmem:[%s3306_s17 + $0x320] sm:$0xff] }
  0xec   : > { %v842_v44 = vld [vmem:[%s3312_s30 + $0x320] sm:$0xff] }
  0xed   : > { %v2351_v1 = vadd.f32 %v2350_v60, %v1839_v54  ;;  %v1342_v54 = vsub.f32 %v318_v47, %v830_v48  ;;  %v1853_v60 = vmul.f32 %v1341_v49, %v1341_v49  ;;  %v331_v48 = vld [vmem:[%s3306_s17 + $0x328] sm:$0xff] }
  0xee   : > { %v843_v49 = vld [vmem:[%s3312_s30 + $0x328] sm:$0xff] }
  0xef   : > { %v2352_v6 = vadd.f32 %v2351_v1, %v1840_v59  ;;  %v1343_v59 = vsub.f32 %v319_v52, %v831_v53  ;;  %v1854_v1 = vmul.f32 %v1342_v54, %v1342_v54  ;;  %v332_v53 = vld [vmem:[%s3306_s17 + $0x330] sm:$0xff] }
  0xf0   : > { %v844_v54 = vld [vmem:[%s3312_s30 + $0x330] sm:$0xff] }
  0xf1   : > { %v2353_v11 = vadd.f32 %v2352_v6, %v1841_v0  ;;  %v1344_v0 = vsub.f32 %v320_v57, %v832_v58  ;;  %v1855_v6 = vmul.f32 %v1343_v59, %v1343_v59  ;;  %v333_v58 = vld [vmem:[%s3306_s17 + $0x338] sm:$0xff] }
  0xf2   : > { %v845_v59 = vld [vmem:[%s3312_s30 + $0x338] sm:$0xff] }
  0xf3   : > { %v2354_v16 = vadd.f32 %v2353_v11, %v1842_v5  ;;  %v1345_v5 = vsub.f32 %v321_v62, %v833_v63  ;;  %v1856_v11 = vmul.f32 %v1344_v0, %v1344_v0  ;;  %v334_v63 = vld [vmem:[%s3306_s17 + $0x340] sm:$0xff] }
  0xf4   : > { %v846_v0 = vld [vmem:[%s3312_s30 + $0x340] sm:$0xff] }
  0xf5   : > { %v2355_v21 = vadd.f32 %v2354_v16, %v1843_v10  ;;  %v1346_v10 = vsub.f32 %v322_v3, %v834_v4  ;;  %v1857_v16 = vmul.f32 %v1345_v5, %v1345_v5  ;;  %v335_v4 = vld [vmem:[%s3306_s17 + $0x348] sm:$0xff] }
  0xf6   : > { %v847_v5 = vld [vmem:[%s3312_s30 + $0x348] sm:$0xff] }
  0xf7   : > { %v2356_v26 = vadd.f32 %v2355_v21, %v1844_v15  ;;  %v1347_v15 = vsub.f32 %v323_v8, %v835_v9  ;;  %v1858_v21 = vmul.f32 %v1346_v10, %v1346_v10  ;;  %v336_v9 = vld [vmem:[%s3306_s17 + $0x350] sm:$0xff] }
  0xf8   : > { %v848_v10 = vld [vmem:[%s3312_s30 + $0x350] sm:$0xff] }
  0xf9   : > { %v2357_v31 = vadd.f32 %v2356_v26, %v1845_v20  ;;  %v1348_v20 = vsub.f32 %v324_v13, %v836_v14  ;;  %v1859_v26 = vmul.f32 %v1347_v15, %v1347_v15  ;;  %v337_v14 = vld [vmem:[%s3306_s17 + $0x358] sm:$0xff] }
  0xfa   : > { %v849_v15 = vld [vmem:[%s3312_s30 + $0x358] sm:$0xff] }
  0xfb   : > { %v2358_v36 = vadd.f32 %v2357_v31, %v1846_v25  ;;  %v1349_v25 = vsub.f32 %v325_v18, %v837_v19  ;;  %v1860_v31 = vmul.f32 %v1348_v20, %v1348_v20  ;;  %v338_v19 = vld [vmem:[%s3306_s17 + $0x360] sm:$0xff] }
  0xfc   : > { %v850_v20 = vld [vmem:[%s3312_s30 + $0x360] sm:$0xff] }
  0xfd   : > { %v2359_v41 = vadd.f32 %v2358_v36, %v1847_v30  ;;  %v1350_v30 = vsub.f32 %v326_v23, %v838_v24  ;;  %v1861_v36 = vmul.f32 %v1349_v25, %v1349_v25  ;;  %v339_v24 = vld [vmem:[%s3306_s17 + $0x368] sm:$0xff] }
  0xfe   : > { %v851_v25 = vld [vmem:[%s3312_s30 + $0x368] sm:$0xff] }
  0xff   : > { %v2360_v46 = vadd.f32 %v2359_v41, %v1848_v35  ;;  %v1351_v35 = vsub.f32 %v327_v28, %v839_v29  ;;  %v1862_v41 = vmul.f32 %v1350_v30, %v1350_v30  ;;  %v340_v29 = vld [vmem:[%s3306_s17 + $0x370] sm:$0xff] }
 0x100   : > { %v852_v30 = vld [vmem:[%s3312_s30 + $0x370] sm:$0xff] }
 0x101   : > { %v2361_v51 = vadd.f32 %v2360_v46, %v1849_v40  ;;  %v1352_v40 = vsub.f32 %v328_v33, %v840_v34  ;;  %v1863_v46 = vmul.f32 %v1351_v35, %v1351_v35  ;;  %v341_v34 = vld [vmem:[%s3306_s17 + $0x378] sm:$0xff] }
 0x102   : > { %v853_v35 = vld [vmem:[%s3312_s30 + $0x378] sm:$0xff] }
 0x103   : > { %v2362_v56 = vadd.f32 %v2361_v51, %v1850_v45  ;;  %v1353_v45 = vsub.f32 %v329_v38, %v841_v39  ;;  %v1864_v51 = vmul.f32 %v1352_v40, %v1352_v40  ;;  %v342_v39 = vld [vmem:[%s3306_s17 + $0x380] sm:$0xff] }
 0x104   : > { %v854_v40 = vld [vmem:[%s3312_s30 + $0x380] sm:$0xff] }
 0x105   : > { %v2363_v61 = vadd.f32 %v2362_v56, %v1851_v50  ;;  %v1354_v50 = vsub.f32 %v330_v43, %v842_v44  ;;  %v1865_v56 = vmul.f32 %v1353_v45, %v1353_v45  ;;  %v343_v44 = vld [vmem:[%s3306_s17 + $0x388] sm:$0xff] }
 0x106   : > { %v855_v45 = vld [vmem:[%s3312_s30 + $0x388] sm:$0xff] }
 0x107   : > { %v2364_v2 = vadd.f32 %v2363_v61, %v1852_v55  ;;  %v1355_v55 = vsub.f32 %v331_v48, %v843_v49  ;;  %v1866_v61 = vmul.f32 %v1354_v50, %v1354_v50  ;;  %v344_v49 = vld [vmem:[%s3306_s17 + $0x390] sm:$0xff] }
 0x108   : > { %v856_v50 = vld [vmem:[%s3312_s30 + $0x390] sm:$0xff] }
 0x109   : > { %v2365_v7 = vadd.f32 %v2364_v2, %v1853_v60  ;;  %v1356_v60 = vsub.f32 %v332_v53, %v844_v54  ;;  %v1867_v2 = vmul.f32 %v1355_v55, %v1355_v55  ;;  %v345_v54 = vld [vmem:[%s3306_s17 + $0x398] sm:$0xff] }
 0x10a   : > { %v857_v55 = vld [vmem:[%s3312_s30 + $0x398] sm:$0xff] }
 0x10b   : > { %v2366_v12 = vadd.f32 %v2365_v7, %v1854_v1  ;;  %v1357_v1 = vsub.f32 %v333_v58, %v845_v59  ;;  %v1868_v7 = vmul.f32 %v1356_v60, %v1356_v60  ;;  %v346_v59 = vld [vmem:[%s3306_s17 + $0x3a0] sm:$0xff] }
 0x10c   : > { %v858_v60 = vld [vmem:[%s3312_s30 + $0x3a0] sm:$0xff] }
 0x10d   : > { %v2367_v17 = vadd.f32 %v2366_v12, %v1855_v6  ;;  %v1358_v6 = vsub.f32 %v334_v63, %v846_v0  ;;  %v1869_v12 = vmul.f32 %v1357_v1, %v1357_v1  ;;  %v347_v0 = vld [vmem:[%s3306_s17 + $0x3a8] sm:$0xff] }
 0x10e   : > { %v859_v1 = vld [vmem:[%s3312_s30 + $0x3a8] sm:$0xff] }
 0x10f   : > { %v2368_v22 = vadd.f32 %v2367_v17, %v1856_v11  ;;  %v1359_v11 = vsub.f32 %v335_v4, %v847_v5  ;;  %v1870_v17 = vmul.f32 %v1358_v6, %v1358_v6  ;;  %v348_v5 = vld [vmem:[%s3306_s17 + $0x3b0] sm:$0xff] }
 0x110   : > { %v860_v6 = vld [vmem:[%s3312_s30 + $0x3b0] sm:$0xff] }
 0x111   : > { %v2369_v27 = vadd.f32 %v2368_v22, %v1857_v16  ;;  %v1360_v16 = vsub.f32 %v336_v9, %v848_v10  ;;  %v1871_v22 = vmul.f32 %v1359_v11, %v1359_v11  ;;  %v349_v10 = vld [vmem:[%s3306_s17 + $0x3b8] sm:$0xff] }
 0x112   : > { %v861_v11 = vld [vmem:[%s3312_s30 + $0x3b8] sm:$0xff] }
 0x113   : > { %v2370_v32 = vadd.f32 %v2369_v27, %v1858_v21  ;;  %v1361_v21 = vsub.f32 %v337_v14, %v849_v15  ;;  %v1872_v27 = vmul.f32 %v1360_v16, %v1360_v16  ;;  %v350_v15 = vld [vmem:[%s3306_s17 + $0x3c0] sm:$0xff] }
 0x114   : > { %v862_v16 = vld [vmem:[%s3312_s30 + $0x3c0] sm:$0xff] }
 0x115   : > { %v2371_v37 = vadd.f32 %v2370_v32, %v1859_v26  ;;  %v1362_v26 = vsub.f32 %v338_v19, %v850_v20  ;;  %v1873_v32 = vmul.f32 %v1361_v21, %v1361_v21  ;;  %v351_v20 = vld [vmem:[%s3306_s17 + $0x3c8] sm:$0xff] }
 0x116   : > { %v863_v21 = vld [vmem:[%s3312_s30 + $0x3c8] sm:$0xff] }
 0x117   : > { %v2372_v42 = vadd.f32 %v2371_v37, %v1860_v31  ;;  %v1363_v31 = vsub.f32 %v339_v24, %v851_v25  ;;  %v1874_v37 = vmul.f32 %v1362_v26, %v1362_v26  ;;  %v352_v25 = vld [vmem:[%s3306_s17 + $0x3d0] sm:$0xff] }
 0x118   : > { %v864_v26 = vld [vmem:[%s3312_s30 + $0x3d0] sm:$0xff] }
 0x119   : > { %v2373_v47 = vadd.f32 %v2372_v42, %v1861_v36  ;;  %v1364_v36 = vsub.f32 %v340_v29, %v852_v30  ;;  %v1875_v42 = vmul.f32 %v1363_v31, %v1363_v31  ;;  %v353_v30 = vld [vmem:[%s3306_s17 + $0x3d8] sm:$0xff] }
 0x11a   : > { %v865_v31 = vld [vmem:[%s3312_s30 + $0x3d8] sm:$0xff] }
 0x11b   : > { %v2374_v52 = vadd.f32 %v2373_v47, %v1862_v41  ;;  %v1365_v41 = vsub.f32 %v341_v34, %v853_v35  ;;  %v1876_v47 = vmul.f32 %v1364_v36, %v1364_v36  ;;  %v354_v35 = vld [vmem:[%s3306_s17 + $0x3e0] sm:$0xff] }
 0x11c   : > { %v866_v36 = vld [vmem:[%s3312_s30 + $0x3e0] sm:$0xff] }
 0x11d   : > { %v2375_v57 = vadd.f32 %v2374_v52, %v1863_v46  ;;  %v1366_v46 = vsub.f32 %v342_v39, %v854_v40  ;;  %v1877_v52 = vmul.f32 %v1365_v41, %v1365_v41  ;;  %v355_v40 = vld [vmem:[%s3306_s17 + $0x3e8] sm:$0xff] }
 0x11e   : > { %v867_v41 = vld [vmem:[%s3312_s30 + $0x3e8] sm:$0xff] }
 0x11f   : > { %v2376_v62 = vadd.f32 %v2375_v57, %v1864_v51  ;;  %v1367_v51 = vsub.f32 %v343_v44, %v855_v45  ;;  %v1878_v57 = vmul.f32 %v1366_v46, %v1366_v46  ;;  %v356_v45 = vld [vmem:[%s3306_s17 + $0x3f0] sm:$0xff] }
 0x120   : > { %v868_v46 = vld [vmem:[%s3312_s30 + $0x3f0] sm:$0xff] }
 0x121   : > { %v2377_v3 = vadd.f32 %v2376_v62, %v1865_v56  ;;  %v1368_v56 = vsub.f32 %v344_v49, %v856_v50  ;;  %v1879_v62 = vmul.f32 %v1367_v51, %v1367_v51  ;;  %v357_v50 = vld [vmem:[%s3306_s17 + $0x3f8] sm:$0xff] }
 0x122   : > { %v869_v51 = vld [vmem:[%s3312_s30 + $0x3f8] sm:$0xff] }
 0x123   : > { %v2378_v8 = vadd.f32 %v2377_v3, %v1866_v61  ;;  %v1369_v61 = vsub.f32 %v345_v54, %v857_v55  ;;  %v1880_v3 = vmul.f32 %v1368_v56, %v1368_v56  ;;  %v358_v55 = vld [vmem:[%s3306_s17 + $0x400] sm:$0xff] }
 0x124   : > { %v870_v56 = vld [vmem:[%s3312_s30 + $0x400] sm:$0xff] }
 0x125   : > { %v2379_v13 = vadd.f32 %v2378_v8, %v1867_v2  ;;  %v1370_v2 = vsub.f32 %v346_v59, %v858_v60  ;;  %v1881_v8 = vmul.f32 %v1369_v61, %v1369_v61  ;;  %v359_v60 = vld [vmem:[%s3306_s17 + $0x408] sm:$0xff] }
 0x126   : > { %v871_v61 = vld [vmem:[%s3312_s30 + $0x408] sm:$0xff] }
 0x127   : > { %v2380_v18 = vadd.f32 %v2379_v13, %v1868_v7  ;;  %v1371_v7 = vsub.f32 %v347_v0, %v859_v1  ;;  %v1882_v13 = vmul.f32 %v1370_v2, %v1370_v2  ;;  %v360_v1 = vld [vmem:[%s3306_s17 + $0x410] sm:$0xff] }
 0x128   : > { %v872_v2 = vld [vmem:[%s3312_s30 + $0x410] sm:$0xff] }
 0x129   : > { %v2381_v23 = vadd.f32 %v2380_v18, %v1869_v12  ;;  %v1372_v12 = vsub.f32 %v348_v5, %v860_v6  ;;  %v1883_v18 = vmul.f32 %v1371_v7, %v1371_v7  ;;  %v361_v6 = vld [vmem:[%s3306_s17 + $0x418] sm:$0xff] }
 0x12a   : > { %v873_v7 = vld [vmem:[%s3312_s30 + $0x418] sm:$0xff] }
 0x12b   : > { %v2382_v28 = vadd.f32 %v2381_v23, %v1870_v17  ;;  %v1373_v17 = vsub.f32 %v349_v10, %v861_v11  ;;  %v1884_v23 = vmul.f32 %v1372_v12, %v1372_v12  ;;  %v362_v11 = vld [vmem:[%s3306_s17 + $0x420] sm:$0xff] }
 0x12c   : > { %v874_v12 = vld [vmem:[%s3312_s30 + $0x420] sm:$0xff] }
 0x12d   : > { %v2383_v33 = vadd.f32 %v2382_v28, %v1871_v22  ;;  %v1374_v22 = vsub.f32 %v350_v15, %v862_v16  ;;  %v1885_v28 = vmul.f32 %v1373_v17, %v1373_v17  ;;  %v363_v16 = vld [vmem:[%s3306_s17 + $0x428] sm:$0xff] }
 0x12e   : > { %v875_v17 = vld [vmem:[%s3312_s30 + $0x428] sm:$0xff] }
 0x12f   : > { %v2384_v38 = vadd.f32 %v2383_v33, %v1872_v27  ;;  %v1375_v27 = vsub.f32 %v351_v20, %v863_v21  ;;  %v1886_v33 = vmul.f32 %v1374_v22, %v1374_v22  ;;  %v364_v21 = vld [vmem:[%s3306_s17 + $0x430] sm:$0xff] }
 0x130   : > { %v876_v22 = vld [vmem:[%s3312_s30 + $0x430] sm:$0xff] }
 0x131   : > { %v2385_v43 = vadd.f32 %v2384_v38, %v1873_v32  ;;  %v1376_v32 = vsub.f32 %v352_v25, %v864_v26  ;;  %v1887_v38 = vmul.f32 %v1375_v27, %v1375_v27  ;;  %v365_v26 = vld [vmem:[%s3306_s17 + $0x438] sm:$0xff] }
 0x132   : > { %v877_v27 = vld [vmem:[%s3312_s30 + $0x438] sm:$0xff] }
 0x133   : > { %v2386_v48 = vadd.f32 %v2385_v43, %v1874_v37  ;;  %v1377_v37 = vsub.f32 %v353_v30, %v865_v31  ;;  %v1888_v43 = vmul.f32 %v1376_v32, %v1376_v32  ;;  %v366_v31 = vld [vmem:[%s3306_s17 + $0x440] sm:$0xff] }
 0x134   : > { %v878_v32 = vld [vmem:[%s3312_s30 + $0x440] sm:$0xff] }
 0x135   : > { %v2387_v53 = vadd.f32 %v2386_v48, %v1875_v42  ;;  %v1378_v42 = vsub.f32 %v354_v35, %v866_v36  ;;  %v1889_v48 = vmul.f32 %v1377_v37, %v1377_v37  ;;  %v367_v36 = vld [vmem:[%s3306_s17 + $0x448] sm:$0xff] }
 0x136   : > { %v879_v37 = vld [vmem:[%s3312_s30 + $0x448] sm:$0xff] }
 0x137   : > { %v2388_v58 = vadd.f32 %v2387_v53, %v1876_v47  ;;  %v1379_v47 = vsub.f32 %v355_v40, %v867_v41  ;;  %v1890_v53 = vmul.f32 %v1378_v42, %v1378_v42  ;;  %v368_v41 = vld [vmem:[%s3306_s17 + $0x450] sm:$0xff] }
 0x138   : > { %v880_v42 = vld [vmem:[%s3312_s30 + $0x450] sm:$0xff] }
 0x139   : > { %v2389_v63 = vadd.f32 %v2388_v58, %v1877_v52  ;;  %v1380_v52 = vsub.f32 %v356_v45, %v868_v46  ;;  %v1891_v58 = vmul.f32 %v1379_v47, %v1379_v47  ;;  %v369_v46 = vld [vmem:[%s3306_s17 + $0x458] sm:$0xff] }
 0x13a   : > { %v881_v47 = vld [vmem:[%s3312_s30 + $0x458] sm:$0xff] }
 0x13b   : > { %v2390_v4 = vadd.f32 %v2389_v63, %v1878_v57  ;;  %v1381_v57 = vsub.f32 %v357_v50, %v869_v51  ;;  %v1892_v63 = vmul.f32 %v1380_v52, %v1380_v52  ;;  %v370_v51 = vld [vmem:[%s3306_s17 + $0x460] sm:$0xff] }
 0x13c   : > { %v882_v52 = vld [vmem:[%s3312_s30 + $0x460] sm:$0xff] }
 0x13d   : > { %v2391_v9 = vadd.f32 %v2390_v4, %v1879_v62  ;;  %v1382_v62 = vsub.f32 %v358_v55, %v870_v56  ;;  %v1893_v4 = vmul.f32 %v1381_v57, %v1381_v57  ;;  %v371_v56 = vld [vmem:[%s3306_s17 + $0x468] sm:$0xff] }
 0x13e   : > { %v883_v57 = vld [vmem:[%s3312_s30 + $0x468] sm:$0xff] }
 0x13f   : > { %v2392_v14 = vadd.f32 %v2391_v9, %v1880_v3  ;;  %v1383_v3 = vsub.f32 %v359_v60, %v871_v61  ;;  %v1894_v9 = vmul.f32 %v1382_v62, %v1382_v62  ;;  %v372_v61 = vld [vmem:[%s3306_s17 + $0x470] sm:$0xff] }
 0x140   : > { %v884_v62 = vld [vmem:[%s3312_s30 + $0x470] sm:$0xff] }
 0x141   : > { %v2393_v19 = vadd.f32 %v2392_v14, %v1881_v8  ;;  %v1384_v8 = vsub.f32 %v360_v1, %v872_v2  ;;  %v1895_v14 = vmul.f32 %v1383_v3, %v1383_v3  ;;  %v373_v2 = vld [vmem:[%s3306_s17 + $0x478] sm:$0xff] }
 0x142   : > { %v885_v3 = vld [vmem:[%s3312_s30 + $0x478] sm:$0xff] }
 0x143   : > { %v2394_v24 = vadd.f32 %v2393_v19, %v1882_v13  ;;  %v1385_v13 = vsub.f32 %v361_v6, %v873_v7  ;;  %v1896_v19 = vmul.f32 %v1384_v8, %v1384_v8  ;;  %v374_v7 = vld [vmem:[%s3306_s17 + $0x480] sm:$0xff] }
 0x144   : > { %v886_v8 = vld [vmem:[%s3312_s30 + $0x480] sm:$0xff] }
 0x145   : > { %v2395_v29 = vadd.f32 %v2394_v24, %v1883_v18  ;;  %v1386_v18 = vsub.f32 %v362_v11, %v874_v12  ;;  %v1897_v24 = vmul.f32 %v1385_v13, %v1385_v13  ;;  %v375_v12 = vld [vmem:[%s3306_s17 + $0x488] sm:$0xff] }
 0x146   : > { %v887_v13 = vld [vmem:[%s3312_s30 + $0x488] sm:$0xff] }
 0x147   : > { %v2396_v34 = vadd.f32 %v2395_v29, %v1884_v23  ;;  %v1387_v23 = vsub.f32 %v363_v16, %v875_v17  ;;  %v1898_v29 = vmul.f32 %v1386_v18, %v1386_v18  ;;  %v376_v17 = vld [vmem:[%s3306_s17 + $0x490] sm:$0xff] }
 0x148   : > { %v888_v18 = vld [vmem:[%s3312_s30 + $0x490] sm:$0xff] }
 0x149   : > { %v2397_v39 = vadd.f32 %v2396_v34, %v1885_v28  ;;  %v1388_v28 = vsub.f32 %v364_v21, %v876_v22  ;;  %v1899_v34 = vmul.f32 %v1387_v23, %v1387_v23  ;;  %v377_v22 = vld [vmem:[%s3306_s17 + $0x498] sm:$0xff] }
 0x14a   : > { %v889_v23 = vld [vmem:[%s3312_s30 + $0x498] sm:$0xff] }
 0x14b   : > { %v2398_v44 = vadd.f32 %v2397_v39, %v1886_v33  ;;  %v1389_v33 = vsub.f32 %v365_v26, %v877_v27  ;;  %v1900_v39 = vmul.f32 %v1388_v28, %v1388_v28  ;;  %v378_v27 = vld [vmem:[%s3306_s17 + $0x4a0] sm:$0xff] }
 0x14c   : > { %v890_v28 = vld [vmem:[%s3312_s30 + $0x4a0] sm:$0xff] }
 0x14d   : > { %v2399_v49 = vadd.f32 %v2398_v44, %v1887_v38  ;;  %v1390_v38 = vsub.f32 %v366_v31, %v878_v32  ;;  %v1901_v44 = vmul.f32 %v1389_v33, %v1389_v33  ;;  %v379_v32 = vld [vmem:[%s3306_s17 + $0x4a8] sm:$0xff] }
 0x14e   : > { %v891_v33 = vld [vmem:[%s3312_s30 + $0x4a8] sm:$0xff] }
 0x14f   : > { %v2400_v54 = vadd.f32 %v2399_v49, %v1888_v43  ;;  %v1391_v43 = vsub.f32 %v367_v36, %v879_v37  ;;  %v1902_v49 = vmul.f32 %v1390_v38, %v1390_v38  ;;  %v380_v37 = vld [vmem:[%s3306_s17 + $0x4b0] sm:$0xff] }
 0x150   : > { %v892_v38 = vld [vmem:[%s3312_s30 + $0x4b0] sm:$0xff] }
 0x151   : > { %v2401_v59 = vadd.f32 %v2400_v54, %v1889_v48  ;;  %v1392_v48 = vsub.f32 %v368_v41, %v880_v42  ;;  %v1903_v54 = vmul.f32 %v1391_v43, %v1391_v43  ;;  %v381_v42 = vld [vmem:[%s3306_s17 + $0x4b8] sm:$0xff] }
 0x152   : > { %v893_v43 = vld [vmem:[%s3312_s30 + $0x4b8] sm:$0xff] }
 0x153   : > { %v2402_v0 = vadd.f32 %v2401_v59, %v1890_v53  ;;  %v1393_v53 = vsub.f32 %v369_v46, %v881_v47  ;;  %v1904_v59 = vmul.f32 %v1392_v48, %v1392_v48  ;;  %v382_v47 = vld [vmem:[%s3306_s17 + $0x4c0] sm:$0xff] }
 0x154   : > { %v894_v48 = vld [vmem:[%s3312_s30 + $0x4c0] sm:$0xff] }
 0x155   : > { %v2403_v5 = vadd.f32 %v2402_v0, %v1891_v58  ;;  %v1394_v58 = vsub.f32 %v370_v51, %v882_v52  ;;  %v1905_v0 = vmul.f32 %v1393_v53, %v1393_v53  ;;  %v383_v52 = vld [vmem:[%s3306_s17 + $0x4c8] sm:$0xff] }
 0x156   : > { %v895_v53 = vld [vmem:[%s3312_s30 + $0x4c8] sm:$0xff] }
 0x157   : > { %v2404_v10 = vadd.f32 %v2403_v5, %v1892_v63  ;;  %v1395_v63 = vsub.f32 %v371_v56, %v883_v57  ;;  %v1906_v5 = vmul.f32 %v1394_v58, %v1394_v58  ;;  %v384_v57 = vld [vmem:[%s3306_s17 + $0x4d0] sm:$0xff] }
 0x158   : > { %v896_v58 = vld [vmem:[%s3312_s30 + $0x4d0] sm:$0xff] }
 0x159   : > { %v2405_v15 = vadd.f32 %v2404_v10, %v1893_v4  ;;  %v1396_v4 = vsub.f32 %v372_v61, %v884_v62  ;;  %v1907_v10 = vmul.f32 %v1395_v63, %v1395_v63  ;;  %v385_v62 = vld [vmem:[%s3306_s17 + $0x4d8] sm:$0xff] }
 0x15a   : > { %v897_v63 = vld [vmem:[%s3312_s30 + $0x4d8] sm:$0xff] }
 0x15b   : > { %v2406_v20 = vadd.f32 %v2405_v15, %v1894_v9  ;;  %v1397_v9 = vsub.f32 %v373_v2, %v885_v3  ;;  %v1908_v15 = vmul.f32 %v1396_v4, %v1396_v4  ;;  %v386_v3 = vld [vmem:[%s3306_s17 + $0x4e0] sm:$0xff] }
 0x15c   : > { %v898_v4 = vld [vmem:[%s3312_s30 + $0x4e0] sm:$0xff] }
 0x15d   : > { %v2407_v25 = vadd.f32 %v2406_v20, %v1895_v14  ;;  %v1398_v14 = vsub.f32 %v374_v7, %v886_v8  ;;  %v1909_v20 = vmul.f32 %v1397_v9, %v1397_v9  ;;  %v387_v8 = vld [vmem:[%s3306_s17 + $0x4e8] sm:$0xff] }
 0x15e   : > { %v899_v9 = vld [vmem:[%s3312_s30 + $0x4e8] sm:$0xff] }
 0x15f   : > { %v2408_v30 = vadd.f32 %v2407_v25, %v1896_v19  ;;  %v1399_v19 = vsub.f32 %v375_v12, %v887_v13  ;;  %v1910_v25 = vmul.f32 %v1398_v14, %v1398_v14  ;;  %v388_v13 = vld [vmem:[%s3306_s17 + $0x4f0] sm:$0xff] }
 0x160   : > { %v900_v14 = vld [vmem:[%s3312_s30 + $0x4f0] sm:$0xff] }
 0x161   : > { %v2409_v35 = vadd.f32 %v2408_v30, %v1897_v24  ;;  %v1400_v24 = vsub.f32 %v376_v17, %v888_v18  ;;  %v1911_v30 = vmul.f32 %v1399_v19, %v1399_v19  ;;  %v389_v18 = vld [vmem:[%s3306_s17 + $0x4f8] sm:$0xff] }
 0x162   : > { %v901_v19 = vld [vmem:[%s3312_s30 + $0x4f8] sm:$0xff] }
 0x163   : > { %v2410_v40 = vadd.f32 %v2409_v35, %v1898_v29  ;;  %v1401_v29 = vsub.f32 %v377_v22, %v889_v23  ;;  %v1912_v35 = vmul.f32 %v1400_v24, %v1400_v24  ;;  %v390_v23 = vld [vmem:[%s3306_s17 + $0x500] sm:$0xff] }
 0x164   : > { %v902_v24 = vld [vmem:[%s3312_s30 + $0x500] sm:$0xff] }
 0x165   : > { %v2411_v45 = vadd.f32 %v2410_v40, %v1899_v34  ;;  %v1402_v34 = vsub.f32 %v378_v27, %v890_v28  ;;  %v1913_v40 = vmul.f32 %v1401_v29, %v1401_v29  ;;  %v391_v28 = vld [vmem:[%s3306_s17 + $0x508] sm:$0xff] }
 0x166   : > { %v903_v29 = vld [vmem:[%s3312_s30 + $0x508] sm:$0xff] }
 0x167   : > { %v2412_v50 = vadd.f32 %v2411_v45, %v1900_v39  ;;  %v1403_v39 = vsub.f32 %v379_v32, %v891_v33  ;;  %v1914_v45 = vmul.f32 %v1402_v34, %v1402_v34  ;;  %v392_v33 = vld [vmem:[%s3306_s17 + $0x510] sm:$0xff] }
 0x168   : > { %v904_v34 = vld [vmem:[%s3312_s30 + $0x510] sm:$0xff] }
 0x169   : > { %v2413_v55 = vadd.f32 %v2412_v50, %v1901_v44  ;;  %v1404_v44 = vsub.f32 %v380_v37, %v892_v38  ;;  %v1915_v50 = vmul.f32 %v1403_v39, %v1403_v39  ;;  %v393_v38 = vld [vmem:[%s3306_s17 + $0x518] sm:$0xff] }
 0x16a   : > { %v905_v39 = vld [vmem:[%s3312_s30 + $0x518] sm:$0xff] }
 0x16b   : > { %v2414_v60 = vadd.f32 %v2413_v55, %v1902_v49  ;;  %v1405_v49 = vsub.f32 %v381_v42, %v893_v43  ;;  %v1916_v55 = vmul.f32 %v1404_v44, %v1404_v44  ;;  %v394_v43 = vld [vmem:[%s3306_s17 + $0x520] sm:$0xff] }
 0x16c   : > { %v906_v44 = vld [vmem:[%s3312_s30 + $0x520] sm:$0xff] }
 0x16d   : > { %v2415_v1 = vadd.f32 %v2414_v60, %v1903_v54  ;;  %v1406_v54 = vsub.f32 %v382_v47, %v894_v48  ;;  %v1917_v60 = vmul.f32 %v1405_v49, %v1405_v49  ;;  %v395_v48 = vld [vmem:[%s3306_s17 + $0x528] sm:$0xff] }
 0x16e   : > { %v907_v49 = vld [vmem:[%s3312_s30 + $0x528] sm:$0xff] }
 0x16f   : > { %v2416_v6 = vadd.f32 %v2415_v1, %v1904_v59  ;;  %v1407_v59 = vsub.f32 %v383_v52, %v895_v53  ;;  %v1918_v1 = vmul.f32 %v1406_v54, %v1406_v54  ;;  %v396_v53 = vld [vmem:[%s3306_s17 + $0x530] sm:$0xff] }
 0x170   : > { %v908_v54 = vld [vmem:[%s3312_s30 + $0x530] sm:$0xff] }
 0x171   : > { %v2417_v11 = vadd.f32 %v2416_v6, %v1905_v0  ;;  %v1408_v0 = vsub.f32 %v384_v57, %v896_v58  ;;  %v1919_v6 = vmul.f32 %v1407_v59, %v1407_v59  ;;  %v397_v58 = vld [vmem:[%s3306_s17 + $0x538] sm:$0xff] }
 0x172   : > { %v909_v59 = vld [vmem:[%s3312_s30 + $0x538] sm:$0xff] }
 0x173   : > { %v2418_v16 = vadd.f32 %v2417_v11, %v1906_v5  ;;  %v1409_v5 = vsub.f32 %v385_v62, %v897_v63  ;;  %v1920_v11 = vmul.f32 %v1408_v0, %v1408_v0  ;;  %v398_v63 = vld [vmem:[%s3306_s17 + $0x540] sm:$0xff] }
 0x174   : > { %v910_v0 = vld [vmem:[%s3312_s30 + $0x540] sm:$0xff] }
 0x175   : > { %v2419_v21 = vadd.f32 %v2418_v16, %v1907_v10  ;;  %v1410_v10 = vsub.f32 %v386_v3, %v898_v4  ;;  %v1921_v16 = vmul.f32 %v1409_v5, %v1409_v5  ;;  %v399_v4 = vld [vmem:[%s3306_s17 + $0x548] sm:$0xff] }
 0x176   : > { %v911_v5 = vld [vmem:[%s3312_s30 + $0x548] sm:$0xff] }
 0x177   : > { %v2420_v26 = vadd.f32 %v2419_v21, %v1908_v15  ;;  %v1411_v15 = vsub.f32 %v387_v8, %v899_v9  ;;  %v1922_v21 = vmul.f32 %v1410_v10, %v1410_v10  ;;  %v400_v9 = vld [vmem:[%s3306_s17 + $0x550] sm:$0xff] }
 0x178   : > { %v912_v10 = vld [vmem:[%s3312_s30 + $0x550] sm:$0xff] }
 0x179   : > { %v2421_v31 = vadd.f32 %v2420_v26, %v1909_v20  ;;  %v1412_v20 = vsub.f32 %v388_v13, %v900_v14  ;;  %v1923_v26 = vmul.f32 %v1411_v15, %v1411_v15  ;;  %v401_v14 = vld [vmem:[%s3306_s17 + $0x558] sm:$0xff] }
 0x17a   : > { %v913_v15 = vld [vmem:[%s3312_s30 + $0x558] sm:$0xff] }
 0x17b   : > { %v2422_v36 = vadd.f32 %v2421_v31, %v1910_v25  ;;  %v1413_v25 = vsub.f32 %v389_v18, %v901_v19  ;;  %v1924_v31 = vmul.f32 %v1412_v20, %v1412_v20  ;;  %v402_v19 = vld [vmem:[%s3306_s17 + $0x560] sm:$0xff] }
 0x17c   : > { %v914_v20 = vld [vmem:[%s3312_s30 + $0x560] sm:$0xff] }
 0x17d   : > { %v2423_v41 = vadd.f32 %v2422_v36, %v1911_v30  ;;  %v1414_v30 = vsub.f32 %v390_v23, %v902_v24  ;;  %v1925_v36 = vmul.f32 %v1413_v25, %v1413_v25  ;;  %v403_v24 = vld [vmem:[%s3306_s17 + $0x568] sm:$0xff] }
 0x17e   : > { %v915_v25 = vld [vmem:[%s3312_s30 + $0x568] sm:$0xff] }
 0x17f   : > { %v2424_v46 = vadd.f32 %v2423_v41, %v1912_v35  ;;  %v1415_v35 = vsub.f32 %v391_v28, %v903_v29  ;;  %v1926_v41 = vmul.f32 %v1414_v30, %v1414_v30  ;;  %v404_v29 = vld [vmem:[%s3306_s17 + $0x570] sm:$0xff] }
 0x180   : > { %v916_v30 = vld [vmem:[%s3312_s30 + $0x570] sm:$0xff] }
 0x181   : > { %v2425_v51 = vadd.f32 %v2424_v46, %v1913_v40  ;;  %v1416_v40 = vsub.f32 %v392_v33, %v904_v34  ;;  %v1927_v46 = vmul.f32 %v1415_v35, %v1415_v35  ;;  %v405_v34 = vld [vmem:[%s3306_s17 + $0x578] sm:$0xff] }
 0x182   : > { %v917_v35 = vld [vmem:[%s3312_s30 + $0x578] sm:$0xff] }
 0x183   : > { %v2426_v56 = vadd.f32 %v2425_v51, %v1914_v45  ;;  %v1417_v45 = vsub.f32 %v393_v38, %v905_v39  ;;  %v1928_v51 = vmul.f32 %v1416_v40, %v1416_v40  ;;  %v406_v39 = vld [vmem:[%s3306_s17 + $0x580] sm:$0xff] }
 0x184   : > { %v918_v40 = vld [vmem:[%s3312_s30 + $0x580] sm:$0xff] }
 0x185   : > { %v2427_v61 = vadd.f32 %v2426_v56, %v1915_v50  ;;  %v1418_v50 = vsub.f32 %v394_v43, %v906_v44  ;;  %v1929_v56 = vmul.f32 %v1417_v45, %v1417_v45  ;;  %v407_v44 = vld [vmem:[%s3306_s17 + $0x588] sm:$0xff] }
 0x186   : > { %v919_v45 = vld [vmem:[%s3312_s30 + $0x588] sm:$0xff] }
 0x187   : > { %v2428_v2 = vadd.f32 %v2427_v61, %v1916_v55  ;;  %v1419_v55 = vsub.f32 %v395_v48, %v907_v49  ;;  %v1930_v61 = vmul.f32 %v1418_v50, %v1418_v50  ;;  %v408_v49 = vld [vmem:[%s3306_s17 + $0x590] sm:$0xff] }
 0x188   : > { %v920_v50 = vld [vmem:[%s3312_s30 + $0x590] sm:$0xff] }
 0x189   : > { %v2429_v7 = vadd.f32 %v2428_v2, %v1917_v60  ;;  %v1420_v60 = vsub.f32 %v396_v53, %v908_v54  ;;  %v1931_v2 = vmul.f32 %v1419_v55, %v1419_v55  ;;  %v409_v54 = vld [vmem:[%s3306_s17 + $0x598] sm:$0xff] }
 0x18a   : > { %v921_v55 = vld [vmem:[%s3312_s30 + $0x598] sm:$0xff] }
 0x18b   : > { %v2430_v12 = vadd.f32 %v2429_v7, %v1918_v1  ;;  %v1421_v1 = vsub.f32 %v397_v58, %v909_v59  ;;  %v1932_v7 = vmul.f32 %v1420_v60, %v1420_v60  ;;  %v410_v59 = vld [vmem:[%s3306_s17 + $0x5a0] sm:$0xff] }
 0x18c   : > { %v922_v60 = vld [vmem:[%s3312_s30 + $0x5a0] sm:$0xff] }
 0x18d   : > { %v2431_v17 = vadd.f32 %v2430_v12, %v1919_v6  ;;  %v1422_v6 = vsub.f32 %v398_v63, %v910_v0  ;;  %v1933_v12 = vmul.f32 %v1421_v1, %v1421_v1  ;;  %v411_v0 = vld [vmem:[%s3306_s17 + $0x5a8] sm:$0xff] }
 0x18e   : > { %v923_v1 = vld [vmem:[%s3312_s30 + $0x5a8] sm:$0xff] }
 0x18f   : > { %v2432_v22 = vadd.f32 %v2431_v17, %v1920_v11  ;;  %v1423_v11 = vsub.f32 %v399_v4, %v911_v5  ;;  %v1934_v17 = vmul.f32 %v1422_v6, %v1422_v6  ;;  %v412_v5 = vld [vmem:[%s3306_s17 + $0x5b0] sm:$0xff] }
 0x190   : > { %v924_v6 = vld [vmem:[%s3312_s30 + $0x5b0] sm:$0xff] }
 0x191   : > { %v2433_v27 = vadd.f32 %v2432_v22, %v1921_v16  ;;  %v1424_v16 = vsub.f32 %v400_v9, %v912_v10  ;;  %v1935_v22 = vmul.f32 %v1423_v11, %v1423_v11  ;;  %v413_v10 = vld [vmem:[%s3306_s17 + $0x5b8] sm:$0xff] }
 0x192   : > { %v925_v11 = vld [vmem:[%s3312_s30 + $0x5b8] sm:$0xff] }
 0x193   : > { %v2434_v32 = vadd.f32 %v2433_v27, %v1922_v21  ;;  %v1425_v21 = vsub.f32 %v401_v14, %v913_v15  ;;  %v1936_v27 = vmul.f32 %v1424_v16, %v1424_v16  ;;  %v414_v15 = vld [vmem:[%s3306_s17 + $0x5c0] sm:$0xff] }
 0x194   : > { %v926_v16 = vld [vmem:[%s3312_s30 + $0x5c0] sm:$0xff] }
 0x195   : > { %v2435_v37 = vadd.f32 %v2434_v32, %v1923_v26  ;;  %v1426_v26 = vsub.f32 %v402_v19, %v914_v20  ;;  %v1937_v32 = vmul.f32 %v1425_v21, %v1425_v21  ;;  %v415_v20 = vld [vmem:[%s3306_s17 + $0x5c8] sm:$0xff] }
 0x196   : > { %v927_v21 = vld [vmem:[%s3312_s30 + $0x5c8] sm:$0xff] }
 0x197   : > { %v2436_v42 = vadd.f32 %v2435_v37, %v1924_v31  ;;  %v1427_v31 = vsub.f32 %v403_v24, %v915_v25  ;;  %v1938_v37 = vmul.f32 %v1426_v26, %v1426_v26  ;;  %v416_v25 = vld [vmem:[%s3306_s17 + $0x5d0] sm:$0xff] }
 0x198   : > { %v928_v26 = vld [vmem:[%s3312_s30 + $0x5d0] sm:$0xff] }
 0x199   : > { %v2437_v47 = vadd.f32 %v2436_v42, %v1925_v36  ;;  %v1428_v36 = vsub.f32 %v404_v29, %v916_v30  ;;  %v1939_v42 = vmul.f32 %v1427_v31, %v1427_v31  ;;  %v417_v30 = vld [vmem:[%s3306_s17 + $0x5d8] sm:$0xff] }
 0x19a   : > { %v929_v31 = vld [vmem:[%s3312_s30 + $0x5d8] sm:$0xff] }
 0x19b   : > { %v2438_v52 = vadd.f32 %v2437_v47, %v1926_v41  ;;  %v1429_v41 = vsub.f32 %v405_v34, %v917_v35  ;;  %v1940_v47 = vmul.f32 %v1428_v36, %v1428_v36  ;;  %v418_v35 = vld [vmem:[%s3306_s17 + $0x5e0] sm:$0xff] }
 0x19c   : > { %v930_v36 = vld [vmem:[%s3312_s30 + $0x5e0] sm:$0xff] }
 0x19d   : > { %v2439_v57 = vadd.f32 %v2438_v52, %v1927_v46  ;;  %v1430_v46 = vsub.f32 %v406_v39, %v918_v40  ;;  %v1941_v52 = vmul.f32 %v1429_v41, %v1429_v41  ;;  %v419_v40 = vld [vmem:[%s3306_s17 + $0x5e8] sm:$0xff] }
 0x19e   : > { %v931_v41 = vld [vmem:[%s3312_s30 + $0x5e8] sm:$0xff] }
 0x19f   : > { %v2440_v62 = vadd.f32 %v2439_v57, %v1928_v51  ;;  %v1431_v51 = vsub.f32 %v407_v44, %v919_v45  ;;  %v1942_v57 = vmul.f32 %v1430_v46, %v1430_v46  ;;  %v420_v45 = vld [vmem:[%s3306_s17 + $0x5f0] sm:$0xff] }
 0x1a0   : > { %v932_v46 = vld [vmem:[%s3312_s30 + $0x5f0] sm:$0xff] }
 0x1a1   : > { %v2441_v3 = vadd.f32 %v2440_v62, %v1929_v56  ;;  %v1432_v56 = vsub.f32 %v408_v49, %v920_v50  ;;  %v1943_v62 = vmul.f32 %v1431_v51, %v1431_v51  ;;  %v421_v50 = vld [vmem:[%s3306_s17 + $0x5f8] sm:$0xff] }
 0x1a2   : > { %v933_v51 = vld [vmem:[%s3312_s30 + $0x5f8] sm:$0xff] }
 0x1a3   : > { %v2442_v8 = vadd.f32 %v2441_v3, %v1930_v61  ;;  %v1433_v61 = vsub.f32 %v409_v54, %v921_v55  ;;  %v1944_v3 = vmul.f32 %v1432_v56, %v1432_v56  ;;  %v422_v55 = vld [vmem:[%s3306_s17 + $0x600] sm:$0xff] }
 0x1a4   : > { %v934_v56 = vld [vmem:[%s3312_s30 + $0x600] sm:$0xff] }
 0x1a5   : > { %v2443_v13 = vadd.f32 %v2442_v8, %v1931_v2  ;;  %v1434_v2 = vsub.f32 %v410_v59, %v922_v60  ;;  %v1945_v8 = vmul.f32 %v1433_v61, %v1433_v61  ;;  %v423_v60 = vld [vmem:[%s3306_s17 + $0x608] sm:$0xff] }
 0x1a6   : > { %v935_v61 = vld [vmem:[%s3312_s30 + $0x608] sm:$0xff] }
 0x1a7   : > { %v2444_v18 = vadd.f32 %v2443_v13, %v1932_v7  ;;  %v1435_v7 = vsub.f32 %v411_v0, %v923_v1  ;;  %v1946_v13 = vmul.f32 %v1434_v2, %v1434_v2  ;;  %v424_v1 = vld [vmem:[%s3306_s17 + $0x610] sm:$0xff] }
 0x1a8   : > { %v936_v2 = vld [vmem:[%s3312_s30 + $0x610] sm:$0xff] }
 0x1a9   : > { %v2445_v23 = vadd.f32 %v2444_v18, %v1933_v12  ;;  %v1436_v12 = vsub.f32 %v412_v5, %v924_v6  ;;  %v1947_v18 = vmul.f32 %v1435_v7, %v1435_v7  ;;  %v425_v6 = vld [vmem:[%s3306_s17 + $0x618] sm:$0xff] }
 0x1aa   : > { %v937_v7 = vld [vmem:[%s3312_s30 + $0x618] sm:$0xff] }
 0x1ab   : > { %v2446_v28 = vadd.f32 %v2445_v23, %v1934_v17  ;;  %v1437_v17 = vsub.f32 %v413_v10, %v925_v11  ;;  %v1948_v23 = vmul.f32 %v1436_v12, %v1436_v12  ;;  %v426_v11 = vld [vmem:[%s3306_s17 + $0x620] sm:$0xff] }
 0x1ac   : > { %v938_v12 = vld [vmem:[%s3312_s30 + $0x620] sm:$0xff] }
 0x1ad   : > { %v2447_v33 = vadd.f32 %v2446_v28, %v1935_v22  ;;  %v1438_v22 = vsub.f32 %v414_v15, %v926_v16  ;;  %v1949_v28 = vmul.f32 %v1437_v17, %v1437_v17  ;;  %v427_v16 = vld [vmem:[%s3306_s17 + $0x628] sm:$0xff] }
 0x1ae   : > { %v939_v17 = vld [vmem:[%s3312_s30 + $0x628] sm:$0xff] }
 0x1af   : > { %v2448_v38 = vadd.f32 %v2447_v33, %v1936_v27  ;;  %v1439_v27 = vsub.f32 %v415_v20, %v927_v21  ;;  %v1950_v33 = vmul.f32 %v1438_v22, %v1438_v22  ;;  %v428_v21 = vld [vmem:[%s3306_s17 + $0x630] sm:$0xff] }
 0x1b0   : > { %v940_v22 = vld [vmem:[%s3312_s30 + $0x630] sm:$0xff] }
 0x1b1   : > { %v2449_v43 = vadd.f32 %v2448_v38, %v1937_v32  ;;  %v1440_v32 = vsub.f32 %v416_v25, %v928_v26  ;;  %v1951_v38 = vmul.f32 %v1439_v27, %v1439_v27  ;;  %v429_v26 = vld [vmem:[%s3306_s17 + $0x638] sm:$0xff] }
 0x1b2   : > { %v941_v27 = vld [vmem:[%s3312_s30 + $0x638] sm:$0xff] }
 0x1b3   : > { %v2450_v48 = vadd.f32 %v2449_v43, %v1938_v37  ;;  %v1441_v37 = vsub.f32 %v417_v30, %v929_v31  ;;  %v1952_v43 = vmul.f32 %v1440_v32, %v1440_v32  ;;  %v430_v31 = vld [vmem:[%s3306_s17 + $0x640] sm:$0xff] }
 0x1b4   : > { %v942_v32 = vld [vmem:[%s3312_s30 + $0x640] sm:$0xff] }
 0x1b5   : > { %v2451_v53 = vadd.f32 %v2450_v48, %v1939_v42  ;;  %v1442_v42 = vsub.f32 %v418_v35, %v930_v36  ;;  %v1953_v48 = vmul.f32 %v1441_v37, %v1441_v37  ;;  %v431_v36 = vld [vmem:[%s3306_s17 + $0x648] sm:$0xff] }
 0x1b6   : > { %v943_v37 = vld [vmem:[%s3312_s30 + $0x648] sm:$0xff] }
 0x1b7   : > { %v2452_v58 = vadd.f32 %v2451_v53, %v1940_v47  ;;  %v1443_v47 = vsub.f32 %v419_v40, %v931_v41  ;;  %v1954_v53 = vmul.f32 %v1442_v42, %v1442_v42  ;;  %v432_v41 = vld [vmem:[%s3306_s17 + $0x650] sm:$0xff] }
 0x1b8   : > { %v944_v42 = vld [vmem:[%s3312_s30 + $0x650] sm:$0xff] }
 0x1b9   : > { %v2453_v63 = vadd.f32 %v2452_v58, %v1941_v52  ;;  %v1444_v52 = vsub.f32 %v420_v45, %v932_v46  ;;  %v1955_v58 = vmul.f32 %v1443_v47, %v1443_v47  ;;  %v433_v46 = vld [vmem:[%s3306_s17 + $0x658] sm:$0xff] }
 0x1ba   : > { %v945_v47 = vld [vmem:[%s3312_s30 + $0x658] sm:$0xff] }
 0x1bb   : > { %v2454_v4 = vadd.f32 %v2453_v63, %v1942_v57  ;;  %v1445_v57 = vsub.f32 %v421_v50, %v933_v51  ;;  %v1956_v63 = vmul.f32 %v1444_v52, %v1444_v52  ;;  %v434_v51 = vld [vmem:[%s3306_s17 + $0x660] sm:$0xff] }
 0x1bc   : > { %v946_v52 = vld [vmem:[%s3312_s30 + $0x660] sm:$0xff] }
 0x1bd   : > { %v2455_v9 = vadd.f32 %v2454_v4, %v1943_v62  ;;  %v1446_v62 = vsub.f32 %v422_v55, %v934_v56  ;;  %v1957_v4 = vmul.f32 %v1445_v57, %v1445_v57  ;;  %v435_v56 = vld [vmem:[%s3306_s17 + $0x668] sm:$0xff] }
 0x1be   : > { %v947_v57 = vld [vmem:[%s3312_s30 + $0x668] sm:$0xff] }
 0x1bf   : > { %v2456_v14 = vadd.f32 %v2455_v9, %v1944_v3  ;;  %v1447_v3 = vsub.f32 %v423_v60, %v935_v61  ;;  %v1958_v9 = vmul.f32 %v1446_v62, %v1446_v62  ;;  %v436_v61 = vld [vmem:[%s3306_s17 + $0x670] sm:$0xff] }
 0x1c0   : > { %v948_v62 = vld [vmem:[%s3312_s30 + $0x670] sm:$0xff] }
 0x1c1   : > { %v2457_v19 = vadd.f32 %v2456_v14, %v1945_v8  ;;  %v1448_v8 = vsub.f32 %v424_v1, %v936_v2  ;;  %v1959_v14 = vmul.f32 %v1447_v3, %v1447_v3  ;;  %v437_v2 = vld [vmem:[%s3306_s17 + $0x678] sm:$0xff] }
 0x1c2   : > { %v949_v3 = vld [vmem:[%s3312_s30 + $0x678] sm:$0xff] }
 0x1c3   : > { %v2458_v24 = vadd.f32 %v2457_v19, %v1946_v13  ;;  %v1449_v13 = vsub.f32 %v425_v6, %v937_v7  ;;  %v1960_v19 = vmul.f32 %v1448_v8, %v1448_v8  ;;  %v438_v7 = vld [vmem:[%s3306_s17 + $0x680] sm:$0xff] }
 0x1c4   : > { %v950_v8 = vld [vmem:[%s3312_s30 + $0x680] sm:$0xff] }
 0x1c5   : > { %v2459_v29 = vadd.f32 %v2458_v24, %v1947_v18  ;;  %v1450_v18 = vsub.f32 %v426_v11, %v938_v12  ;;  %v1961_v24 = vmul.f32 %v1449_v13, %v1449_v13  ;;  %v439_v12 = vld [vmem:[%s3306_s17 + $0x688] sm:$0xff] }
 0x1c6   : > { %v951_v13 = vld [vmem:[%s3312_s30 + $0x688] sm:$0xff] }
 0x1c7   : > { %v2460_v34 = vadd.f32 %v2459_v29, %v1948_v23  ;;  %v1451_v23 = vsub.f32 %v427_v16, %v939_v17  ;;  %v1962_v29 = vmul.f32 %v1450_v18, %v1450_v18  ;;  %v440_v17 = vld [vmem:[%s3306_s17 + $0x690] sm:$0xff] }
 0x1c8   : > { %v952_v18 = vld [vmem:[%s3312_s30 + $0x690] sm:$0xff] }
 0x1c9   : > { %v2461_v39 = vadd.f32 %v2460_v34, %v1949_v28  ;;  %v1452_v28 = vsub.f32 %v428_v21, %v940_v22  ;;  %v1963_v34 = vmul.f32 %v1451_v23, %v1451_v23  ;;  %v441_v22 = vld [vmem:[%s3306_s17 + $0x698] sm:$0xff] }
 0x1ca   : > { %v953_v23 = vld [vmem:[%s3312_s30 + $0x698] sm:$0xff] }
 0x1cb   : > { %v2462_v44 = vadd.f32 %v2461_v39, %v1950_v33  ;;  %v1453_v33 = vsub.f32 %v429_v26, %v941_v27  ;;  %v1964_v39 = vmul.f32 %v1452_v28, %v1452_v28  ;;  %v442_v27 = vld [vmem:[%s3306_s17 + $0x6a0] sm:$0xff] }
 0x1cc   : > { %v954_v28 = vld [vmem:[%s3312_s30 + $0x6a0] sm:$0xff] }
 0x1cd   : > { %v2463_v49 = vadd.f32 %v2462_v44, %v1951_v38  ;;  %v1454_v38 = vsub.f32 %v430_v31, %v942_v32  ;;  %v1965_v44 = vmul.f32 %v1453_v33, %v1453_v33  ;;  %v443_v32 = vld [vmem:[%s3306_s17 + $0x6a8] sm:$0xff] }
 0x1ce   : > { %v955_v33 = vld [vmem:[%s3312_s30 + $0x6a8] sm:$0xff] }
 0x1cf   : > { %v2464_v54 = vadd.f32 %v2463_v49, %v1952_v43  ;;  %v1455_v43 = vsub.f32 %v431_v36, %v943_v37  ;;  %v1966_v49 = vmul.f32 %v1454_v38, %v1454_v38  ;;  %v444_v37 = vld [vmem:[%s3306_s17 + $0x6b0] sm:$0xff] }
 0x1d0   : > { %v956_v38 = vld [vmem:[%s3312_s30 + $0x6b0] sm:$0xff] }
 0x1d1   : > { %v2465_v59 = vadd.f32 %v2464_v54, %v1953_v48  ;;  %v1456_v48 = vsub.f32 %v432_v41, %v944_v42  ;;  %v1967_v54 = vmul.f32 %v1455_v43, %v1455_v43  ;;  %v445_v42 = vld [vmem:[%s3306_s17 + $0x6b8] sm:$0xff] }
 0x1d2   : > { %v957_v43 = vld [vmem:[%s3312_s30 + $0x6b8] sm:$0xff] }
 0x1d3   : > { %v2466_v0 = vadd.f32 %v2465_v59, %v1954_v53  ;;  %v1457_v53 = vsub.f32 %v433_v46, %v945_v47  ;;  %v1968_v59 = vmul.f32 %v1456_v48, %v1456_v48  ;;  %v446_v47 = vld [vmem:[%s3306_s17 + $0x6c0] sm:$0xff] }
 0x1d4   : > { %v958_v48 = vld [vmem:[%s3312_s30 + $0x6c0] sm:$0xff] }
 0x1d5   : > { %v2467_v5 = vadd.f32 %v2466_v0, %v1955_v58  ;;  %v1458_v58 = vsub.f32 %v434_v51, %v946_v52  ;;  %v1969_v0 = vmul.f32 %v1457_v53, %v1457_v53  ;;  %v447_v52 = vld [vmem:[%s3306_s17 + $0x6c8] sm:$0xff] }
 0x1d6   : > { %v959_v53 = vld [vmem:[%s3312_s30 + $0x6c8] sm:$0xff] }
 0x1d7   : > { %v2468_v10 = vadd.f32 %v2467_v5, %v1956_v63  ;;  %v1459_v63 = vsub.f32 %v435_v56, %v947_v57  ;;  %v1970_v5 = vmul.f32 %v1458_v58, %v1458_v58  ;;  %v448_v57 = vld [vmem:[%s3306_s17 + $0x6d0] sm:$0xff] }
 0x1d8   : > { %v960_v58 = vld [vmem:[%s3312_s30 + $0x6d0] sm:$0xff] }
 0x1d9   : > { %v2469_v15 = vadd.f32 %v2468_v10, %v1957_v4  ;;  %v1460_v4 = vsub.f32 %v436_v61, %v948_v62  ;;  %v1971_v10 = vmul.f32 %v1459_v63, %v1459_v63  ;;  %v449_v62 = vld [vmem:[%s3306_s17 + $0x6d8] sm:$0xff] }
 0x1da   : > { %v961_v63 = vld [vmem:[%s3312_s30 + $0x6d8] sm:$0xff] }
 0x1db   : > { %v2470_v20 = vadd.f32 %v2469_v15, %v1958_v9  ;;  %v1461_v9 = vsub.f32 %v437_v2, %v949_v3  ;;  %v1972_v15 = vmul.f32 %v1460_v4, %v1460_v4  ;;  %v450_v3 = vld [vmem:[%s3306_s17 + $0x6e0] sm:$0xff] }
 0x1dc   : > { %v962_v4 = vld [vmem:[%s3312_s30 + $0x6e0] sm:$0xff] }
 0x1dd   : > { %v2471_v25 = vadd.f32 %v2470_v20, %v1959_v14  ;;  %v1462_v14 = vsub.f32 %v438_v7, %v950_v8  ;;  %v1973_v20 = vmul.f32 %v1461_v9, %v1461_v9  ;;  %v451_v8 = vld [vmem:[%s3306_s17 + $0x6e8] sm:$0xff] }
 0x1de   : > { %v963_v9 = vld [vmem:[%s3312_s30 + $0x6e8] sm:$0xff] }
 0x1df   : > { %v2472_v30 = vadd.f32 %v2471_v25, %v1960_v19  ;;  %v1463_v19 = vsub.f32 %v439_v12, %v951_v13  ;;  %v1974_v25 = vmul.f32 %v1462_v14, %v1462_v14  ;;  %v452_v13 = vld [vmem:[%s3306_s17 + $0x6f0] sm:$0xff] }
 0x1e0   : > { %v964_v14 = vld [vmem:[%s3312_s30 + $0x6f0] sm:$0xff] }
 0x1e1   : > { %v2473_v35 = vadd.f32 %v2472_v30, %v1961_v24  ;;  %v1464_v24 = vsub.f32 %v440_v17, %v952_v18  ;;  %v1975_v30 = vmul.f32 %v1463_v19, %v1463_v19  ;;  %v453_v18 = vld [vmem:[%s3306_s17 + $0x6f8] sm:$0xff] }
 0x1e2   : > { %v965_v19 = vld [vmem:[%s3312_s30 + $0x6f8] sm:$0xff] }
 0x1e3   : > { %v2474_v40 = vadd.f32 %v2473_v35, %v1962_v29  ;;  %v1465_v29 = vsub.f32 %v441_v22, %v953_v23  ;;  %v1976_v35 = vmul.f32 %v1464_v24, %v1464_v24  ;;  %v454_v23 = vld [vmem:[%s3306_s17 + $0x700] sm:$0xff] }
 0x1e4   : > { %v966_v24 = vld [vmem:[%s3312_s30 + $0x700] sm:$0xff] }
 0x1e5   : > { %v2475_v45 = vadd.f32 %v2474_v40, %v1963_v34  ;;  %v1466_v34 = vsub.f32 %v442_v27, %v954_v28  ;;  %v1977_v40 = vmul.f32 %v1465_v29, %v1465_v29  ;;  %v455_v28 = vld [vmem:[%s3306_s17 + $0x708] sm:$0xff] }
 0x1e6   : > { %v967_v29 = vld [vmem:[%s3312_s30 + $0x708] sm:$0xff] }
 0x1e7   : > { %v2476_v50 = vadd.f32 %v2475_v45, %v1964_v39  ;;  %v1467_v39 = vsub.f32 %v443_v32, %v955_v33  ;;  %v1978_v45 = vmul.f32 %v1466_v34, %v1466_v34  ;;  %v456_v33 = vld [vmem:[%s3306_s17 + $0x710] sm:$0xff] }
 0x1e8   : > { %v968_v34 = vld [vmem:[%s3312_s30 + $0x710] sm:$0xff] }
 0x1e9   : > { %v2477_v55 = vadd.f32 %v2476_v50, %v1965_v44  ;;  %v1468_v44 = vsub.f32 %v444_v37, %v956_v38  ;;  %v1979_v50 = vmul.f32 %v1467_v39, %v1467_v39  ;;  %v457_v38 = vld [vmem:[%s3306_s17 + $0x718] sm:$0xff] }
 0x1ea   : > { %v969_v39 = vld [vmem:[%s3312_s30 + $0x718] sm:$0xff] }
 0x1eb   : > { %v2478_v60 = vadd.f32 %v2477_v55, %v1966_v49  ;;  %v1469_v49 = vsub.f32 %v445_v42, %v957_v43  ;;  %v1980_v55 = vmul.f32 %v1468_v44, %v1468_v44  ;;  %v458_v43 = vld [vmem:[%s3306_s17 + $0x720] sm:$0xff] }
 0x1ec   : > { %v970_v44 = vld [vmem:[%s3312_s30 + $0x720] sm:$0xff] }
 0x1ed   : > { %v2479_v1 = vadd.f32 %v2478_v60, %v1967_v54  ;;  %v1470_v54 = vsub.f32 %v446_v47, %v958_v48  ;;  %v1981_v60 = vmul.f32 %v1469_v49, %v1469_v49  ;;  %v459_v48 = vld [vmem:[%s3306_s17 + $0x728] sm:$0xff] }
 0x1ee   : > { %v971_v49 = vld [vmem:[%s3312_s30 + $0x728] sm:$0xff] }
 0x1ef   : > { %v2480_v6 = vadd.f32 %v2479_v1, %v1968_v59  ;;  %v1471_v59 = vsub.f32 %v447_v52, %v959_v53  ;;  %v1982_v1 = vmul.f32 %v1470_v54, %v1470_v54  ;;  %v460_v53 = vld [vmem:[%s3306_s17 + $0x730] sm:$0xff] }
 0x1f0   : > { %v972_v54 = vld [vmem:[%s3312_s30 + $0x730] sm:$0xff] }
 0x1f1   : > { %v2481_v11 = vadd.f32 %v2480_v6, %v1969_v0  ;;  %v1472_v0 = vsub.f32 %v448_v57, %v960_v58  ;;  %v1983_v6 = vmul.f32 %v1471_v59, %v1471_v59  ;;  %v461_v58 = vld [vmem:[%s3306_s17 + $0x738] sm:$0xff] }
 0x1f2   : > { %v973_v59 = vld [vmem:[%s3312_s30 + $0x738] sm:$0xff] }
 0x1f3   : > { %v2482_v16 = vadd.f32 %v2481_v11, %v1970_v5  ;;  %v1473_v5 = vsub.f32 %v449_v62, %v961_v63  ;;  %v1984_v11 = vmul.f32 %v1472_v0, %v1472_v0  ;;  %v462_v63 = vld [vmem:[%s3306_s17 + $0x740] sm:$0xff] }
 0x1f4   : > { %v974_v0 = vld [vmem:[%s3312_s30 + $0x740] sm:$0xff] }
 0x1f5   : > { %v2483_v21 = vadd.f32 %v2482_v16, %v1971_v10  ;;  %v1474_v10 = vsub.f32 %v450_v3, %v962_v4  ;;  %v1985_v16 = vmul.f32 %v1473_v5, %v1473_v5  ;;  %v463_v4 = vld [vmem:[%s3306_s17 + $0x748] sm:$0xff] }
 0x1f6   : > { %v975_v5 = vld [vmem:[%s3312_s30 + $0x748] sm:$0xff] }
 0x1f7   : > { %v2484_v26 = vadd.f32 %v2483_v21, %v1972_v15  ;;  %v1475_v15 = vsub.f32 %v451_v8, %v963_v9  ;;  %v1986_v21 = vmul.f32 %v1474_v10, %v1474_v10  ;;  %v464_v9 = vld [vmem:[%s3306_s17 + $0x750] sm:$0xff] }
 0x1f8   : > { %v976_v10 = vld [vmem:[%s3312_s30 + $0x750] sm:$0xff] }
 0x1f9   : > { %v2485_v31 = vadd.f32 %v2484_v26, %v1973_v20  ;;  %v1476_v20 = vsub.f32 %v452_v13, %v964_v14  ;;  %v1987_v26 = vmul.f32 %v1475_v15, %v1475_v15  ;;  %v465_v14 = vld [vmem:[%s3306_s17 + $0x758] sm:$0xff] }
 0x1fa   : > { %v977_v15 = vld [vmem:[%s3312_s30 + $0x758] sm:$0xff] }
 0x1fb   : > { %v2486_v36 = vadd.f32 %v2485_v31, %v1974_v25  ;;  %v1477_v25 = vsub.f32 %v453_v18, %v965_v19  ;;  %v1988_v31 = vmul.f32 %v1476_v20, %v1476_v20  ;;  %v466_v19 = vld [vmem:[%s3306_s17 + $0x760] sm:$0xff] }
 0x1fc   : > { %v978_v20 = vld [vmem:[%s3312_s30 + $0x760] sm:$0xff] }
 0x1fd   : > { %v2487_v41 = vadd.f32 %v2486_v36, %v1975_v30  ;;  %v1478_v30 = vsub.f32 %v454_v23, %v966_v24  ;;  %v1989_v36 = vmul.f32 %v1477_v25, %v1477_v25  ;;  %v467_v24 = vld [vmem:[%s3306_s17 + $0x768] sm:$0xff] }
 0x1fe   : > { %v979_v25 = vld [vmem:[%s3312_s30 + $0x768] sm:$0xff] }
 0x1ff   : > { %v2488_v46 = vadd.f32 %v2487_v41, %v1976_v35  ;;  %v1479_v35 = vsub.f32 %v455_v28, %v967_v29  ;;  %v1990_v41 = vmul.f32 %v1478_v30, %v1478_v30  ;;  %v468_v29 = vld [vmem:[%s3306_s17 + $0x770] sm:$0xff] }
 0x200   : > { %v980_v30 = vld [vmem:[%s3312_s30 + $0x770] sm:$0xff] }
 0x201   : > { %v2489_v51 = vadd.f32 %v2488_v46, %v1977_v40  ;;  %v1480_v40 = vsub.f32 %v456_v33, %v968_v34  ;;  %v1991_v46 = vmul.f32 %v1479_v35, %v1479_v35  ;;  %v469_v34 = vld [vmem:[%s3306_s17 + $0x778] sm:$0xff] }
 0x202   : > { %v981_v35 = vld [vmem:[%s3312_s30 + $0x778] sm:$0xff] }
 0x203   : > { %v2490_v56 = vadd.f32 %v2489_v51, %v1978_v45  ;;  %v1481_v45 = vsub.f32 %v457_v38, %v969_v39  ;;  %v1992_v51 = vmul.f32 %v1480_v40, %v1480_v40  ;;  %v470_v39 = vld [vmem:[%s3306_s17 + $0x780] sm:$0xff] }
 0x204   : > { %v982_v40 = vld [vmem:[%s3312_s30 + $0x780] sm:$0xff] }
 0x205   : > { %v2491_v61 = vadd.f32 %v2490_v56, %v1979_v50  ;;  %v1482_v50 = vsub.f32 %v458_v43, %v970_v44  ;;  %v1993_v56 = vmul.f32 %v1481_v45, %v1481_v45  ;;  %v471_v44 = vld [vmem:[%s3306_s17 + $0x788] sm:$0xff] }
 0x206   : > { %v983_v45 = vld [vmem:[%s3312_s30 + $0x788] sm:$0xff] }
 0x207   : > { %v2492_v2 = vadd.f32 %v2491_v61, %v1980_v55  ;;  %v1483_v55 = vsub.f32 %v459_v48, %v971_v49  ;;  %v1994_v61 = vmul.f32 %v1482_v50, %v1482_v50  ;;  %v472_v49 = vld [vmem:[%s3306_s17 + $0x790] sm:$0xff] }
 0x208   : > { %v984_v50 = vld [vmem:[%s3312_s30 + $0x790] sm:$0xff] }
 0x209   : > { %v2493_v7 = vadd.f32 %v2492_v2, %v1981_v60  ;;  %v1484_v60 = vsub.f32 %v460_v53, %v972_v54  ;;  %v1995_v2 = vmul.f32 %v1483_v55, %v1483_v55  ;;  %v473_v54 = vld [vmem:[%s3306_s17 + $0x798] sm:$0xff] }
 0x20a   : > { %v985_v55 = vld [vmem:[%s3312_s30 + $0x798] sm:$0xff] }
 0x20b   : > { %v2494_v12 = vadd.f32 %v2493_v7, %v1982_v1  ;;  %v1485_v1 = vsub.f32 %v461_v58, %v973_v59  ;;  %v1996_v7 = vmul.f32 %v1484_v60, %v1484_v60  ;;  %v474_v59 = vld [vmem:[%s3306_s17 + $0x7a0] sm:$0xff] }
 0x20c   : > { %v986_v60 = vld [vmem:[%s3312_s30 + $0x7a0] sm:$0xff] }
 0x20d   : > { %v2495_v17 = vadd.f32 %v2494_v12, %v1983_v6  ;;  %v1486_v6 = vsub.f32 %v462_v63, %v974_v0  ;;  %v1997_v12 = vmul.f32 %v1485_v1, %v1485_v1  ;;  %v475_v0 = vld [vmem:[%s3306_s17 + $0x7a8] sm:$0xff] }
 0x20e   : > { %v987_v1 = vld [vmem:[%s3312_s30 + $0x7a8] sm:$0xff] }
 0x20f   : > { %v2496_v22 = vadd.f32 %v2495_v17, %v1984_v11  ;;  %v1487_v11 = vsub.f32 %v463_v4, %v975_v5  ;;  %v1998_v17 = vmul.f32 %v1486_v6, %v1486_v6  ;;  %v476_v5 = vld [vmem:[%s3306_s17 + $0x7b0] sm:$0xff] }
 0x210   : > { %v988_v6 = vld [vmem:[%s3312_s30 + $0x7b0] sm:$0xff] }
 0x211   : > { %v2497_v27 = vadd.f32 %v2496_v22, %v1985_v16  ;;  %v1488_v16 = vsub.f32 %v464_v9, %v976_v10  ;;  %v1999_v22 = vmul.f32 %v1487_v11, %v1487_v11  ;;  %v477_v10 = vld [vmem:[%s3306_s17 + $0x7b8] sm:$0xff] }
 0x212   : > { %v989_v11 = vld [vmem:[%s3312_s30 + $0x7b8] sm:$0xff] }
 0x213   : > { %v2498_v32 = vadd.f32 %v2497_v27, %v1986_v21  ;;  %v1489_v21 = vsub.f32 %v465_v14, %v977_v15  ;;  %v2000_v27 = vmul.f32 %v1488_v16, %v1488_v16  ;;  %v478_v15 = vld [vmem:[%s3306_s17 + $0x7c0] sm:$0xff] }
 0x214   : > { %v990_v16 = vld [vmem:[%s3312_s30 + $0x7c0] sm:$0xff] }
 0x215   : > { %v2499_v37 = vadd.f32 %v2498_v32, %v1987_v26  ;;  %v1490_v26 = vsub.f32 %v466_v19, %v978_v20  ;;  %v2001_v32 = vmul.f32 %v1489_v21, %v1489_v21  ;;  %v479_v20 = vld [vmem:[%s3306_s17 + $0x7c8] sm:$0xff] }
 0x216   : > { %v991_v21 = vld [vmem:[%s3312_s30 + $0x7c8] sm:$0xff] }
 0x217   : > { %v2500_v42 = vadd.f32 %v2499_v37, %v1988_v31  ;;  %v1491_v31 = vsub.f32 %v467_v24, %v979_v25  ;;  %v2002_v37 = vmul.f32 %v1490_v26, %v1490_v26  ;;  %v480_v25 = vld [vmem:[%s3306_s17 + $0x7d0] sm:$0xff] }
 0x218   : > { %v992_v26 = vld [vmem:[%s3312_s30 + $0x7d0] sm:$0xff] }
 0x219   : > { %v2501_v47 = vadd.f32 %v2500_v42, %v1989_v36  ;;  %v1492_v36 = vsub.f32 %v468_v29, %v980_v30  ;;  %v2003_v42 = vmul.f32 %v1491_v31, %v1491_v31  ;;  %v481_v30 = vld [vmem:[%s3306_s17 + $0x7d8] sm:$0xff] }
 0x21a   : > { %v993_v31 = vld [vmem:[%s3312_s30 + $0x7d8] sm:$0xff] }
 0x21b   : > { %v2502_v52 = vadd.f32 %v2501_v47, %v1990_v41  ;;  %v1493_v41 = vsub.f32 %v469_v34, %v981_v35  ;;  %v2004_v47 = vmul.f32 %v1492_v36, %v1492_v36  ;;  %v482_v35 = vld [vmem:[%s3306_s17 + $0x7e0] sm:$0xff] }
 0x21c   : > { %v994_v36 = vld [vmem:[%s3312_s30 + $0x7e0] sm:$0xff] }
 0x21d   : > { %v2503_v57 = vadd.f32 %v2502_v52, %v1991_v46  ;;  %v1494_v46 = vsub.f32 %v470_v39, %v982_v40  ;;  %v2005_v52 = vmul.f32 %v1493_v41, %v1493_v41  ;;  %v483_v40 = vld [vmem:[%s3306_s17 + $0x7e8] sm:$0xff] }
 0x21e   : > { %v995_v41 = vld [vmem:[%s3312_s30 + $0x7e8] sm:$0xff] }
 0x21f   : > { %v2504_v62 = vadd.f32 %v2503_v57, %v1992_v51  ;;  %v1495_v51 = vsub.f32 %v471_v44, %v983_v45  ;;  %v2006_v57 = vmul.f32 %v1494_v46, %v1494_v46  ;;  %v484_v45 = vld [vmem:[%s3306_s17 + $0x7f0] sm:$0xff] }
 0x220   : > { %v996_v46 = vld [vmem:[%s3312_s30 + $0x7f0] sm:$0xff] }
 0x221   : > { %v2505_v3 = vadd.f32 %v2504_v62, %v1993_v56  ;;  %v1496_v56 = vsub.f32 %v472_v49, %v984_v50  ;;  %v2007_v62 = vmul.f32 %v1495_v51, %v1495_v51  ;;  %v485_v50 = vld [vmem:[%s3306_s17 + $0x7f8] sm:$0xff] }
 0x222   : > { %v997_v51 = vld [vmem:[%s3312_s30 + $0x7f8] sm:$0xff] }
 0x223   : > { %v2506_v8 = vadd.f32 %v2505_v3, %v1994_v61  ;;  %v1497_v61 = vsub.f32 %v473_v54, %v985_v55  ;;  %v2008_v3 = vmul.f32 %v1496_v56, %v1496_v56  ;;  %v486_v55 = vld [vmem:[%s3306_s17 + $0x800] sm:$0xff] }
 0x224   : > { %v998_v56 = vld [vmem:[%s3312_s30 + $0x800] sm:$0xff] }
 0x225   : > { %v2507_v13 = vadd.f32 %v2506_v8, %v1995_v2  ;;  %v1498_v2 = vsub.f32 %v474_v59, %v986_v60  ;;  %v2009_v8 = vmul.f32 %v1497_v61, %v1497_v61  ;;  %v487_v60 = vld [vmem:[%s3306_s17 + $0x808] sm:$0xff] }
 0x226   : > { %v999_v61 = vld [vmem:[%s3312_s30 + $0x808] sm:$0xff] }
 0x227   : > { %v2508_v18 = vadd.f32 %v2507_v13, %v1996_v7  ;;  %v1499_v7 = vsub.f32 %v475_v0, %v987_v1  ;;  %v2010_v13 = vmul.f32 %v1498_v2, %v1498_v2  ;;  %v488_v1 = vld [vmem:[%s3306_s17 + $0x810] sm:$0xff] }
 0x228   : > { %v1000_v2 = vld [vmem:[%s3312_s30 + $0x810] sm:$0xff] }
 0x229   : > { %v2509_v23 = vadd.f32 %v2508_v18, %v1997_v12  ;;  %v1500_v12 = vsub.f32 %v476_v5, %v988_v6  ;;  %v2011_v18 = vmul.f32 %v1499_v7, %v1499_v7  ;;  %v489_v6 = vld [vmem:[%s3306_s17 + $0x818] sm:$0xff] }
 0x22a   : > { %v1001_v7 = vld [vmem:[%s3312_s30 + $0x818] sm:$0xff] }
 0x22b   : > { %v2510_v28 = vadd.f32 %v2509_v23, %v1998_v17  ;;  %v1501_v17 = vsub.f32 %v477_v10, %v989_v11  ;;  %v2012_v23 = vmul.f32 %v1500_v12, %v1500_v12  ;;  %v490_v11 = vld [vmem:[%s3306_s17 + $0x820] sm:$0xff] }
 0x22c   : > { %v1002_v12 = vld [vmem:[%s3312_s30 + $0x820] sm:$0xff] }
 0x22d   : > { %v2511_v33 = vadd.f32 %v2510_v28, %v1999_v22  ;;  %v1502_v22 = vsub.f32 %v478_v15, %v990_v16  ;;  %v2013_v28 = vmul.f32 %v1501_v17, %v1501_v17  ;;  %v491_v16 = vld [vmem:[%s3306_s17 + $0x828] sm:$0xff] }
 0x22e   : > { %v1003_v17 = vld [vmem:[%s3312_s30 + $0x828] sm:$0xff] }
 0x22f   : > { %v2512_v38 = vadd.f32 %v2511_v33, %v2000_v27  ;;  %v1503_v27 = vsub.f32 %v479_v20, %v991_v21  ;;  %v2014_v33 = vmul.f32 %v1502_v22, %v1502_v22  ;;  %v492_v21 = vld [vmem:[%s3306_s17 + $0x830] sm:$0xff] }
 0x230   : > { %v1004_v22 = vld [vmem:[%s3312_s30 + $0x830] sm:$0xff] }
 0x231   : > { %v2513_v43 = vadd.f32 %v2512_v38, %v2001_v32  ;;  %v1504_v32 = vsub.f32 %v480_v25, %v992_v26  ;;  %v2015_v38 = vmul.f32 %v1503_v27, %v1503_v27  ;;  %v493_v26 = vld [vmem:[%s3306_s17 + $0x838] sm:$0xff] }
 0x232   : > { %v1005_v27 = vld [vmem:[%s3312_s30 + $0x838] sm:$0xff] }
 0x233   : > { %v2514_v48 = vadd.f32 %v2513_v43, %v2002_v37  ;;  %v1505_v37 = vsub.f32 %v481_v30, %v993_v31  ;;  %v2016_v43 = vmul.f32 %v1504_v32, %v1504_v32  ;;  %v494_v31 = vld [vmem:[%s3306_s17 + $0x840] sm:$0xff] }
 0x234   : > { %v1006_v32 = vld [vmem:[%s3312_s30 + $0x840] sm:$0xff] }
 0x235   : > { %v2515_v53 = vadd.f32 %v2514_v48, %v2003_v42  ;;  %v1506_v42 = vsub.f32 %v482_v35, %v994_v36  ;;  %v2017_v48 = vmul.f32 %v1505_v37, %v1505_v37  ;;  %v495_v36 = vld [vmem:[%s3306_s17 + $0x848] sm:$0xff] }
 0x236   : > { %v1007_v37 = vld [vmem:[%s3312_s30 + $0x848] sm:$0xff] }
 0x237   : > { %v2516_v58 = vadd.f32 %v2515_v53, %v2004_v47  ;;  %v1507_v47 = vsub.f32 %v483_v40, %v995_v41  ;;  %v2018_v53 = vmul.f32 %v1506_v42, %v1506_v42  ;;  %v496_v41 = vld [vmem:[%s3306_s17 + $0x850] sm:$0xff] }
 0x238   : > { %v1008_v42 = vld [vmem:[%s3312_s30 + $0x850] sm:$0xff] }
 0x239   : > { %v2517_v63 = vadd.f32 %v2516_v58, %v2005_v52  ;;  %v1508_v52 = vsub.f32 %v484_v45, %v996_v46  ;;  %v2019_v58 = vmul.f32 %v1507_v47, %v1507_v47  ;;  %v497_v46 = vld [vmem:[%s3306_s17 + $0x858] sm:$0xff] }
 0x23a   : > { %v1009_v47 = vld [vmem:[%s3312_s30 + $0x858] sm:$0xff] }
 0x23b   : > { %v2518_v4 = vadd.f32 %v2517_v63, %v2006_v57  ;;  %v1509_v57 = vsub.f32 %v485_v50, %v997_v51  ;;  %v2020_v63 = vmul.f32 %v1508_v52, %v1508_v52  ;;  %v498_v51 = vld [vmem:[%s3306_s17 + $0x860] sm:$0xff] }
 0x23c   : > { %v1010_v52 = vld [vmem:[%s3312_s30 + $0x860] sm:$0xff] }
 0x23d   : > { %v2519_v9 = vadd.f32 %v2518_v4, %v2007_v62  ;;  %v1510_v62 = vsub.f32 %v486_v55, %v998_v56  ;;  %v2021_v4 = vmul.f32 %v1509_v57, %v1509_v57  ;;  %v499_v56 = vld [vmem:[%s3306_s17 + $0x868] sm:$0xff] }
 0x23e   : > { %v1011_v57 = vld [vmem:[%s3312_s30 + $0x868] sm:$0xff] }
 0x23f   : > { %v2520_v14 = vadd.f32 %v2519_v9, %v2008_v3  ;;  %v1511_v3 = vsub.f32 %v487_v60, %v999_v61  ;;  %v2022_v9 = vmul.f32 %v1510_v62, %v1510_v62  ;;  %v500_v61 = vld [vmem:[%s3306_s17 + $0x870] sm:$0xff] }
 0x240   : > { %v1012_v62 = vld [vmem:[%s3312_s30 + $0x870] sm:$0xff] }
 0x241   : > { %v2521_v19 = vadd.f32 %v2520_v14, %v2009_v8  ;;  %v1512_v8 = vsub.f32 %v488_v1, %v1000_v2  ;;  %v2023_v14 = vmul.f32 %v1511_v3, %v1511_v3  ;;  %v501_v2 = vld [vmem:[%s3306_s17 + $0x878] sm:$0xff] }
 0x242   : > { %v1013_v3 = vld [vmem:[%s3312_s30 + $0x878] sm:$0xff] }
 0x243   : > { %v2522_v24 = vadd.f32 %v2521_v19, %v2010_v13  ;;  %v1513_v13 = vsub.f32 %v489_v6, %v1001_v7  ;;  %v2024_v19 = vmul.f32 %v1512_v8, %v1512_v8  ;;  %v502_v7 = vld [vmem:[%s3306_s17 + $0x880] sm:$0xff] }
 0x244   : > { %v1014_v8 = vld [vmem:[%s3312_s30 + $0x880] sm:$0xff] }
 0x245   : > { %v2523_v29 = vadd.f32 %v2522_v24, %v2011_v18  ;;  %v1514_v18 = vsub.f32 %v490_v11, %v1002_v12  ;;  %v2025_v24 = vmul.f32 %v1513_v13, %v1513_v13  ;;  %v503_v12 = vld [vmem:[%s3306_s17 + $0x888] sm:$0xff] }
 0x246   : > { %v1015_v13 = vld [vmem:[%s3312_s30 + $0x888] sm:$0xff] }
 0x247   : > { %v2524_v34 = vadd.f32 %v2523_v29, %v2012_v23  ;;  %v1515_v23 = vsub.f32 %v491_v16, %v1003_v17  ;;  %v2026_v29 = vmul.f32 %v1514_v18, %v1514_v18  ;;  %v504_v17 = vld [vmem:[%s3306_s17 + $0x890] sm:$0xff] }
 0x248   : > { %v1016_v18 = vld [vmem:[%s3312_s30 + $0x890] sm:$0xff] }
 0x249   : > { %v2525_v39 = vadd.f32 %v2524_v34, %v2013_v28  ;;  %v1516_v28 = vsub.f32 %v492_v21, %v1004_v22  ;;  %v2027_v34 = vmul.f32 %v1515_v23, %v1515_v23  ;;  %v505_v22 = vld [vmem:[%s3306_s17 + $0x898] sm:$0xff] }
 0x24a   : > { %v1017_v23 = vld [vmem:[%s3312_s30 + $0x898] sm:$0xff] }
 0x24b   : > { %v2526_v44 = vadd.f32 %v2525_v39, %v2014_v33  ;;  %v1517_v33 = vsub.f32 %v493_v26, %v1005_v27  ;;  %v2028_v39 = vmul.f32 %v1516_v28, %v1516_v28  ;;  %v506_v27 = vld [vmem:[%s3306_s17 + $0x8a0] sm:$0xff] }
 0x24c   : > { %v1018_v28 = vld [vmem:[%s3312_s30 + $0x8a0] sm:$0xff] }
 0x24d   : > { %v2527_v49 = vadd.f32 %v2526_v44, %v2015_v38  ;;  %v1518_v38 = vsub.f32 %v494_v31, %v1006_v32  ;;  %v2029_v44 = vmul.f32 %v1517_v33, %v1517_v33  ;;  %v507_v32 = vld [vmem:[%s3306_s17 + $0x8a8] sm:$0xff] }
 0x24e   : > { %v1019_v33 = vld [vmem:[%s3312_s30 + $0x8a8] sm:$0xff] }
 0x24f   : > { %v2528_v54 = vadd.f32 %v2527_v49, %v2016_v43  ;;  %v1519_v43 = vsub.f32 %v495_v36, %v1007_v37  ;;  %v2030_v49 = vmul.f32 %v1518_v38, %v1518_v38  ;;  %v508_v37 = vld [vmem:[%s3306_s17 + $0x8b0] sm:$0xff] }
 0x250   : > { %v1020_v38 = vld [vmem:[%s3312_s30 + $0x8b0] sm:$0xff] }
 0x251   : > { %v2529_v59 = vadd.f32 %v2528_v54, %v2017_v48  ;;  %v1520_v48 = vsub.f32 %v496_v41, %v1008_v42  ;;  %v2031_v54 = vmul.f32 %v1519_v43, %v1519_v43  ;;  %v509_v42 = vld [vmem:[%s3306_s17 + $0x8b8] sm:$0xff] }
 0x252   : > { %v1021_v43 = vld [vmem:[%s3312_s30 + $0x8b8] sm:$0xff] }
 0x253   : > { %v2530_v0 = vadd.f32 %v2529_v59, %v2018_v53  ;;  %v1521_v53 = vsub.f32 %v497_v46, %v1009_v47  ;;  %v2032_v59 = vmul.f32 %v1520_v48, %v1520_v48  ;;  %v510_v47 = vld [vmem:[%s3306_s17 + $0x8c0] sm:$0xff] }
 0x254   : > { %v1022_v48 = vld [vmem:[%s3312_s30 + $0x8c0] sm:$0xff] }
 0x255   : > { %v2531_v5 = vadd.f32 %v2530_v0, %v2019_v58  ;;  %v1522_v58 = vsub.f32 %v498_v51, %v1010_v52  ;;  %v2033_v0 = vmul.f32 %v1521_v53, %v1521_v53  ;;  %v511_v52 = vld [vmem:[%s3306_s17 + $0x8c8] sm:$0xff] }
 0x256   : > { %v1023_v53 = vld [vmem:[%s3312_s30 + $0x8c8] sm:$0xff] }
 0x257   : > { %v2532_v10 = vadd.f32 %v2531_v5, %v2020_v63  ;;  %v1523_v63 = vsub.f32 %v499_v56, %v1011_v57  ;;  %v2034_v5 = vmul.f32 %v1522_v58, %v1522_v58  ;;  %v512_v57 = vld [vmem:[%s3306_s17 + $0x8d0] sm:$0xff] }
 0x258   : > { %v1024_v58 = vld [vmem:[%s3312_s30 + $0x8d0] sm:$0xff] }
 0x259   : > { %v2533_v15 = vadd.f32 %v2532_v10, %v2021_v4  ;;  %v1524_v4 = vsub.f32 %v500_v61, %v1012_v62  ;;  %v2035_v10 = vmul.f32 %v1523_v63, %v1523_v63  ;;  %v513_v62 = vld [vmem:[%s3306_s17 + $0x8d8] sm:$0xff] }
 0x25a   : > { %v1025_v63 = vld [vmem:[%s3312_s30 + $0x8d8] sm:$0xff] }
 0x25b   : > { %v2534_v20 = vadd.f32 %v2533_v15, %v2022_v9  ;;  %v1525_v9 = vsub.f32 %v501_v2, %v1013_v3  ;;  %v2036_v15 = vmul.f32 %v1524_v4, %v1524_v4  ;;  %v514_v3 = vld [vmem:[%s3306_s17 + $0x8e0] sm:$0xff] }
 0x25c   : > { %v1026_v4 = vld [vmem:[%s3312_s30 + $0x8e0] sm:$0xff] }
 0x25d   : > { %v2535_v25 = vadd.f32 %v2534_v20, %v2023_v14  ;;  %v1526_v14 = vsub.f32 %v502_v7, %v1014_v8  ;;  %v2037_v20 = vmul.f32 %v1525_v9, %v1525_v9  ;;  %v515_v8 = vld [vmem:[%s3306_s17 + $0x8e8] sm:$0xff] }
 0x25e   : > { %v1027_v9 = vld [vmem:[%s3312_s30 + $0x8e8] sm:$0xff] }
 0x25f   : > { %v2536_v30 = vadd.f32 %v2535_v25, %v2024_v19  ;;  %v1527_v19 = vsub.f32 %v503_v12, %v1015_v13  ;;  %v2038_v25 = vmul.f32 %v1526_v14, %v1526_v14  ;;  %v516_v13 = vld [vmem:[%s3306_s17 + $0x8f0] sm:$0xff] }
 0x260   : > { %v1028_v14 = vld [vmem:[%s3312_s30 + $0x8f0] sm:$0xff] }
 0x261   : > { %v2537_v35 = vadd.f32 %v2536_v30, %v2025_v24  ;;  %v1528_v24 = vsub.f32 %v504_v17, %v1016_v18  ;;  %v2039_v30 = vmul.f32 %v1527_v19, %v1527_v19  ;;  %v517_v18 = vld [vmem:[%s3306_s17 + $0x8f8] sm:$0xff] }
 0x262   : > { %v1029_v19 = vld [vmem:[%s3312_s30 + $0x8f8] sm:$0xff] }
 0x263   : > { %v2538_v40 = vadd.f32 %v2537_v35, %v2026_v29  ;;  %v1529_v29 = vsub.f32 %v505_v22, %v1017_v23  ;;  %v2040_v35 = vmul.f32 %v1528_v24, %v1528_v24  ;;  %v518_v23 = vld [vmem:[%s3306_s17 + $0x900] sm:$0xff] }
 0x264   : > { %v1030_v24 = vld [vmem:[%s3312_s30 + $0x900] sm:$0xff] }
 0x265   : > { %v2539_v45 = vadd.f32 %v2538_v40, %v2027_v34  ;;  %v1530_v34 = vsub.f32 %v506_v27, %v1018_v28  ;;  %v2041_v40 = vmul.f32 %v1529_v29, %v1529_v29  ;;  %v519_v28 = vld [vmem:[%s3306_s17 + $0x908] sm:$0xff] }
 0x266   : > { %v1031_v29 = vld [vmem:[%s3312_s30 + $0x908] sm:$0xff] }
 0x267   : > { %v2540_v50 = vadd.f32 %v2539_v45, %v2028_v39  ;;  %v1531_v39 = vsub.f32 %v507_v32, %v1019_v33  ;;  %v2042_v45 = vmul.f32 %v1530_v34, %v1530_v34  ;;  %v520_v33 = vld [vmem:[%s3306_s17 + $0x910] sm:$0xff] }
 0x268   : > { %v1032_v34 = vld [vmem:[%s3312_s30 + $0x910] sm:$0xff] }
 0x269   : > { %v2541_v55 = vadd.f32 %v2540_v50, %v2029_v44  ;;  %v1532_v44 = vsub.f32 %v508_v37, %v1020_v38  ;;  %v2043_v50 = vmul.f32 %v1531_v39, %v1531_v39  ;;  %v521_v38 = vld [vmem:[%s3306_s17 + $0x918] sm:$0xff] }
 0x26a   : > { %v1033_v39 = vld [vmem:[%s3312_s30 + $0x918] sm:$0xff] }
 0x26b   : > { %v2542_v60 = vadd.f32 %v2541_v55, %v2030_v49  ;;  %v1533_v49 = vsub.f32 %v509_v42, %v1021_v43  ;;  %v2044_v55 = vmul.f32 %v1532_v44, %v1532_v44  ;;  %v522_v43 = vld [vmem:[%s3306_s17 + $0x920] sm:$0xff] }
 0x26c   : > { %v1034_v44 = vld [vmem:[%s3312_s30 + $0x920] sm:$0xff] }
 0x26d   : > { %v2543_v1 = vadd.f32 %v2542_v60, %v2031_v54  ;;  %v1534_v54 = vsub.f32 %v510_v47, %v1022_v48  ;;  %v2045_v60 = vmul.f32 %v1533_v49, %v1533_v49  ;;  %v523_v48 = vld [vmem:[%s3306_s17 + $0x928] sm:$0xff] }
 0x26e   : > { %v1035_v49 = vld [vmem:[%s3312_s30 + $0x928] sm:$0xff] }
 0x26f   : > { %v2544_v6 = vadd.f32 %v2543_v1, %v2032_v59  ;;  %v1535_v59 = vsub.f32 %v511_v52, %v1023_v53  ;;  %v2046_v1 = vmul.f32 %v1534_v54, %v1534_v54  ;;  %v524_v53 = vld [vmem:[%s3306_s17 + $0x930] sm:$0xff] }
 0x270   : > { %v1036_v54 = vld [vmem:[%s3312_s30 + $0x930] sm:$0xff] }
 0x271   : > { %v2545_v11 = vadd.f32 %v2544_v6, %v2033_v0  ;;  %v1536_v0 = vsub.f32 %v512_v57, %v1024_v58  ;;  %v2047_v6 = vmul.f32 %v1535_v59, %v1535_v59  ;;  %v525_v58 = vld [vmem:[%s3306_s17 + $0x938] sm:$0xff] }
 0x272   : > { %v1037_v59 = vld [vmem:[%s3312_s30 + $0x938] sm:$0xff] }
 0x273   : > { %v2546_v16 = vadd.f32 %v2545_v11, %v2034_v5  ;;  %v1537_v5 = vsub.f32 %v513_v62, %v1025_v63  ;;  %v2048_v11 = vmul.f32 %v1536_v0, %v1536_v0  ;;  %v526_v63 = vld [vmem:[%s3306_s17 + $0x940] sm:$0xff] }
 0x274   : > { %v1038_v0 = vld [vmem:[%s3312_s30 + $0x940] sm:$0xff] }
 0x275   : > { %v2547_v21 = vadd.f32 %v2546_v16, %v2035_v10  ;;  %v1538_v10 = vsub.f32 %v514_v3, %v1026_v4  ;;  %v2049_v16 = vmul.f32 %v1537_v5, %v1537_v5  ;;  %v527_v4 = vld [vmem:[%s3306_s17 + $0x948] sm:$0xff] }
 0x276   : > { %v1039_v5 = vld [vmem:[%s3312_s30 + $0x948] sm:$0xff] }
 0x277   : > { %v2548_v26 = vadd.f32 %v2547_v21, %v2036_v15  ;;  %v1539_v15 = vsub.f32 %v515_v8, %v1027_v9  ;;  %v2050_v21 = vmul.f32 %v1538_v10, %v1538_v10  ;;  %v528_v9 = vld [vmem:[%s3306_s17 + $0x950] sm:$0xff] }
 0x278   : > { %v1040_v10 = vld [vmem:[%s3312_s30 + $0x950] sm:$0xff] }
 0x279   : > { %v2549_v31 = vadd.f32 %v2548_v26, %v2037_v20  ;;  %v1540_v20 = vsub.f32 %v516_v13, %v1028_v14  ;;  %v2051_v26 = vmul.f32 %v1539_v15, %v1539_v15  ;;  %v529_v14 = vld [vmem:[%s3306_s17 + $0x958] sm:$0xff] }
 0x27a   : > { %v1041_v15 = vld [vmem:[%s3312_s30 + $0x958] sm:$0xff] }
 0x27b   : > { %v2550_v36 = vadd.f32 %v2549_v31, %v2038_v25  ;;  %v1541_v25 = vsub.f32 %v517_v18, %v1029_v19  ;;  %v2052_v31 = vmul.f32 %v1540_v20, %v1540_v20  ;;  %v530_v19 = vld [vmem:[%s3306_s17 + $0x960] sm:$0xff] }
 0x27c   : > { %v1042_v20 = vld [vmem:[%s3312_s30 + $0x960] sm:$0xff] }
 0x27d   : > { %v2551_v41 = vadd.f32 %v2550_v36, %v2039_v30  ;;  %v1542_v30 = vsub.f32 %v518_v23, %v1030_v24  ;;  %v2053_v36 = vmul.f32 %v1541_v25, %v1541_v25  ;;  %v531_v24 = vld [vmem:[%s3306_s17 + $0x968] sm:$0xff] }
 0x27e   : > { %v1043_v25 = vld [vmem:[%s3312_s30 + $0x968] sm:$0xff] }
 0x27f   : > { %v2552_v46 = vadd.f32 %v2551_v41, %v2040_v35  ;;  %v1543_v35 = vsub.f32 %v519_v28, %v1031_v29  ;;  %v2054_v41 = vmul.f32 %v1542_v30, %v1542_v30  ;;  %v532_v29 = vld [vmem:[%s3306_s17 + $0x970] sm:$0xff] }
 0x280   : > { %v1044_v30 = vld [vmem:[%s3312_s30 + $0x970] sm:$0xff] }
 0x281   : > { %v2553_v51 = vadd.f32 %v2552_v46, %v2041_v40  ;;  %v1544_v40 = vsub.f32 %v520_v33, %v1032_v34  ;;  %v2055_v46 = vmul.f32 %v1543_v35, %v1543_v35  ;;  %v533_v34 = vld [vmem:[%s3306_s17 + $0x978] sm:$0xff] }
 0x282   : > { %v1045_v35 = vld [vmem:[%s3312_s30 + $0x978] sm:$0xff] }
 0x283   : > { %v2554_v56 = vadd.f32 %v2553_v51, %v2042_v45  ;;  %v1545_v45 = vsub.f32 %v521_v38, %v1033_v39  ;;  %v2056_v51 = vmul.f32 %v1544_v40, %v1544_v40  ;;  %v534_v39 = vld [vmem:[%s3306_s17 + $0x980] sm:$0xff] }
 0x284   : > { %v1046_v40 = vld [vmem:[%s3312_s30 + $0x980] sm:$0xff] }
 0x285   : > { %v2555_v61 = vadd.f32 %v2554_v56, %v2043_v50  ;;  %v1546_v50 = vsub.f32 %v522_v43, %v1034_v44  ;;  %v2057_v56 = vmul.f32 %v1545_v45, %v1545_v45  ;;  %v535_v44 = vld [vmem:[%s3306_s17 + $0x988] sm:$0xff] }
 0x286   : > { %v1047_v45 = vld [vmem:[%s3312_s30 + $0x988] sm:$0xff] }
 0x287   : > { %v2556_v2 = vadd.f32 %v2555_v61, %v2044_v55  ;;  %v1547_v55 = vsub.f32 %v523_v48, %v1035_v49  ;;  %v2058_v61 = vmul.f32 %v1546_v50, %v1546_v50  ;;  %v536_v49 = vld [vmem:[%s3306_s17 + $0x990] sm:$0xff] }
 0x288   : > { %v1048_v50 = vld [vmem:[%s3312_s30 + $0x990] sm:$0xff] }
 0x289   : > { %v2557_v7 = vadd.f32 %v2556_v2, %v2045_v60  ;;  %v1548_v60 = vsub.f32 %v524_v53, %v1036_v54  ;;  %v2059_v2 = vmul.f32 %v1547_v55, %v1547_v55  ;;  %v537_v54 = vld [vmem:[%s3306_s17 + $0x998] sm:$0xff] }
 0x28a   : > { %v1049_v55 = vld [vmem:[%s3312_s30 + $0x998] sm:$0xff] }
 0x28b   : > { %v2558_v12 = vadd.f32 %v2557_v7, %v2046_v1  ;;  %v1549_v1 = vsub.f32 %v525_v58, %v1037_v59  ;;  %v2060_v7 = vmul.f32 %v1548_v60, %v1548_v60  ;;  %v538_v59 = vld [vmem:[%s3306_s17 + $0x9a0] sm:$0xff] }
 0x28c   : > { %v1050_v60 = vld [vmem:[%s3312_s30 + $0x9a0] sm:$0xff] }
 0x28d   : > { %v2559_v17 = vadd.f32 %v2558_v12, %v2047_v6  ;;  %v1550_v6 = vsub.f32 %v526_v63, %v1038_v0  ;;  %v2061_v12 = vmul.f32 %v1549_v1, %v1549_v1  ;;  %v539_v0 = vld [vmem:[%s3306_s17 + $0x9a8] sm:$0xff] }
 0x28e   : > { %v1051_v1 = vld [vmem:[%s3312_s30 + $0x9a8] sm:$0xff] }
 0x28f   : > { %v2560_v22 = vadd.f32 %v2559_v17, %v2048_v11  ;;  %v1551_v11 = vsub.f32 %v527_v4, %v1039_v5  ;;  %v2062_v17 = vmul.f32 %v1550_v6, %v1550_v6  ;;  %v540_v5 = vld [vmem:[%s3306_s17 + $0x9b0] sm:$0xff] }
 0x290   : > { %v1052_v6 = vld [vmem:[%s3312_s30 + $0x9b0] sm:$0xff] }
 0x291   : > { %v2561_v27 = vadd.f32 %v2560_v22, %v2049_v16  ;;  %v1552_v16 = vsub.f32 %v528_v9, %v1040_v10  ;;  %v2063_v22 = vmul.f32 %v1551_v11, %v1551_v11  ;;  %v541_v10 = vld [vmem:[%s3306_s17 + $0x9b8] sm:$0xff] }
 0x292   : > { %v1053_v11 = vld [vmem:[%s3312_s30 + $0x9b8] sm:$0xff] }
 0x293   : > { %v2562_v32 = vadd.f32 %v2561_v27, %v2050_v21  ;;  %v1553_v21 = vsub.f32 %v529_v14, %v1041_v15  ;;  %v2064_v27 = vmul.f32 %v1552_v16, %v1552_v16  ;;  %v542_v15 = vld [vmem:[%s3306_s17 + $0x9c0] sm:$0xff] }
 0x294   : > { %v1054_v16 = vld [vmem:[%s3312_s30 + $0x9c0] sm:$0xff] }
 0x295   : > { %v2563_v37 = vadd.f32 %v2562_v32, %v2051_v26  ;;  %v1554_v26 = vsub.f32 %v530_v19, %v1042_v20  ;;  %v2065_v32 = vmul.f32 %v1553_v21, %v1553_v21  ;;  %v543_v20 = vld [vmem:[%s3306_s17 + $0x9c8] sm:$0xff] }
 0x296   : > { %v1055_v21 = vld [vmem:[%s3312_s30 + $0x9c8] sm:$0xff] }
 0x297   : > { %v2564_v42 = vadd.f32 %v2563_v37, %v2052_v31  ;;  %v1555_v31 = vsub.f32 %v531_v24, %v1043_v25  ;;  %v2066_v37 = vmul.f32 %v1554_v26, %v1554_v26  ;;  %v544_v25 = vld [vmem:[%s3306_s17 + $0x9d0] sm:$0xff] }
 0x298   : > { %v1056_v26 = vld [vmem:[%s3312_s30 + $0x9d0] sm:$0xff] }
 0x299   : > { %v2565_v47 = vadd.f32 %v2564_v42, %v2053_v36  ;;  %v1556_v36 = vsub.f32 %v532_v29, %v1044_v30  ;;  %v2067_v42 = vmul.f32 %v1555_v31, %v1555_v31  ;;  %v545_v30 = vld [vmem:[%s3306_s17 + $0x9d8] sm:$0xff] }
 0x29a   : > { %v1057_v31 = vld [vmem:[%s3312_s30 + $0x9d8] sm:$0xff] }
 0x29b   : > { %v2566_v52 = vadd.f32 %v2565_v47, %v2054_v41  ;;  %v1557_v41 = vsub.f32 %v533_v34, %v1045_v35  ;;  %v2068_v47 = vmul.f32 %v1556_v36, %v1556_v36  ;;  %v546_v35 = vld [vmem:[%s3306_s17 + $0x9e0] sm:$0xff] }
 0x29c   : > { %v1058_v36 = vld [vmem:[%s3312_s30 + $0x9e0] sm:$0xff] }
 0x29d   : > { %v2567_v57 = vadd.f32 %v2566_v52, %v2055_v46  ;;  %v1558_v46 = vsub.f32 %v534_v39, %v1046_v40  ;;  %v2069_v52 = vmul.f32 %v1557_v41, %v1557_v41  ;;  %v547_v40 = vld [vmem:[%s3306_s17 + $0x9e8] sm:$0xff] }
 0x29e   : > { %v1059_v41 = vld [vmem:[%s3312_s30 + $0x9e8] sm:$0xff] }
 0x29f   : > { %v2568_v62 = vadd.f32 %v2567_v57, %v2056_v51  ;;  %v1559_v51 = vsub.f32 %v535_v44, %v1047_v45  ;;  %v2070_v57 = vmul.f32 %v1558_v46, %v1558_v46  ;;  %v548_v45 = vld [vmem:[%s3306_s17 + $0x9f0] sm:$0xff] }
 0x2a0   : > { %v1060_v46 = vld [vmem:[%s3312_s30 + $0x9f0] sm:$0xff] }
 0x2a1   : > { %v2569_v3 = vadd.f32 %v2568_v62, %v2057_v56  ;;  %v1560_v56 = vsub.f32 %v536_v49, %v1048_v50  ;;  %v2071_v62 = vmul.f32 %v1559_v51, %v1559_v51  ;;  %v549_v50 = vld [vmem:[%s3306_s17 + $0x9f8] sm:$0xff] }
 0x2a2   : > { %v1061_v51 = vld [vmem:[%s3312_s30 + $0x9f8] sm:$0xff] }
 0x2a3   : > { %v2570_v8 = vadd.f32 %v2569_v3, %v2058_v61  ;;  %v1561_v61 = vsub.f32 %v537_v54, %v1049_v55  ;;  %v2072_v3 = vmul.f32 %v1560_v56, %v1560_v56  ;;  %v550_v55 = vld [vmem:[%s3306_s17 + $0xa00] sm:$0xff] }
 0x2a4   : > { %v1062_v56 = vld [vmem:[%s3312_s30 + $0xa00] sm:$0xff] }
 0x2a5   : > { %v2571_v13 = vadd.f32 %v2570_v8, %v2059_v2  ;;  %v1562_v2 = vsub.f32 %v538_v59, %v1050_v60  ;;  %v2073_v8 = vmul.f32 %v1561_v61, %v1561_v61  ;;  %v551_v60 = vld [vmem:[%s3306_s17 + $0xa08] sm:$0xff] }
 0x2a6   : > { %v1063_v61 = vld [vmem:[%s3312_s30 + $0xa08] sm:$0xff] }
 0x2a7   : > { %v2572_v18 = vadd.f32 %v2571_v13, %v2060_v7  ;;  %v1563_v7 = vsub.f32 %v539_v0, %v1051_v1  ;;  %v2074_v13 = vmul.f32 %v1562_v2, %v1562_v2  ;;  %v552_v1 = vld [vmem:[%s3306_s17 + $0xa10] sm:$0xff] }
 0x2a8   : > { %v1064_v2 = vld [vmem:[%s3312_s30 + $0xa10] sm:$0xff] }
 0x2a9   : > { %v2573_v23 = vadd.f32 %v2572_v18, %v2061_v12  ;;  %v1564_v12 = vsub.f32 %v540_v5, %v1052_v6  ;;  %v2075_v18 = vmul.f32 %v1563_v7, %v1563_v7  ;;  %v553_v6 = vld [vmem:[%s3306_s17 + $0xa18] sm:$0xff] }
 0x2aa   : > { %v1065_v7 = vld [vmem:[%s3312_s30 + $0xa18] sm:$0xff] }
 0x2ab   : > { %v2574_v28 = vadd.f32 %v2573_v23, %v2062_v17  ;;  %v1565_v17 = vsub.f32 %v541_v10, %v1053_v11  ;;  %v2076_v23 = vmul.f32 %v1564_v12, %v1564_v12  ;;  %v554_v11 = vld [vmem:[%s3306_s17 + $0xa20] sm:$0xff] }
 0x2ac   : > { %v1066_v12 = vld [vmem:[%s3312_s30 + $0xa20] sm:$0xff] }
 0x2ad   : > { %v2575_v33 = vadd.f32 %v2574_v28, %v2063_v22  ;;  %v1566_v22 = vsub.f32 %v542_v15, %v1054_v16  ;;  %v2077_v28 = vmul.f32 %v1565_v17, %v1565_v17  ;;  %v555_v16 = vld [vmem:[%s3306_s17 + $0xa28] sm:$0xff] }
 0x2ae   : > { %v1067_v17 = vld [vmem:[%s3312_s30 + $0xa28] sm:$0xff] }
 0x2af   : > { %v2576_v38 = vadd.f32 %v2575_v33, %v2064_v27  ;;  %v1567_v27 = vsub.f32 %v543_v20, %v1055_v21  ;;  %v2078_v33 = vmul.f32 %v1566_v22, %v1566_v22  ;;  %v556_v21 = vld [vmem:[%s3306_s17 + $0xa30] sm:$0xff] }
 0x2b0   : > { %v1068_v22 = vld [vmem:[%s3312_s30 + $0xa30] sm:$0xff] }
 0x2b1   : > { %v2577_v43 = vadd.f32 %v2576_v38, %v2065_v32  ;;  %v1568_v32 = vsub.f32 %v544_v25, %v1056_v26  ;;  %v2079_v38 = vmul.f32 %v1567_v27, %v1567_v27  ;;  %v557_v26 = vld [vmem:[%s3306_s17 + $0xa38] sm:$0xff] }
 0x2b2   : > { %v1069_v27 = vld [vmem:[%s3312_s30 + $0xa38] sm:$0xff] }
 0x2b3   : > { %v2578_v48 = vadd.f32 %v2577_v43, %v2066_v37  ;;  %v1569_v37 = vsub.f32 %v545_v30, %v1057_v31  ;;  %v2080_v43 = vmul.f32 %v1568_v32, %v1568_v32  ;;  %v558_v31 = vld [vmem:[%s3306_s17 + $0xa40] sm:$0xff] }
 0x2b4   : > { %v1070_v32 = vld [vmem:[%s3312_s30 + $0xa40] sm:$0xff] }
 0x2b5   : > { %v2579_v53 = vadd.f32 %v2578_v48, %v2067_v42  ;;  %v1570_v42 = vsub.f32 %v546_v35, %v1058_v36  ;;  %v2081_v48 = vmul.f32 %v1569_v37, %v1569_v37  ;;  %v559_v36 = vld [vmem:[%s3306_s17 + $0xa48] sm:$0xff] }
 0x2b6   : > { %v1071_v37 = vld [vmem:[%s3312_s30 + $0xa48] sm:$0xff] }
 0x2b7   : > { %v2580_v58 = vadd.f32 %v2579_v53, %v2068_v47  ;;  %v1571_v47 = vsub.f32 %v547_v40, %v1059_v41  ;;  %v2082_v53 = vmul.f32 %v1570_v42, %v1570_v42  ;;  %v560_v41 = vld [vmem:[%s3306_s17 + $0xa50] sm:$0xff] }
 0x2b8   : > { %v1072_v42 = vld [vmem:[%s3312_s30 + $0xa50] sm:$0xff] }
 0x2b9   : > { %v2581_v63 = vadd.f32 %v2580_v58, %v2069_v52  ;;  %v1572_v52 = vsub.f32 %v548_v45, %v1060_v46  ;;  %v2083_v58 = vmul.f32 %v1571_v47, %v1571_v47  ;;  %v561_v46 = vld [vmem:[%s3306_s17 + $0xa58] sm:$0xff] }
 0x2ba   : > { %v1073_v47 = vld [vmem:[%s3312_s30 + $0xa58] sm:$0xff] }
 0x2bb   : > { %v2582_v4 = vadd.f32 %v2581_v63, %v2070_v57  ;;  %v1573_v57 = vsub.f32 %v549_v50, %v1061_v51  ;;  %v2084_v63 = vmul.f32 %v1572_v52, %v1572_v52  ;;  %v562_v51 = vld [vmem:[%s3306_s17 + $0xa60] sm:$0xff] }
 0x2bc   : > { %v1074_v52 = vld [vmem:[%s3312_s30 + $0xa60] sm:$0xff] }
 0x2bd   : > { %v2583_v9 = vadd.f32 %v2582_v4, %v2071_v62  ;;  %v1574_v62 = vsub.f32 %v550_v55, %v1062_v56  ;;  %v2085_v4 = vmul.f32 %v1573_v57, %v1573_v57  ;;  %v563_v56 = vld [vmem:[%s3306_s17 + $0xa68] sm:$0xff] }
 0x2be   : > { %v1075_v57 = vld [vmem:[%s3312_s30 + $0xa68] sm:$0xff] }
 0x2bf   : > { %v2584_v14 = vadd.f32 %v2583_v9, %v2072_v3  ;;  %v1575_v3 = vsub.f32 %v551_v60, %v1063_v61  ;;  %v2086_v9 = vmul.f32 %v1574_v62, %v1574_v62  ;;  %v564_v61 = vld [vmem:[%s3306_s17 + $0xa70] sm:$0xff] }
 0x2c0   : > { %v1076_v62 = vld [vmem:[%s3312_s30 + $0xa70] sm:$0xff] }
 0x2c1   : > { %v2585_v19 = vadd.f32 %v2584_v14, %v2073_v8  ;;  %v1576_v8 = vsub.f32 %v552_v1, %v1064_v2  ;;  %v2087_v14 = vmul.f32 %v1575_v3, %v1575_v3  ;;  %v565_v2 = vld [vmem:[%s3306_s17 + $0xa78] sm:$0xff] }
 0x2c2   : > { %v1077_v3 = vld [vmem:[%s3312_s30 + $0xa78] sm:$0xff] }
 0x2c3   : > { %v2586_v24 = vadd.f32 %v2585_v19, %v2074_v13  ;;  %v1577_v13 = vsub.f32 %v553_v6, %v1065_v7  ;;  %v2088_v19 = vmul.f32 %v1576_v8, %v1576_v8  ;;  %v566_v7 = vld [vmem:[%s3306_s17 + $0xa80] sm:$0xff] }
 0x2c4   : > { %v1078_v8 = vld [vmem:[%s3312_s30 + $0xa80] sm:$0xff] }
 0x2c5   : > { %v2587_v29 = vadd.f32 %v2586_v24, %v2075_v18  ;;  %v1578_v18 = vsub.f32 %v554_v11, %v1066_v12  ;;  %v2089_v24 = vmul.f32 %v1577_v13, %v1577_v13  ;;  %v567_v12 = vld [vmem:[%s3306_s17 + $0xa88] sm:$0xff] }
 0x2c6   : > { %v1079_v13 = vld [vmem:[%s3312_s30 + $0xa88] sm:$0xff] }
 0x2c7   : > { %v2588_v34 = vadd.f32 %v2587_v29, %v2076_v23  ;;  %v1579_v23 = vsub.f32 %v555_v16, %v1067_v17  ;;  %v2090_v29 = vmul.f32 %v1578_v18, %v1578_v18  ;;  %v568_v17 = vld [vmem:[%s3306_s17 + $0xa90] sm:$0xff] }
 0x2c8   : > { %v1080_v18 = vld [vmem:[%s3312_s30 + $0xa90] sm:$0xff] }
 0x2c9   : > { %v2589_v39 = vadd.f32 %v2588_v34, %v2077_v28  ;;  %v1580_v28 = vsub.f32 %v556_v21, %v1068_v22  ;;  %v2091_v34 = vmul.f32 %v1579_v23, %v1579_v23  ;;  %v569_v22 = vld [vmem:[%s3306_s17 + $0xa98] sm:$0xff] }
 0x2ca   : > { %v1081_v23 = vld [vmem:[%s3312_s30 + $0xa98] sm:$0xff] }
 0x2cb   : > { %v2590_v44 = vadd.f32 %v2589_v39, %v2078_v33  ;;  %v1581_v33 = vsub.f32 %v557_v26, %v1069_v27  ;;  %v2092_v39 = vmul.f32 %v1580_v28, %v1580_v28  ;;  %v570_v27 = vld [vmem:[%s3306_s17 + $0xaa0] sm:$0xff] }
 0x2cc   : > { %v1082_v28 = vld [vmem:[%s3312_s30 + $0xaa0] sm:$0xff] }
 0x2cd   : > { %v2591_v49 = vadd.f32 %v2590_v44, %v2079_v38  ;;  %v1582_v38 = vsub.f32 %v558_v31, %v1070_v32  ;;  %v2093_v44 = vmul.f32 %v1581_v33, %v1581_v33  ;;  %v571_v32 = vld [vmem:[%s3306_s17 + $0xaa8] sm:$0xff] }
 0x2ce   : > { %v1083_v33 = vld [vmem:[%s3312_s30 + $0xaa8] sm:$0xff] }
 0x2cf   : > { %v2592_v54 = vadd.f32 %v2591_v49, %v2080_v43  ;;  %v1583_v43 = vsub.f32 %v559_v36, %v1071_v37  ;;  %v2094_v49 = vmul.f32 %v1582_v38, %v1582_v38  ;;  %v572_v37 = vld [vmem:[%s3306_s17 + $0xab0] sm:$0xff] }
 0x2d0   : > { %v1084_v38 = vld [vmem:[%s3312_s30 + $0xab0] sm:$0xff] }
 0x2d1   : > { %v2593_v59 = vadd.f32 %v2592_v54, %v2081_v48  ;;  %v1584_v48 = vsub.f32 %v560_v41, %v1072_v42  ;;  %v2095_v54 = vmul.f32 %v1583_v43, %v1583_v43  ;;  %v573_v42 = vld [vmem:[%s3306_s17 + $0xab8] sm:$0xff] }
 0x2d2   : > { %v1085_v43 = vld [vmem:[%s3312_s30 + $0xab8] sm:$0xff] }
 0x2d3   : > { %v2594_v0 = vadd.f32 %v2593_v59, %v2082_v53  ;;  %v1585_v53 = vsub.f32 %v561_v46, %v1073_v47  ;;  %v2096_v59 = vmul.f32 %v1584_v48, %v1584_v48  ;;  %v574_v47 = vld [vmem:[%s3306_s17 + $0xac0] sm:$0xff] }
 0x2d4   : > { %v1086_v48 = vld [vmem:[%s3312_s30 + $0xac0] sm:$0xff] }
 0x2d5   : > { %v2595_v5 = vadd.f32 %v2594_v0, %v2083_v58  ;;  %v1586_v58 = vsub.f32 %v562_v51, %v1074_v52  ;;  %v2097_v0 = vmul.f32 %v1585_v53, %v1585_v53  ;;  %v575_v52 = vld [vmem:[%s3306_s17 + $0xac8] sm:$0xff] }
 0x2d6   : > { %v1087_v53 = vld [vmem:[%s3312_s30 + $0xac8] sm:$0xff] }
 0x2d7   : > { %v2596_v10 = vadd.f32 %v2595_v5, %v2084_v63  ;;  %v1587_v63 = vsub.f32 %v563_v56, %v1075_v57  ;;  %v2098_v5 = vmul.f32 %v1586_v58, %v1586_v58  ;;  %v576_v57 = vld [vmem:[%s3306_s17 + $0xad0] sm:$0xff] }
 0x2d8   : > { %v1088_v58 = vld [vmem:[%s3312_s30 + $0xad0] sm:$0xff] }
 0x2d9   : > { %v2597_v15 = vadd.f32 %v2596_v10, %v2085_v4  ;;  %v1588_v4 = vsub.f32 %v564_v61, %v1076_v62  ;;  %v2099_v10 = vmul.f32 %v1587_v63, %v1587_v63  ;;  %v577_v62 = vld [vmem:[%s3306_s17 + $0xad8] sm:$0xff] }
 0x2da   : > { %v1089_v63 = vld [vmem:[%s3312_s30 + $0xad8] sm:$0xff] }
 0x2db   : > { %v2598_v20 = vadd.f32 %v2597_v15, %v2086_v9  ;;  %v1589_v9 = vsub.f32 %v565_v2, %v1077_v3  ;;  %v2100_v15 = vmul.f32 %v1588_v4, %v1588_v4  ;;  %v578_v3 = vld [vmem:[%s3306_s17 + $0xae0] sm:$0xff] }
 0x2dc   : > { %v1090_v4 = vld [vmem:[%s3312_s30 + $0xae0] sm:$0xff] }
 0x2dd   : > { %v2599_v25 = vadd.f32 %v2598_v20, %v2087_v14  ;;  %v1590_v14 = vsub.f32 %v566_v7, %v1078_v8  ;;  %v2101_v20 = vmul.f32 %v1589_v9, %v1589_v9  ;;  %v579_v8 = vld [vmem:[%s3306_s17 + $0xae8] sm:$0xff] }
 0x2de   : > { %v1091_v9 = vld [vmem:[%s3312_s30 + $0xae8] sm:$0xff] }
 0x2df   : > { %v2600_v30 = vadd.f32 %v2599_v25, %v2088_v19  ;;  %v1591_v19 = vsub.f32 %v567_v12, %v1079_v13  ;;  %v2102_v25 = vmul.f32 %v1590_v14, %v1590_v14  ;;  %v580_v13 = vld [vmem:[%s3306_s17 + $0xaf0] sm:$0xff] }
 0x2e0   : > { %v1092_v14 = vld [vmem:[%s3312_s30 + $0xaf0] sm:$0xff] }
 0x2e1   : > { %v2601_v35 = vadd.f32 %v2600_v30, %v2089_v24  ;;  %v1592_v24 = vsub.f32 %v568_v17, %v1080_v18  ;;  %v2103_v30 = vmul.f32 %v1591_v19, %v1591_v19  ;;  %v581_v18 = vld [vmem:[%s3306_s17 + $0xaf8] sm:$0xff] }
 0x2e2   : > { %v1093_v19 = vld [vmem:[%s3312_s30 + $0xaf8] sm:$0xff] }
 0x2e3   : > { %v2602_v40 = vadd.f32 %v2601_v35, %v2090_v29  ;;  %v1593_v29 = vsub.f32 %v569_v22, %v1081_v23  ;;  %v2104_v35 = vmul.f32 %v1592_v24, %v1592_v24  ;;  %v582_v23 = vld [vmem:[%s3306_s17 + $0xb00] sm:$0xff] }
 0x2e4   : > { %v1094_v24 = vld [vmem:[%s3312_s30 + $0xb00] sm:$0xff] }
 0x2e5   : > { %v2603_v45 = vadd.f32 %v2602_v40, %v2091_v34  ;;  %v1594_v34 = vsub.f32 %v570_v27, %v1082_v28  ;;  %v2105_v40 = vmul.f32 %v1593_v29, %v1593_v29  ;;  %v583_v28 = vld [vmem:[%s3306_s17 + $0xb08] sm:$0xff] }
 0x2e6   : > { %v1095_v29 = vld [vmem:[%s3312_s30 + $0xb08] sm:$0xff] }
 0x2e7   : > { %v2604_v50 = vadd.f32 %v2603_v45, %v2092_v39  ;;  %v1595_v39 = vsub.f32 %v571_v32, %v1083_v33  ;;  %v2106_v45 = vmul.f32 %v1594_v34, %v1594_v34  ;;  %v584_v33 = vld [vmem:[%s3306_s17 + $0xb10] sm:$0xff] }
 0x2e8   : > { %v1096_v34 = vld [vmem:[%s3312_s30 + $0xb10] sm:$0xff] }
 0x2e9   : > { %v2605_v55 = vadd.f32 %v2604_v50, %v2093_v44  ;;  %v1596_v44 = vsub.f32 %v572_v37, %v1084_v38  ;;  %v2107_v50 = vmul.f32 %v1595_v39, %v1595_v39  ;;  %v585_v38 = vld [vmem:[%s3306_s17 + $0xb18] sm:$0xff] }
 0x2ea   : > { %v1097_v39 = vld [vmem:[%s3312_s30 + $0xb18] sm:$0xff] }
 0x2eb   : > { %v2606_v60 = vadd.f32 %v2605_v55, %v2094_v49  ;;  %v1597_v49 = vsub.f32 %v573_v42, %v1085_v43  ;;  %v2108_v55 = vmul.f32 %v1596_v44, %v1596_v44  ;;  %v586_v43 = vld [vmem:[%s3306_s17 + $0xb20] sm:$0xff] }
 0x2ec   : > { %v1098_v44 = vld [vmem:[%s3312_s30 + $0xb20] sm:$0xff] }
 0x2ed   : > { %v2607_v1 = vadd.f32 %v2606_v60, %v2095_v54  ;;  %v1598_v54 = vsub.f32 %v574_v47, %v1086_v48  ;;  %v2109_v60 = vmul.f32 %v1597_v49, %v1597_v49  ;;  %v587_v48 = vld [vmem:[%s3306_s17 + $0xb28] sm:$0xff] }
 0x2ee   : > { %v1099_v49 = vld [vmem:[%s3312_s30 + $0xb28] sm:$0xff] }
 0x2ef   : > { %v2608_v6 = vadd.f32 %v2607_v1, %v2096_v59  ;;  %v1599_v59 = vsub.f32 %v575_v52, %v1087_v53  ;;  %v2110_v1 = vmul.f32 %v1598_v54, %v1598_v54  ;;  %v588_v53 = vld [vmem:[%s3306_s17 + $0xb30] sm:$0xff] }
 0x2f0   : > { %v1100_v54 = vld [vmem:[%s3312_s30 + $0xb30] sm:$0xff] }
 0x2f1   : > { %v2609_v11 = vadd.f32 %v2608_v6, %v2097_v0  ;;  %v1600_v0 = vsub.f32 %v576_v57, %v1088_v58  ;;  %v2111_v6 = vmul.f32 %v1599_v59, %v1599_v59  ;;  %v589_v58 = vld [vmem:[%s3306_s17 + $0xb38] sm:$0xff] }
 0x2f2   : > { %v1101_v59 = vld [vmem:[%s3312_s30 + $0xb38] sm:$0xff] }
 0x2f3   : > { %v2610_v16 = vadd.f32 %v2609_v11, %v2098_v5  ;;  %v1601_v5 = vsub.f32 %v577_v62, %v1089_v63  ;;  %v2112_v11 = vmul.f32 %v1600_v0, %v1600_v0  ;;  %v590_v63 = vld [vmem:[%s3306_s17 + $0xb40] sm:$0xff] }
 0x2f4   : > { %v1102_v0 = vld [vmem:[%s3312_s30 + $0xb40] sm:$0xff] }
 0x2f5   : > { %v2611_v21 = vadd.f32 %v2610_v16, %v2099_v10  ;;  %v1602_v10 = vsub.f32 %v578_v3, %v1090_v4  ;;  %v2113_v16 = vmul.f32 %v1601_v5, %v1601_v5  ;;  %v591_v4 = vld [vmem:[%s3306_s17 + $0xb48] sm:$0xff] }
 0x2f6   : > { %v1103_v5 = vld [vmem:[%s3312_s30 + $0xb48] sm:$0xff] }
 0x2f7   : > { %v2612_v26 = vadd.f32 %v2611_v21, %v2100_v15  ;;  %v1603_v15 = vsub.f32 %v579_v8, %v1091_v9  ;;  %v2114_v21 = vmul.f32 %v1602_v10, %v1602_v10  ;;  %v592_v9 = vld [vmem:[%s3306_s17 + $0xb50] sm:$0xff] }
 0x2f8   : > { %v1104_v10 = vld [vmem:[%s3312_s30 + $0xb50] sm:$0xff] }
 0x2f9   : > { %v2613_v31 = vadd.f32 %v2612_v26, %v2101_v20  ;;  %v1604_v20 = vsub.f32 %v580_v13, %v1092_v14  ;;  %v2115_v26 = vmul.f32 %v1603_v15, %v1603_v15  ;;  %v593_v14 = vld [vmem:[%s3306_s17 + $0xb58] sm:$0xff] }
 0x2fa   : > { %v1105_v15 = vld [vmem:[%s3312_s30 + $0xb58] sm:$0xff] }
 0x2fb   : > { %v2614_v36 = vadd.f32 %v2613_v31, %v2102_v25  ;;  %v1605_v25 = vsub.f32 %v581_v18, %v1093_v19  ;;  %v2116_v31 = vmul.f32 %v1604_v20, %v1604_v20  ;;  %v594_v19 = vld [vmem:[%s3306_s17 + $0xb60] sm:$0xff] }
 0x2fc   : > { %v1106_v20 = vld [vmem:[%s3312_s30 + $0xb60] sm:$0xff] }
 0x2fd   : > { %v2615_v41 = vadd.f32 %v2614_v36, %v2103_v30  ;;  %v1606_v30 = vsub.f32 %v582_v23, %v1094_v24  ;;  %v2117_v36 = vmul.f32 %v1605_v25, %v1605_v25  ;;  %v595_v24 = vld [vmem:[%s3306_s17 + $0xb68] sm:$0xff] }
 0x2fe   : > { %v1107_v25 = vld [vmem:[%s3312_s30 + $0xb68] sm:$0xff] }
 0x2ff   : > { %v2616_v46 = vadd.f32 %v2615_v41, %v2104_v35  ;;  %v1607_v35 = vsub.f32 %v583_v28, %v1095_v29  ;;  %v2118_v41 = vmul.f32 %v1606_v30, %v1606_v30  ;;  %v596_v29 = vld [vmem:[%s3306_s17 + $0xb70] sm:$0xff] }
 0x300   : > { %v1108_v30 = vld [vmem:[%s3312_s30 + $0xb70] sm:$0xff] }
 0x301   : > { %v2617_v51 = vadd.f32 %v2616_v46, %v2105_v40  ;;  %v1608_v40 = vsub.f32 %v584_v33, %v1096_v34  ;;  %v2119_v46 = vmul.f32 %v1607_v35, %v1607_v35  ;;  %v597_v34 = vld [vmem:[%s3306_s17 + $0xb78] sm:$0xff] }
 0x302   : > { %v1109_v35 = vld [vmem:[%s3312_s30 + $0xb78] sm:$0xff] }
 0x303   : > { %v2618_v56 = vadd.f32 %v2617_v51, %v2106_v45  ;;  %v1609_v45 = vsub.f32 %v585_v38, %v1097_v39  ;;  %v2120_v51 = vmul.f32 %v1608_v40, %v1608_v40  ;;  %v598_v39 = vld [vmem:[%s3306_s17 + $0xb80] sm:$0xff] }
 0x304   : > { %v1110_v40 = vld [vmem:[%s3312_s30 + $0xb80] sm:$0xff] }
 0x305   : > { %v2619_v61 = vadd.f32 %v2618_v56, %v2107_v50  ;;  %v1610_v50 = vsub.f32 %v586_v43, %v1098_v44  ;;  %v2121_v56 = vmul.f32 %v1609_v45, %v1609_v45  ;;  %v599_v44 = vld [vmem:[%s3306_s17 + $0xb88] sm:$0xff] }
 0x306   : > { %v1111_v45 = vld [vmem:[%s3312_s30 + $0xb88] sm:$0xff] }
 0x307   : > { %v2620_v2 = vadd.f32 %v2619_v61, %v2108_v55  ;;  %v1611_v55 = vsub.f32 %v587_v48, %v1099_v49  ;;  %v2122_v61 = vmul.f32 %v1610_v50, %v1610_v50  ;;  %v600_v49 = vld [vmem:[%s3306_s17 + $0xb90] sm:$0xff] }
 0x308   : > { %v1112_v50 = vld [vmem:[%s3312_s30 + $0xb90] sm:$0xff] }
 0x309   : > { %v2621_v7 = vadd.f32 %v2620_v2, %v2109_v60  ;;  %v1612_v60 = vsub.f32 %v588_v53, %v1100_v54  ;;  %v2123_v2 = vmul.f32 %v1611_v55, %v1611_v55  ;;  %v601_v54 = vld [vmem:[%s3306_s17 + $0xb98] sm:$0xff] }
 0x30a   : > { %v1113_v55 = vld [vmem:[%s3312_s30 + $0xb98] sm:$0xff] }
 0x30b   : > { %v2622_v12 = vadd.f32 %v2621_v7, %v2110_v1  ;;  %v1613_v1 = vsub.f32 %v589_v58, %v1101_v59  ;;  %v2124_v7 = vmul.f32 %v1612_v60, %v1612_v60  ;;  %v602_v59 = vld [vmem:[%s3306_s17 + $0xba0] sm:$0xff] }
 0x30c   : > { %v1114_v60 = vld [vmem:[%s3312_s30 + $0xba0] sm:$0xff] }
 0x30d   : > { %v2623_v17 = vadd.f32 %v2622_v12, %v2111_v6  ;;  %v1614_v6 = vsub.f32 %v590_v63, %v1102_v0  ;;  %v2125_v12 = vmul.f32 %v1613_v1, %v1613_v1  ;;  %v603_v0 = vld [vmem:[%s3306_s17 + $0xba8] sm:$0xff] }
 0x30e   : > { %v1115_v1 = vld [vmem:[%s3312_s30 + $0xba8] sm:$0xff] }
 0x30f   : > { %v2624_v22 = vadd.f32 %v2623_v17, %v2112_v11  ;;  %v1615_v11 = vsub.f32 %v591_v4, %v1103_v5  ;;  %v2126_v17 = vmul.f32 %v1614_v6, %v1614_v6  ;;  %v604_v5 = vld [vmem:[%s3306_s17 + $0xbb0] sm:$0xff] }
 0x310   : > { %v1116_v6 = vld [vmem:[%s3312_s30 + $0xbb0] sm:$0xff] }
 0x311   : > { %v2625_v27 = vadd.f32 %v2624_v22, %v2113_v16  ;;  %v1616_v16 = vsub.f32 %v592_v9, %v1104_v10  ;;  %v2127_v22 = vmul.f32 %v1615_v11, %v1615_v11  ;;  %v605_v10 = vld [vmem:[%s3306_s17 + $0xbb8] sm:$0xff] }
 0x312   : > { %v1117_v11 = vld [vmem:[%s3312_s30 + $0xbb8] sm:$0xff] }
 0x313   : > { %v2626_v32 = vadd.f32 %v2625_v27, %v2114_v21  ;;  %v1617_v21 = vsub.f32 %v593_v14, %v1105_v15  ;;  %v2128_v27 = vmul.f32 %v1616_v16, %v1616_v16  ;;  %v606_v15 = vld [vmem:[%s3306_s17 + $0xbc0] sm:$0xff] }
 0x314   : > { %v1118_v16 = vld [vmem:[%s3312_s30 + $0xbc0] sm:$0xff] }
 0x315   : > { %v2627_v37 = vadd.f32 %v2626_v32, %v2115_v26  ;;  %v1618_v26 = vsub.f32 %v594_v19, %v1106_v20  ;;  %v2129_v32 = vmul.f32 %v1617_v21, %v1617_v21  ;;  %v607_v20 = vld [vmem:[%s3306_s17 + $0xbc8] sm:$0xff] }
 0x316   : > { %v1119_v21 = vld [vmem:[%s3312_s30 + $0xbc8] sm:$0xff] }
 0x317   : > { %v2628_v42 = vadd.f32 %v2627_v37, %v2116_v31  ;;  %v1619_v31 = vsub.f32 %v595_v24, %v1107_v25  ;;  %v2130_v37 = vmul.f32 %v1618_v26, %v1618_v26  ;;  %v608_v25 = vld [vmem:[%s3306_s17 + $0xbd0] sm:$0xff] }
 0x318   : > { %v1120_v26 = vld [vmem:[%s3312_s30 + $0xbd0] sm:$0xff] }
 0x319   : > { %v2629_v47 = vadd.f32 %v2628_v42, %v2117_v36  ;;  %v1620_v36 = vsub.f32 %v596_v29, %v1108_v30  ;;  %v2131_v42 = vmul.f32 %v1619_v31, %v1619_v31  ;;  %v609_v30 = vld [vmem:[%s3306_s17 + $0xbd8] sm:$0xff] }
 0x31a   : > { %v1121_v31 = vld [vmem:[%s3312_s30 + $0xbd8] sm:$0xff] }
 0x31b   : > { %v2630_v52 = vadd.f32 %v2629_v47, %v2118_v41  ;;  %v1621_v41 = vsub.f32 %v597_v34, %v1109_v35  ;;  %v2132_v47 = vmul.f32 %v1620_v36, %v1620_v36  ;;  %v610_v35 = vld [vmem:[%s3306_s17 + $0xbe0] sm:$0xff] }
 0x31c   : > { %v1122_v36 = vld [vmem:[%s3312_s30 + $0xbe0] sm:$0xff] }
 0x31d   : > { %v2631_v57 = vadd.f32 %v2630_v52, %v2119_v46  ;;  %v1622_v46 = vsub.f32 %v598_v39, %v1110_v40  ;;  %v2133_v52 = vmul.f32 %v1621_v41, %v1621_v41  ;;  %v611_v40 = vld [vmem:[%s3306_s17 + $0xbe8] sm:$0xff] }
 0x31e   : > { %v1123_v41 = vld [vmem:[%s3312_s30 + $0xbe8] sm:$0xff] }
 0x31f   : > { %v2632_v62 = vadd.f32 %v2631_v57, %v2120_v51  ;;  %v1623_v51 = vsub.f32 %v599_v44, %v1111_v45  ;;  %v2134_v57 = vmul.f32 %v1622_v46, %v1622_v46  ;;  %v612_v45 = vld [vmem:[%s3306_s17 + $0xbf0] sm:$0xff] }
 0x320   : > { %v1124_v46 = vld [vmem:[%s3312_s30 + $0xbf0] sm:$0xff] }
 0x321   : > { %v2633_v3 = vadd.f32 %v2632_v62, %v2121_v56  ;;  %v1624_v56 = vsub.f32 %v600_v49, %v1112_v50  ;;  %v2135_v62 = vmul.f32 %v1623_v51, %v1623_v51  ;;  %v613_v50 = vld [vmem:[%s3306_s17 + $0xbf8] sm:$0xff] }
 0x322   : > { %v1125_v51 = vld [vmem:[%s3312_s30 + $0xbf8] sm:$0xff] }
 0x323   : > { %v2634_v8 = vadd.f32 %v2633_v3, %v2122_v61  ;;  %v1625_v61 = vsub.f32 %v601_v54, %v1113_v55  ;;  %v2136_v3 = vmul.f32 %v1624_v56, %v1624_v56  ;;  %v614_v55 = vld [vmem:[%s3306_s17 + $0xc00] sm:$0xff] }
 0x324   : > { %v1126_v56 = vld [vmem:[%s3312_s30 + $0xc00] sm:$0xff] }
 0x325   : > { %v2635_v13 = vadd.f32 %v2634_v8, %v2123_v2  ;;  %v1626_v2 = vsub.f32 %v602_v59, %v1114_v60  ;;  %v2137_v8 = vmul.f32 %v1625_v61, %v1625_v61  ;;  %v615_v60 = vld [vmem:[%s3306_s17 + $0xc08] sm:$0xff] }
 0x326   : > { %v1127_v61 = vld [vmem:[%s3312_s30 + $0xc08] sm:$0xff] }
 0x327   : > { %v2636_v18 = vadd.f32 %v2635_v13, %v2124_v7  ;;  %v1627_v7 = vsub.f32 %v603_v0, %v1115_v1  ;;  %v2138_v13 = vmul.f32 %v1626_v2, %v1626_v2  ;;  %v616_v1 = vld [vmem:[%s3306_s17 + $0xc10] sm:$0xff] }
 0x328   : > { %v1128_v2 = vld [vmem:[%s3312_s30 + $0xc10] sm:$0xff] }
 0x329   : > { %v2637_v23 = vadd.f32 %v2636_v18, %v2125_v12  ;;  %v1628_v12 = vsub.f32 %v604_v5, %v1116_v6  ;;  %v2139_v18 = vmul.f32 %v1627_v7, %v1627_v7  ;;  %v617_v6 = vld [vmem:[%s3306_s17 + $0xc18] sm:$0xff] }
 0x32a   : > { %v1129_v7 = vld [vmem:[%s3312_s30 + $0xc18] sm:$0xff] }
 0x32b   : > { %v2638_v28 = vadd.f32 %v2637_v23, %v2126_v17  ;;  %v1629_v17 = vsub.f32 %v605_v10, %v1117_v11  ;;  %v2140_v23 = vmul.f32 %v1628_v12, %v1628_v12  ;;  %v618_v11 = vld [vmem:[%s3306_s17 + $0xc20] sm:$0xff] }
 0x32c   : > { %v1130_v12 = vld [vmem:[%s3312_s30 + $0xc20] sm:$0xff] }
 0x32d   : > { %v2639_v33 = vadd.f32 %v2638_v28, %v2127_v22  ;;  %v1630_v22 = vsub.f32 %v606_v15, %v1118_v16  ;;  %v2141_v28 = vmul.f32 %v1629_v17, %v1629_v17  ;;  %v619_v16 = vld [vmem:[%s3306_s17 + $0xc28] sm:$0xff] }
 0x32e   : > { %v1131_v17 = vld [vmem:[%s3312_s30 + $0xc28] sm:$0xff] }
 0x32f   : > { %v2640_v38 = vadd.f32 %v2639_v33, %v2128_v27  ;;  %v1631_v27 = vsub.f32 %v607_v20, %v1119_v21  ;;  %v2142_v33 = vmul.f32 %v1630_v22, %v1630_v22  ;;  %v620_v21 = vld [vmem:[%s3306_s17 + $0xc30] sm:$0xff] }
 0x330   : > { %v1132_v22 = vld [vmem:[%s3312_s30 + $0xc30] sm:$0xff] }
 0x331   : > { %v2641_v43 = vadd.f32 %v2640_v38, %v2129_v32  ;;  %v1632_v32 = vsub.f32 %v608_v25, %v1120_v26  ;;  %v2143_v38 = vmul.f32 %v1631_v27, %v1631_v27  ;;  %v621_v26 = vld [vmem:[%s3306_s17 + $0xc38] sm:$0xff] }
 0x332   : > { %v1133_v27 = vld [vmem:[%s3312_s30 + $0xc38] sm:$0xff] }
 0x333   : > { %v2642_v48 = vadd.f32 %v2641_v43, %v2130_v37  ;;  %v1633_v37 = vsub.f32 %v609_v30, %v1121_v31  ;;  %v2144_v43 = vmul.f32 %v1632_v32, %v1632_v32  ;;  %v622_v31 = vld [vmem:[%s3306_s17 + $0xc40] sm:$0xff] }
 0x334   : > { %v1134_v32 = vld [vmem:[%s3312_s30 + $0xc40] sm:$0xff] }
 0x335   : > { %v2643_v53 = vadd.f32 %v2642_v48, %v2131_v42  ;;  %v1634_v42 = vsub.f32 %v610_v35, %v1122_v36  ;;  %v2145_v48 = vmul.f32 %v1633_v37, %v1633_v37  ;;  %v623_v36 = vld [vmem:[%s3306_s17 + $0xc48] sm:$0xff] }
 0x336   : > { %v1135_v37 = vld [vmem:[%s3312_s30 + $0xc48] sm:$0xff] }
 0x337   : > { %v2644_v58 = vadd.f32 %v2643_v53, %v2132_v47  ;;  %v1635_v47 = vsub.f32 %v611_v40, %v1123_v41  ;;  %v2146_v53 = vmul.f32 %v1634_v42, %v1634_v42  ;;  %v624_v41 = vld [vmem:[%s3306_s17 + $0xc50] sm:$0xff] }
 0x338   : > { %v1136_v42 = vld [vmem:[%s3312_s30 + $0xc50] sm:$0xff] }
 0x339   : > { %v2645_v63 = vadd.f32 %v2644_v58, %v2133_v52  ;;  %v1636_v52 = vsub.f32 %v612_v45, %v1124_v46  ;;  %v2147_v58 = vmul.f32 %v1635_v47, %v1635_v47  ;;  %v625_v46 = vld [vmem:[%s3306_s17 + $0xc58] sm:$0xff] }
 0x33a   : > { %v1137_v47 = vld [vmem:[%s3312_s30 + $0xc58] sm:$0xff] }
 0x33b   : > { %v2646_v4 = vadd.f32 %v2645_v63, %v2134_v57  ;;  %v1637_v57 = vsub.f32 %v613_v50, %v1125_v51  ;;  %v2148_v63 = vmul.f32 %v1636_v52, %v1636_v52  ;;  %v626_v51 = vld [vmem:[%s3306_s17 + $0xc60] sm:$0xff] }
 0x33c   : > { %v1138_v52 = vld [vmem:[%s3312_s30 + $0xc60] sm:$0xff] }
 0x33d   : > { %v2647_v9 = vadd.f32 %v2646_v4, %v2135_v62  ;;  %v1638_v62 = vsub.f32 %v614_v55, %v1126_v56  ;;  %v2149_v4 = vmul.f32 %v1637_v57, %v1637_v57  ;;  %v627_v56 = vld [vmem:[%s3306_s17 + $0xc68] sm:$0xff] }
 0x33e   : > { %v1139_v57 = vld [vmem:[%s3312_s30 + $0xc68] sm:$0xff] }
 0x33f   : > { %v2648_v14 = vadd.f32 %v2647_v9, %v2136_v3  ;;  %v1639_v3 = vsub.f32 %v615_v60, %v1127_v61  ;;  %v2150_v9 = vmul.f32 %v1638_v62, %v1638_v62  ;;  %v628_v61 = vld [vmem:[%s3306_s17 + $0xc70] sm:$0xff] }
 0x340   : > { %v1140_v62 = vld [vmem:[%s3312_s30 + $0xc70] sm:$0xff] }
 0x341   : > { %v2649_v19 = vadd.f32 %v2648_v14, %v2137_v8  ;;  %v1640_v8 = vsub.f32 %v616_v1, %v1128_v2  ;;  %v2151_v14 = vmul.f32 %v1639_v3, %v1639_v3  ;;  %v629_v2 = vld [vmem:[%s3306_s17 + $0xc78] sm:$0xff] }
 0x342   : > { %v1141_v3 = vld [vmem:[%s3312_s30 + $0xc78] sm:$0xff] }
 0x343   : > { %v2650_v24 = vadd.f32 %v2649_v19, %v2138_v13  ;;  %v1641_v13 = vsub.f32 %v617_v6, %v1129_v7  ;;  %v2152_v19 = vmul.f32 %v1640_v8, %v1640_v8  ;;  %v630_v7 = vld [vmem:[%s3306_s17 + $0xc80] sm:$0xff] }
 0x344   : > { %v1142_v8 = vld [vmem:[%s3312_s30 + $0xc80] sm:$0xff] }
 0x345   : > { %v2651_v29 = vadd.f32 %v2650_v24, %v2139_v18  ;;  %v1642_v18 = vsub.f32 %v618_v11, %v1130_v12  ;;  %v2153_v24 = vmul.f32 %v1641_v13, %v1641_v13  ;;  %v631_v12 = vld [vmem:[%s3306_s17 + $0xc88] sm:$0xff] }
 0x346   : > { %v1143_v13 = vld [vmem:[%s3312_s30 + $0xc88] sm:$0xff] }
 0x347   : > { %v2652_v34 = vadd.f32 %v2651_v29, %v2140_v23  ;;  %v1643_v23 = vsub.f32 %v619_v16, %v1131_v17  ;;  %v2154_v29 = vmul.f32 %v1642_v18, %v1642_v18  ;;  %v632_v17 = vld [vmem:[%s3306_s17 + $0xc90] sm:$0xff] }
 0x348   : > { %v1144_v18 = vld [vmem:[%s3312_s30 + $0xc90] sm:$0xff] }
 0x349   : > { %v2653_v39 = vadd.f32 %v2652_v34, %v2141_v28  ;;  %v1644_v28 = vsub.f32 %v620_v21, %v1132_v22  ;;  %v2155_v34 = vmul.f32 %v1643_v23, %v1643_v23  ;;  %v633_v22 = vld [vmem:[%s3306_s17 + $0xc98] sm:$0xff] }
 0x34a   : > { %v1145_v23 = vld [vmem:[%s3312_s30 + $0xc98] sm:$0xff] }
 0x34b   : > { %v2654_v44 = vadd.f32 %v2653_v39, %v2142_v33  ;;  %v1645_v33 = vsub.f32 %v621_v26, %v1133_v27  ;;  %v2156_v39 = vmul.f32 %v1644_v28, %v1644_v28  ;;  %v634_v27 = vld [vmem:[%s3306_s17 + $0xca0] sm:$0xff] }
 0x34c   : > { %v1146_v28 = vld [vmem:[%s3312_s30 + $0xca0] sm:$0xff] }
 0x34d   : > { %v2655_v49 = vadd.f32 %v2654_v44, %v2143_v38  ;;  %v1646_v38 = vsub.f32 %v622_v31, %v1134_v32  ;;  %v2157_v44 = vmul.f32 %v1645_v33, %v1645_v33  ;;  %v635_v32 = vld [vmem:[%s3306_s17 + $0xca8] sm:$0xff] }
 0x34e   : > { %v1147_v33 = vld [vmem:[%s3312_s30 + $0xca8] sm:$0xff] }
 0x34f   : > { %v2656_v54 = vadd.f32 %v2655_v49, %v2144_v43  ;;  %v1647_v43 = vsub.f32 %v623_v36, %v1135_v37  ;;  %v2158_v49 = vmul.f32 %v1646_v38, %v1646_v38  ;;  %v636_v37 = vld [vmem:[%s3306_s17 + $0xcb0] sm:$0xff] }
 0x350   : > { %v1148_v38 = vld [vmem:[%s3312_s30 + $0xcb0] sm:$0xff] }
 0x351   : > { %v2657_v59 = vadd.f32 %v2656_v54, %v2145_v48  ;;  %v1648_v48 = vsub.f32 %v624_v41, %v1136_v42  ;;  %v2159_v54 = vmul.f32 %v1647_v43, %v1647_v43  ;;  %v637_v42 = vld [vmem:[%s3306_s17 + $0xcb8] sm:$0xff] }
 0x352   : > { %v1149_v43 = vld [vmem:[%s3312_s30 + $0xcb8] sm:$0xff] }
 0x353   : > { %v2658_v0 = vadd.f32 %v2657_v59, %v2146_v53  ;;  %v1649_v53 = vsub.f32 %v625_v46, %v1137_v47  ;;  %v2160_v59 = vmul.f32 %v1648_v48, %v1648_v48  ;;  %v638_v47 = vld [vmem:[%s3306_s17 + $0xcc0] sm:$0xff] }
 0x354   : > { %v1150_v48 = vld [vmem:[%s3312_s30 + $0xcc0] sm:$0xff] }
 0x355   : > { %v2659_v5 = vadd.f32 %v2658_v0, %v2147_v58  ;;  %v1650_v58 = vsub.f32 %v626_v51, %v1138_v52  ;;  %v2161_v0 = vmul.f32 %v1649_v53, %v1649_v53  ;;  %v639_v52 = vld [vmem:[%s3306_s17 + $0xcc8] sm:$0xff] }
 0x356   : > { %v1151_v53 = vld [vmem:[%s3312_s30 + $0xcc8] sm:$0xff] }
 0x357   : > { %v2660_v10 = vadd.f32 %v2659_v5, %v2148_v63  ;;  %v1651_v63 = vsub.f32 %v627_v56, %v1139_v57  ;;  %v2162_v5 = vmul.f32 %v1650_v58, %v1650_v58  ;;  %v640_v57 = vld [vmem:[%s3306_s17 + $0xcd0] sm:$0xff] }
 0x358   : > { %v1152_v58 = vld [vmem:[%s3312_s30 + $0xcd0] sm:$0xff] }
 0x359   : > { %v2661_v15 = vadd.f32 %v2660_v10, %v2149_v4  ;;  %v1652_v4 = vsub.f32 %v628_v61, %v1140_v62  ;;  %v2163_v10 = vmul.f32 %v1651_v63, %v1651_v63  ;;  %v641_v62 = vld [vmem:[%s3306_s17 + $0xcd8] sm:$0xff] }
 0x35a   : > { %v1153_v63 = vld [vmem:[%s3312_s30 + $0xcd8] sm:$0xff] }
 0x35b   : > { %v2662_v20 = vadd.f32 %v2661_v15, %v2150_v9  ;;  %v1653_v9 = vsub.f32 %v629_v2, %v1141_v3  ;;  %v2164_v15 = vmul.f32 %v1652_v4, %v1652_v4  ;;  %v642_v3 = vld [vmem:[%s3306_s17 + $0xce0] sm:$0xff] }
 0x35c   : > { %v1154_v4 = vld [vmem:[%s3312_s30 + $0xce0] sm:$0xff] }
 0x35d   : > { %v2663_v25 = vadd.f32 %v2662_v20, %v2151_v14  ;;  %v1654_v14 = vsub.f32 %v630_v7, %v1142_v8  ;;  %v2165_v20 = vmul.f32 %v1653_v9, %v1653_v9  ;;  %v643_v8 = vld [vmem:[%s3306_s17 + $0xce8] sm:$0xff] }
 0x35e   : > { %v1155_v9 = vld [vmem:[%s3312_s30 + $0xce8] sm:$0xff] }
 0x35f   : > { %v2664_v30 = vadd.f32 %v2663_v25, %v2152_v19  ;;  %v1655_v19 = vsub.f32 %v631_v12, %v1143_v13  ;;  %v2166_v25 = vmul.f32 %v1654_v14, %v1654_v14  ;;  %v644_v13 = vld [vmem:[%s3306_s17 + $0xcf0] sm:$0xff] }
 0x360   : > { %v1156_v14 = vld [vmem:[%s3312_s30 + $0xcf0] sm:$0xff] }
 0x361   : > { %v2665_v35 = vadd.f32 %v2664_v30, %v2153_v24  ;;  %v1656_v24 = vsub.f32 %v632_v17, %v1144_v18  ;;  %v2167_v30 = vmul.f32 %v1655_v19, %v1655_v19  ;;  %v645_v18 = vld [vmem:[%s3306_s17 + $0xcf8] sm:$0xff] }
 0x362   : > { %v1157_v19 = vld [vmem:[%s3312_s30 + $0xcf8] sm:$0xff] }
 0x363   : > { %v2666_v40 = vadd.f32 %v2665_v35, %v2154_v29  ;;  %v1657_v29 = vsub.f32 %v633_v22, %v1145_v23  ;;  %v2168_v35 = vmul.f32 %v1656_v24, %v1656_v24  ;;  %v646_v23 = vld [vmem:[%s3306_s17 + $0xd00] sm:$0xff] }
 0x364   : > { %v1158_v24 = vld [vmem:[%s3312_s30 + $0xd00] sm:$0xff] }
 0x365   : > { %v2667_v45 = vadd.f32 %v2666_v40, %v2155_v34  ;;  %v1658_v34 = vsub.f32 %v634_v27, %v1146_v28  ;;  %v2169_v40 = vmul.f32 %v1657_v29, %v1657_v29  ;;  %v647_v28 = vld [vmem:[%s3306_s17 + $0xd08] sm:$0xff] }
 0x366   : > { %v1159_v29 = vld [vmem:[%s3312_s30 + $0xd08] sm:$0xff] }
 0x367   : > { %v2668_v50 = vadd.f32 %v2667_v45, %v2156_v39  ;;  %v1659_v39 = vsub.f32 %v635_v32, %v1147_v33  ;;  %v2170_v45 = vmul.f32 %v1658_v34, %v1658_v34  ;;  %v648_v33 = vld [vmem:[%s3306_s17 + $0xd10] sm:$0xff] }
 0x368   : > { %v1160_v34 = vld [vmem:[%s3312_s30 + $0xd10] sm:$0xff] }
 0x369   : > { %v2669_v55 = vadd.f32 %v2668_v50, %v2157_v44  ;;  %v1660_v44 = vsub.f32 %v636_v37, %v1148_v38  ;;  %v2171_v50 = vmul.f32 %v1659_v39, %v1659_v39  ;;  %v649_v38 = vld [vmem:[%s3306_s17 + $0xd18] sm:$0xff] }
 0x36a   : > { %v1161_v39 = vld [vmem:[%s3312_s30 + $0xd18] sm:$0xff] }
 0x36b   : > { %v2670_v60 = vadd.f32 %v2669_v55, %v2158_v49  ;;  %v1661_v49 = vsub.f32 %v637_v42, %v1149_v43  ;;  %v2172_v55 = vmul.f32 %v1660_v44, %v1660_v44  ;;  %v650_v43 = vld [vmem:[%s3306_s17 + $0xd20] sm:$0xff] }
 0x36c   : > { %v1162_v44 = vld [vmem:[%s3312_s30 + $0xd20] sm:$0xff] }
 0x36d   : > { %v2671_v1 = vadd.f32 %v2670_v60, %v2159_v54  ;;  %v1662_v54 = vsub.f32 %v638_v47, %v1150_v48  ;;  %v2173_v60 = vmul.f32 %v1661_v49, %v1661_v49  ;;  %v651_v48 = vld [vmem:[%s3306_s17 + $0xd28] sm:$0xff] }
 0x36e   : > { %v1163_v49 = vld [vmem:[%s3312_s30 + $0xd28] sm:$0xff] }
 0x36f   : > { %v2672_v6 = vadd.f32 %v2671_v1, %v2160_v59  ;;  %v1663_v59 = vsub.f32 %v639_v52, %v1151_v53  ;;  %v2174_v1 = vmul.f32 %v1662_v54, %v1662_v54  ;;  %v652_v53 = vld [vmem:[%s3306_s17 + $0xd30] sm:$0xff] }
 0x370   : > { %v1164_v54 = vld [vmem:[%s3312_s30 + $0xd30] sm:$0xff] }
 0x371   : > { %v2673_v11 = vadd.f32 %v2672_v6, %v2161_v0  ;;  %v1664_v0 = vsub.f32 %v640_v57, %v1152_v58  ;;  %v2175_v6 = vmul.f32 %v1663_v59, %v1663_v59  ;;  %v653_v58 = vld [vmem:[%s3306_s17 + $0xd38] sm:$0xff] }
 0x372   : > { %v1165_v59 = vld [vmem:[%s3312_s30 + $0xd38] sm:$0xff] }
 0x373   : > { %v2674_v16 = vadd.f32 %v2673_v11, %v2162_v5  ;;  %v1665_v5 = vsub.f32 %v641_v62, %v1153_v63  ;;  %v2176_v11 = vmul.f32 %v1664_v0, %v1664_v0  ;;  %v654_v63 = vld [vmem:[%s3306_s17 + $0xd40] sm:$0xff] }
 0x374   : > { %v1166_v0 = vld [vmem:[%s3312_s30 + $0xd40] sm:$0xff] }
 0x375   : > { %v2675_v21 = vadd.f32 %v2674_v16, %v2163_v10  ;;  %v1666_v10 = vsub.f32 %v642_v3, %v1154_v4  ;;  %v2177_v16 = vmul.f32 %v1665_v5, %v1665_v5  ;;  %v655_v4 = vld [vmem:[%s3306_s17 + $0xd48] sm:$0xff] }
 0x376   : > { %v1167_v5 = vld [vmem:[%s3312_s30 + $0xd48] sm:$0xff] }
 0x377   : > { %v2676_v26 = vadd.f32 %v2675_v21, %v2164_v15  ;;  %v1667_v15 = vsub.f32 %v643_v8, %v1155_v9  ;;  %v2178_v21 = vmul.f32 %v1666_v10, %v1666_v10  ;;  %v656_v9 = vld [vmem:[%s3306_s17 + $0xd50] sm:$0xff] }
 0x378   : > { %v1168_v10 = vld [vmem:[%s3312_s30 + $0xd50] sm:$0xff] }
 0x379   : > { %v2677_v31 = vadd.f32 %v2676_v26, %v2165_v20  ;;  %v1668_v20 = vsub.f32 %v644_v13, %v1156_v14  ;;  %v2179_v26 = vmul.f32 %v1667_v15, %v1667_v15  ;;  %v657_v14 = vld [vmem:[%s3306_s17 + $0xd58] sm:$0xff] }
 0x37a   : > { %v1169_v15 = vld [vmem:[%s3312_s30 + $0xd58] sm:$0xff] }
 0x37b   : > { %v2678_v36 = vadd.f32 %v2677_v31, %v2166_v25  ;;  %v1669_v25 = vsub.f32 %v645_v18, %v1157_v19  ;;  %v2180_v31 = vmul.f32 %v1668_v20, %v1668_v20  ;;  %v658_v19 = vld [vmem:[%s3306_s17 + $0xd60] sm:$0xff] }
 0x37c   : > { %v1170_v20 = vld [vmem:[%s3312_s30 + $0xd60] sm:$0xff] }
 0x37d   : > { %v2679_v41 = vadd.f32 %v2678_v36, %v2167_v30  ;;  %v1670_v30 = vsub.f32 %v646_v23, %v1158_v24  ;;  %v2181_v36 = vmul.f32 %v1669_v25, %v1669_v25  ;;  %v659_v24 = vld [vmem:[%s3306_s17 + $0xd68] sm:$0xff] }
 0x37e   : > { %v1171_v25 = vld [vmem:[%s3312_s30 + $0xd68] sm:$0xff] }
 0x37f   : > { %v2680_v46 = vadd.f32 %v2679_v41, %v2168_v35  ;;  %v1671_v35 = vsub.f32 %v647_v28, %v1159_v29  ;;  %v2182_v41 = vmul.f32 %v1670_v30, %v1670_v30  ;;  %v660_v29 = vld [vmem:[%s3306_s17 + $0xd70] sm:$0xff] }
 0x380   : > { %v1172_v30 = vld [vmem:[%s3312_s30 + $0xd70] sm:$0xff] }
 0x381   : > { %v2681_v51 = vadd.f32 %v2680_v46, %v2169_v40  ;;  %v1672_v40 = vsub.f32 %v648_v33, %v1160_v34  ;;  %v2183_v46 = vmul.f32 %v1671_v35, %v1671_v35  ;;  %v661_v34 = vld [vmem:[%s3306_s17 + $0xd78] sm:$0xff] }
 0x382   : > { %v1173_v35 = vld [vmem:[%s3312_s30 + $0xd78] sm:$0xff] }
 0x383   : > { %v2682_v56 = vadd.f32 %v2681_v51, %v2170_v45  ;;  %v1673_v45 = vsub.f32 %v649_v38, %v1161_v39  ;;  %v2184_v51 = vmul.f32 %v1672_v40, %v1672_v40  ;;  %v662_v39 = vld [vmem:[%s3306_s17 + $0xd80] sm:$0xff] }
 0x384   : > { %v1174_v40 = vld [vmem:[%s3312_s30 + $0xd80] sm:$0xff] }
 0x385   : > { %v2683_v61 = vadd.f32 %v2682_v56, %v2171_v50  ;;  %v1674_v50 = vsub.f32 %v650_v43, %v1162_v44  ;;  %v2185_v56 = vmul.f32 %v1673_v45, %v1673_v45  ;;  %v663_v44 = vld [vmem:[%s3306_s17 + $0xd88] sm:$0xff] }
 0x386   : > { %v1175_v45 = vld [vmem:[%s3312_s30 + $0xd88] sm:$0xff] }
 0x387   : > { %v2684_v2 = vadd.f32 %v2683_v61, %v2172_v55  ;;  %v1675_v55 = vsub.f32 %v651_v48, %v1163_v49  ;;  %v2186_v61 = vmul.f32 %v1674_v50, %v1674_v50  ;;  %v664_v49 = vld [vmem:[%s3306_s17 + $0xd90] sm:$0xff] }
 0x388   : > { %v1176_v50 = vld [vmem:[%s3312_s30 + $0xd90] sm:$0xff] }
 0x389   : > { %v2685_v7 = vadd.f32 %v2684_v2, %v2173_v60  ;;  %v1676_v60 = vsub.f32 %v652_v53, %v1164_v54  ;;  %v2187_v2 = vmul.f32 %v1675_v55, %v1675_v55  ;;  %v665_v54 = vld [vmem:[%s3306_s17 + $0xd98] sm:$0xff] }
 0x38a   : > { %v1177_v55 = vld [vmem:[%s3312_s30 + $0xd98] sm:$0xff] }
 0x38b   : > { %v2686_v12 = vadd.f32 %v2685_v7, %v2174_v1  ;;  %v1677_v1 = vsub.f32 %v653_v58, %v1165_v59  ;;  %v2188_v7 = vmul.f32 %v1676_v60, %v1676_v60  ;;  %v666_v59 = vld [vmem:[%s3306_s17 + $0xda0] sm:$0xff] }
 0x38c   : > { %v1178_v60 = vld [vmem:[%s3312_s30 + $0xda0] sm:$0xff] }
 0x38d   : > { %v2687_v17 = vadd.f32 %v2686_v12, %v2175_v6  ;;  %v1678_v6 = vsub.f32 %v654_v63, %v1166_v0  ;;  %v2189_v12 = vmul.f32 %v1677_v1, %v1677_v1  ;;  %v667_v0 = vld [vmem:[%s3306_s17 + $0xda8] sm:$0xff] }
 0x38e   : > { %v1179_v1 = vld [vmem:[%s3312_s30 + $0xda8] sm:$0xff] }
 0x38f   : > { %v2688_v22 = vadd.f32 %v2687_v17, %v2176_v11  ;;  %v1679_v11 = vsub.f32 %v655_v4, %v1167_v5  ;;  %v2190_v17 = vmul.f32 %v1678_v6, %v1678_v6  ;;  %v668_v5 = vld [vmem:[%s3306_s17 + $0xdb0] sm:$0xff] }
 0x390   : > { %v1180_v6 = vld [vmem:[%s3312_s30 + $0xdb0] sm:$0xff] }
 0x391   : > { %v2689_v27 = vadd.f32 %v2688_v22, %v2177_v16  ;;  %v1680_v16 = vsub.f32 %v656_v9, %v1168_v10  ;;  %v2191_v22 = vmul.f32 %v1679_v11, %v1679_v11  ;;  %v669_v10 = vld [vmem:[%s3306_s17 + $0xdb8] sm:$0xff] }
 0x392   : > { %v1181_v11 = vld [vmem:[%s3312_s30 + $0xdb8] sm:$0xff] }
 0x393   : > { %v2690_v32 = vadd.f32 %v2689_v27, %v2178_v21  ;;  %v1681_v21 = vsub.f32 %v657_v14, %v1169_v15  ;;  %v2192_v27 = vmul.f32 %v1680_v16, %v1680_v16  ;;  %v670_v15 = vld [vmem:[%s3306_s17 + $0xdc0] sm:$0xff] }
 0x394   : > { %v1182_v16 = vld [vmem:[%s3312_s30 + $0xdc0] sm:$0xff] }
 0x395   : > { %v2691_v37 = vadd.f32 %v2690_v32, %v2179_v26  ;;  %v1682_v26 = vsub.f32 %v658_v19, %v1170_v20  ;;  %v2193_v32 = vmul.f32 %v1681_v21, %v1681_v21  ;;  %v671_v20 = vld [vmem:[%s3306_s17 + $0xdc8] sm:$0xff] }
 0x396   : > { %v1183_v21 = vld [vmem:[%s3312_s30 + $0xdc8] sm:$0xff] }
 0x397   : > { %v2692_v42 = vadd.f32 %v2691_v37, %v2180_v31  ;;  %v1683_v31 = vsub.f32 %v659_v24, %v1171_v25  ;;  %v2194_v37 = vmul.f32 %v1682_v26, %v1682_v26  ;;  %v672_v25 = vld [vmem:[%s3306_s17 + $0xdd0] sm:$0xff] }
 0x398   : > { %v1184_v26 = vld [vmem:[%s3312_s30 + $0xdd0] sm:$0xff] }
 0x399   : > { %v2693_v47 = vadd.f32 %v2692_v42, %v2181_v36  ;;  %v1684_v36 = vsub.f32 %v660_v29, %v1172_v30  ;;  %v2195_v42 = vmul.f32 %v1683_v31, %v1683_v31  ;;  %v673_v30 = vld [vmem:[%s3306_s17 + $0xdd8] sm:$0xff] }
 0x39a   : > { %v1185_v31 = vld [vmem:[%s3312_s30 + $0xdd8] sm:$0xff] }
 0x39b   : > { %v2694_v52 = vadd.f32 %v2693_v47, %v2182_v41  ;;  %v1685_v41 = vsub.f32 %v661_v34, %v1173_v35  ;;  %v2196_v47 = vmul.f32 %v1684_v36, %v1684_v36  ;;  %v674_v35 = vld [vmem:[%s3306_s17 + $0xde0] sm:$0xff] }
 0x39c   : > { %v1186_v36 = vld [vmem:[%s3312_s30 + $0xde0] sm:$0xff] }
 0x39d   : > { %v2695_v57 = vadd.f32 %v2694_v52, %v2183_v46  ;;  %v1686_v46 = vsub.f32 %v662_v39, %v1174_v40  ;;  %v2197_v52 = vmul.f32 %v1685_v41, %v1685_v41  ;;  %v675_v40 = vld [vmem:[%s3306_s17 + $0xde8] sm:$0xff] }
 0x39e   : > { %v1187_v41 = vld [vmem:[%s3312_s30 + $0xde8] sm:$0xff] }
 0x39f   : > { %v2696_v62 = vadd.f32 %v2695_v57, %v2184_v51  ;;  %v1687_v51 = vsub.f32 %v663_v44, %v1175_v45  ;;  %v2198_v57 = vmul.f32 %v1686_v46, %v1686_v46  ;;  %v676_v45 = vld [vmem:[%s3306_s17 + $0xdf0] sm:$0xff] }
 0x3a0   : > { %v1188_v46 = vld [vmem:[%s3312_s30 + $0xdf0] sm:$0xff] }
 0x3a1   : > { %v2697_v3 = vadd.f32 %v2696_v62, %v2185_v56  ;;  %v1688_v56 = vsub.f32 %v664_v49, %v1176_v50  ;;  %v2199_v62 = vmul.f32 %v1687_v51, %v1687_v51  ;;  %v677_v50 = vld [vmem:[%s3306_s17 + $0xdf8] sm:$0xff] }
 0x3a2   : > { %v1189_v51 = vld [vmem:[%s3312_s30 + $0xdf8] sm:$0xff] }
 0x3a3   : > { %v2698_v8 = vadd.f32 %v2697_v3, %v2186_v61  ;;  %v1689_v61 = vsub.f32 %v665_v54, %v1177_v55  ;;  %v2200_v3 = vmul.f32 %v1688_v56, %v1688_v56  ;;  %v678_v55 = vld [vmem:[%s3306_s17 + $0xe00] sm:$0xff] }
 0x3a4   : > { %v1190_v56 = vld [vmem:[%s3312_s30 + $0xe00] sm:$0xff] }
 0x3a5   : > { %v2699_v13 = vadd.f32 %v2698_v8, %v2187_v2  ;;  %v1690_v2 = vsub.f32 %v666_v59, %v1178_v60  ;;  %v2201_v8 = vmul.f32 %v1689_v61, %v1689_v61  ;;  %v679_v60 = vld [vmem:[%s3306_s17 + $0xe08] sm:$0xff] }
 0x3a6   : > { %v1191_v61 = vld [vmem:[%s3312_s30 + $0xe08] sm:$0xff] }
 0x3a7   : > { %v2700_v18 = vadd.f32 %v2699_v13, %v2188_v7  ;;  %v1691_v7 = vsub.f32 %v667_v0, %v1179_v1  ;;  %v2202_v13 = vmul.f32 %v1690_v2, %v1690_v2  ;;  %v680_v1 = vld [vmem:[%s3306_s17 + $0xe10] sm:$0xff] }
 0x3a8   : > { %v1192_v2 = vld [vmem:[%s3312_s30 + $0xe10] sm:$0xff] }
 0x3a9   : > { %v2701_v23 = vadd.f32 %v2700_v18, %v2189_v12  ;;  %v1692_v12 = vsub.f32 %v668_v5, %v1180_v6  ;;  %v2203_v18 = vmul.f32 %v1691_v7, %v1691_v7  ;;  %v681_v6 = vld [vmem:[%s3306_s17 + $0xe18] sm:$0xff] }
 0x3aa   : > { %v1193_v7 = vld [vmem:[%s3312_s30 + $0xe18] sm:$0xff] }
 0x3ab   : > { %v2702_v28 = vadd.f32 %v2701_v23, %v2190_v17  ;;  %v1693_v17 = vsub.f32 %v669_v10, %v1181_v11  ;;  %v2204_v23 = vmul.f32 %v1692_v12, %v1692_v12  ;;  %v682_v11 = vld [vmem:[%s3306_s17 + $0xe20] sm:$0xff] }
 0x3ac   : > { %v1194_v12 = vld [vmem:[%s3312_s30 + $0xe20] sm:$0xff] }
 0x3ad   : > { %v2703_v33 = vadd.f32 %v2702_v28, %v2191_v22  ;;  %v1694_v22 = vsub.f32 %v670_v15, %v1182_v16  ;;  %v2205_v28 = vmul.f32 %v1693_v17, %v1693_v17  ;;  %v683_v16 = vld [vmem:[%s3306_s17 + $0xe28] sm:$0xff] }
 0x3ae   : > { %v1195_v17 = vld [vmem:[%s3312_s30 + $0xe28] sm:$0xff] }
 0x3af   : > { %v2704_v38 = vadd.f32 %v2703_v33, %v2192_v27  ;;  %v1695_v27 = vsub.f32 %v671_v20, %v1183_v21  ;;  %v2206_v33 = vmul.f32 %v1694_v22, %v1694_v22  ;;  %v684_v21 = vld [vmem:[%s3306_s17 + $0xe30] sm:$0xff] }
 0x3b0   : > { %v1196_v22 = vld [vmem:[%s3312_s30 + $0xe30] sm:$0xff] }
 0x3b1   : > { %v2705_v43 = vadd.f32 %v2704_v38, %v2193_v32  ;;  %v1696_v32 = vsub.f32 %v672_v25, %v1184_v26  ;;  %v2207_v38 = vmul.f32 %v1695_v27, %v1695_v27  ;;  %v685_v26 = vld [vmem:[%s3306_s17 + $0xe38] sm:$0xff] }
 0x3b2   : > { %v1197_v27 = vld [vmem:[%s3312_s30 + $0xe38] sm:$0xff] }
 0x3b3   : > { %v2706_v48 = vadd.f32 %v2705_v43, %v2194_v37  ;;  %v1697_v37 = vsub.f32 %v673_v30, %v1185_v31  ;;  %v2208_v43 = vmul.f32 %v1696_v32, %v1696_v32  ;;  %v686_v31 = vld [vmem:[%s3306_s17 + $0xe40] sm:$0xff] }
 0x3b4   : > { %v1198_v32 = vld [vmem:[%s3312_s30 + $0xe40] sm:$0xff] }
 0x3b5   : > { %v2707_v53 = vadd.f32 %v2706_v48, %v2195_v42  ;;  %v1698_v42 = vsub.f32 %v674_v35, %v1186_v36  ;;  %v2209_v48 = vmul.f32 %v1697_v37, %v1697_v37  ;;  %v687_v36 = vld [vmem:[%s3306_s17 + $0xe48] sm:$0xff] }
 0x3b6   : > { %v1199_v37 = vld [vmem:[%s3312_s30 + $0xe48] sm:$0xff] }
 0x3b7   : > { %v2708_v58 = vadd.f32 %v2707_v53, %v2196_v47  ;;  %v1699_v47 = vsub.f32 %v675_v40, %v1187_v41  ;;  %v2210_v53 = vmul.f32 %v1698_v42, %v1698_v42  ;;  %v688_v41 = vld [vmem:[%s3306_s17 + $0xe50] sm:$0xff] }
 0x3b8   : > { %v1200_v42 = vld [vmem:[%s3312_s30 + $0xe50] sm:$0xff] }
 0x3b9   : > { %v2709_v63 = vadd.f32 %v2708_v58, %v2197_v52  ;;  %v1700_v52 = vsub.f32 %v676_v45, %v1188_v46  ;;  %v2211_v58 = vmul.f32 %v1699_v47, %v1699_v47  ;;  %v689_v46 = vld [vmem:[%s3306_s17 + $0xe58] sm:$0xff] }
 0x3ba   : > { %v1201_v47 = vld [vmem:[%s3312_s30 + $0xe58] sm:$0xff] }
 0x3bb   : > { %v2710_v4 = vadd.f32 %v2709_v63, %v2198_v57  ;;  %v1701_v57 = vsub.f32 %v677_v50, %v1189_v51  ;;  %v2212_v63 = vmul.f32 %v1700_v52, %v1700_v52  ;;  %v690_v51 = vld [vmem:[%s3306_s17 + $0xe60] sm:$0xff] }
 0x3bc   : > { %v1202_v52 = vld [vmem:[%s3312_s30 + $0xe60] sm:$0xff] }
 0x3bd   : > { %v2711_v9 = vadd.f32 %v2710_v4, %v2199_v62  ;;  %v1702_v62 = vsub.f32 %v678_v55, %v1190_v56  ;;  %v2213_v4 = vmul.f32 %v1701_v57, %v1701_v57  ;;  %v691_v56 = vld [vmem:[%s3306_s17 + $0xe68] sm:$0xff] }
 0x3be   : > { %v1203_v57 = vld [vmem:[%s3312_s30 + $0xe68] sm:$0xff] }
 0x3bf   : > { %v2712_v14 = vadd.f32 %v2711_v9, %v2200_v3  ;;  %v1703_v3 = vsub.f32 %v679_v60, %v1191_v61  ;;  %v2214_v9 = vmul.f32 %v1702_v62, %v1702_v62  ;;  %v692_v61 = vld [vmem:[%s3306_s17 + $0xe70] sm:$0xff] }
 0x3c0   : > { %v1204_v62 = vld [vmem:[%s3312_s30 + $0xe70] sm:$0xff] }
 0x3c1   : > { %v2713_v19 = vadd.f32 %v2712_v14, %v2201_v8  ;;  %v1704_v8 = vsub.f32 %v680_v1, %v1192_v2  ;;  %v2215_v14 = vmul.f32 %v1703_v3, %v1703_v3  ;;  %v693_v2 = vld [vmem:[%s3306_s17 + $0xe78] sm:$0xff] }
 0x3c2   : > { %v1205_v3 = vld [vmem:[%s3312_s30 + $0xe78] sm:$0xff] }
 0x3c3   : > { %v2714_v24 = vadd.f32 %v2713_v19, %v2202_v13  ;;  %v1705_v13 = vsub.f32 %v681_v6, %v1193_v7  ;;  %v2216_v19 = vmul.f32 %v1704_v8, %v1704_v8  ;;  %v694_v7 = vld [vmem:[%s3306_s17 + $0xe80] sm:$0xff] }
 0x3c4   : > { %v1206_v8 = vld [vmem:[%s3312_s30 + $0xe80] sm:$0xff] }
 0x3c5   : > { %v2715_v29 = vadd.f32 %v2714_v24, %v2203_v18  ;;  %v1706_v18 = vsub.f32 %v682_v11, %v1194_v12  ;;  %v2217_v24 = vmul.f32 %v1705_v13, %v1705_v13  ;;  %v695_v12 = vld [vmem:[%s3306_s17 + $0xe88] sm:$0xff] }
 0x3c6   : > { %v1207_v13 = vld [vmem:[%s3312_s30 + $0xe88] sm:$0xff] }
 0x3c7   : > { %v2716_v34 = vadd.f32 %v2715_v29, %v2204_v23  ;;  %v1707_v23 = vsub.f32 %v683_v16, %v1195_v17  ;;  %v2218_v29 = vmul.f32 %v1706_v18, %v1706_v18  ;;  %v696_v17 = vld [vmem:[%s3306_s17 + $0xe90] sm:$0xff] }
 0x3c8   : > { %v1208_v18 = vld [vmem:[%s3312_s30 + $0xe90] sm:$0xff] }
 0x3c9   : > { %v2717_v39 = vadd.f32 %v2716_v34, %v2205_v28  ;;  %v1708_v28 = vsub.f32 %v684_v21, %v1196_v22  ;;  %v2219_v34 = vmul.f32 %v1707_v23, %v1707_v23  ;;  %v697_v22 = vld [vmem:[%s3306_s17 + $0xe98] sm:$0xff] }
 0x3ca   : > { %v1209_v23 = vld [vmem:[%s3312_s30 + $0xe98] sm:$0xff] }
 0x3cb   : > { %v2718_v44 = vadd.f32 %v2717_v39, %v2206_v33  ;;  %v1709_v33 = vsub.f32 %v685_v26, %v1197_v27  ;;  %v2220_v39 = vmul.f32 %v1708_v28, %v1708_v28  ;;  %v698_v27 = vld [vmem:[%s3306_s17 + $0xea0] sm:$0xff] }
 0x3cc   : > { %v1210_v28 = vld [vmem:[%s3312_s30 + $0xea0] sm:$0xff] }
 0x3cd   : > { %v2719_v49 = vadd.f32 %v2718_v44, %v2207_v38  ;;  %v1710_v38 = vsub.f32 %v686_v31, %v1198_v32  ;;  %v2221_v44 = vmul.f32 %v1709_v33, %v1709_v33  ;;  %v699_v32 = vld [vmem:[%s3306_s17 + $0xea8] sm:$0xff] }
 0x3ce   : > { %v1211_v33 = vld [vmem:[%s3312_s30 + $0xea8] sm:$0xff] }
 0x3cf   : > { %v2720_v54 = vadd.f32 %v2719_v49, %v2208_v43  ;;  %v1711_v43 = vsub.f32 %v687_v36, %v1199_v37  ;;  %v2222_v49 = vmul.f32 %v1710_v38, %v1710_v38  ;;  %v700_v37 = vld [vmem:[%s3306_s17 + $0xeb0] sm:$0xff] }
 0x3d0   : > { %v1212_v38 = vld [vmem:[%s3312_s30 + $0xeb0] sm:$0xff] }
 0x3d1   : > { %v2721_v59 = vadd.f32 %v2720_v54, %v2209_v48  ;;  %v1712_v48 = vsub.f32 %v688_v41, %v1200_v42  ;;  %v2223_v54 = vmul.f32 %v1711_v43, %v1711_v43  ;;  %v701_v42 = vld [vmem:[%s3306_s17 + $0xeb8] sm:$0xff] }
 0x3d2   : > { %v1213_v43 = vld [vmem:[%s3312_s30 + $0xeb8] sm:$0xff] }
 0x3d3   : > { %v2722_v0 = vadd.f32 %v2721_v59, %v2210_v53  ;;  %v1713_v53 = vsub.f32 %v689_v46, %v1201_v47  ;;  %v2224_v59 = vmul.f32 %v1712_v48, %v1712_v48  ;;  %v702_v47 = vld [vmem:[%s3306_s17 + $0xec0] sm:$0xff] }
 0x3d4   : > { %v1214_v48 = vld [vmem:[%s3312_s30 + $0xec0] sm:$0xff] }
 0x3d5   : > { %v2723_v5 = vadd.f32 %v2722_v0, %v2211_v58  ;;  %v1714_v58 = vsub.f32 %v690_v51, %v1202_v52  ;;  %v2225_v0 = vmul.f32 %v1713_v53, %v1713_v53  ;;  %v703_v52 = vld [vmem:[%s3306_s17 + $0xec8] sm:$0xff] }
 0x3d6   : > { %v1215_v53 = vld [vmem:[%s3312_s30 + $0xec8] sm:$0xff] }
 0x3d7   : > { %v2724_v10 = vadd.f32 %v2723_v5, %v2212_v63  ;;  %v1715_v63 = vsub.f32 %v691_v56, %v1203_v57  ;;  %v2226_v5 = vmul.f32 %v1714_v58, %v1714_v58  ;;  %v704_v57 = vld [vmem:[%s3306_s17 + $0xed0] sm:$0xff] }
 0x3d8   : > { %v1216_v58 = vld [vmem:[%s3312_s30 + $0xed0] sm:$0xff] }
 0x3d9   : > { %v2725_v15 = vadd.f32 %v2724_v10, %v2213_v4  ;;  %v1716_v4 = vsub.f32 %v692_v61, %v1204_v62  ;;  %v2227_v10 = vmul.f32 %v1715_v63, %v1715_v63  ;;  %v705_v62 = vld [vmem:[%s3306_s17 + $0xed8] sm:$0xff] }
 0x3da   : > { %v1217_v63 = vld [vmem:[%s3312_s30 + $0xed8] sm:$0xff] }
 0x3db   : > { %v2726_v20 = vadd.f32 %v2725_v15, %v2214_v9  ;;  %v1717_v9 = vsub.f32 %v693_v2, %v1205_v3  ;;  %v2228_v15 = vmul.f32 %v1716_v4, %v1716_v4  ;;  %v706_v3 = vld [vmem:[%s3306_s17 + $0xee0] sm:$0xff] }
 0x3dc   : > { %v1218_v4 = vld [vmem:[%s3312_s30 + $0xee0] sm:$0xff] }
 0x3dd   : > { %v2727_v25 = vadd.f32 %v2726_v20, %v2215_v14  ;;  %v1718_v14 = vsub.f32 %v694_v7, %v1206_v8  ;;  %v2229_v20 = vmul.f32 %v1717_v9, %v1717_v9  ;;  %v707_v8 = vld [vmem:[%s3306_s17 + $0xee8] sm:$0xff] }
 0x3de   : > { %v1219_v9 = vld [vmem:[%s3312_s30 + $0xee8] sm:$0xff] }
 0x3df   : > { %v2728_v30 = vadd.f32 %v2727_v25, %v2216_v19  ;;  %v1719_v19 = vsub.f32 %v695_v12, %v1207_v13  ;;  %v2230_v25 = vmul.f32 %v1718_v14, %v1718_v14  ;;  %v708_v13 = vld [vmem:[%s3306_s17 + $0xef0] sm:$0xff] }
 0x3e0   : > { %v1220_v14 = vld [vmem:[%s3312_s30 + $0xef0] sm:$0xff] }
 0x3e1   : > { %v2729_v35 = vadd.f32 %v2728_v30, %v2217_v24  ;;  %v1720_v24 = vsub.f32 %v696_v17, %v1208_v18  ;;  %v2231_v30 = vmul.f32 %v1719_v19, %v1719_v19  ;;  %v709_v18 = vld [vmem:[%s3306_s17 + $0xef8] sm:$0xff] }
 0x3e2   : > { %v1221_v19 = vld [vmem:[%s3312_s30 + $0xef8] sm:$0xff] }
 0x3e3   : > { %v2730_v40 = vadd.f32 %v2729_v35, %v2218_v29  ;;  %v1721_v29 = vsub.f32 %v697_v22, %v1209_v23  ;;  %v2232_v35 = vmul.f32 %v1720_v24, %v1720_v24  ;;  %v710_v23 = vld [vmem:[%s3306_s17 + $0xf00] sm:$0xff] }
 0x3e4   : > { %v1222_v24 = vld [vmem:[%s3312_s30 + $0xf00] sm:$0xff] }
 0x3e5   : > { %v2731_v45 = vadd.f32 %v2730_v40, %v2219_v34  ;;  %v1722_v34 = vsub.f32 %v698_v27, %v1210_v28  ;;  %v2233_v40 = vmul.f32 %v1721_v29, %v1721_v29  ;;  %v711_v28 = vld [vmem:[%s3306_s17 + $0xf08] sm:$0xff] }
 0x3e6   : > { %v1223_v29 = vld [vmem:[%s3312_s30 + $0xf08] sm:$0xff] }
 0x3e7   : > { %v2732_v50 = vadd.f32 %v2731_v45, %v2220_v39  ;;  %v1723_v39 = vsub.f32 %v699_v32, %v1211_v33  ;;  %v2234_v45 = vmul.f32 %v1722_v34, %v1722_v34  ;;  %v712_v33 = vld [vmem:[%s3306_s17 + $0xf10] sm:$0xff] }
 0x3e8   : > { %v1224_v34 = vld [vmem:[%s3312_s30 + $0xf10] sm:$0xff] }
 0x3e9   : > { %v2733_v55 = vadd.f32 %v2732_v50, %v2221_v44  ;;  %v1724_v44 = vsub.f32 %v700_v37, %v1212_v38  ;;  %v2235_v50 = vmul.f32 %v1723_v39, %v1723_v39  ;;  %v713_v38 = vld [vmem:[%s3306_s17 + $0xf18] sm:$0xff] }
 0x3ea   : > { %v1225_v39 = vld [vmem:[%s3312_s30 + $0xf18] sm:$0xff] }
 0x3eb   : > { %v2734_v60 = vadd.f32 %v2733_v55, %v2222_v49  ;;  %v1725_v49 = vsub.f32 %v701_v42, %v1213_v43  ;;  %v2236_v55 = vmul.f32 %v1724_v44, %v1724_v44  ;;  %v714_v43 = vld [vmem:[%s3306_s17 + $0xf20] sm:$0xff] }
 0x3ec   : > { %v1226_v44 = vld [vmem:[%s3312_s30 + $0xf20] sm:$0xff] }
 0x3ed   : > { %v2735_v1 = vadd.f32 %v2734_v60, %v2223_v54  ;;  %v1726_v54 = vsub.f32 %v702_v47, %v1214_v48  ;;  %v2237_v60 = vmul.f32 %v1725_v49, %v1725_v49  ;;  %v715_v48 = vld [vmem:[%s3306_s17 + $0xf28] sm:$0xff] }
 0x3ee   : > { %v1227_v49 = vld [vmem:[%s3312_s30 + $0xf28] sm:$0xff] }
 0x3ef   : > { %v2736_v6 = vadd.f32 %v2735_v1, %v2224_v59  ;;  %v1727_v59 = vsub.f32 %v703_v52, %v1215_v53  ;;  %v2238_v1 = vmul.f32 %v1726_v54, %v1726_v54  ;;  %v716_v53 = vld [vmem:[%s3306_s17 + $0xf30] sm:$0xff] }
 0x3f0   : > { %v1228_v54 = vld [vmem:[%s3312_s30 + $0xf30] sm:$0xff] }
 0x3f1   : > { %v2737_v11 = vadd.f32 %v2736_v6, %v2225_v0  ;;  %v1728_v0 = vsub.f32 %v704_v57, %v1216_v58  ;;  %v2239_v6 = vmul.f32 %v1727_v59, %v1727_v59  ;;  %v717_v58 = vld [vmem:[%s3306_s17 + $0xf38] sm:$0xff] }
 0x3f2   : > { %v1229_v59 = vld [vmem:[%s3312_s30 + $0xf38] sm:$0xff] }
 0x3f3   : > { %v2738_v16 = vadd.f32 %v2737_v11, %v2226_v5  ;;  %v1729_v5 = vsub.f32 %v705_v62, %v1217_v63  ;;  %v2240_v11 = vmul.f32 %v1728_v0, %v1728_v0  ;;  %v718_v63 = vld [vmem:[%s3306_s17 + $0xf40] sm:$0xff] }
 0x3f4   : > { %v1230_v0 = vld [vmem:[%s3312_s30 + $0xf40] sm:$0xff] }
 0x3f5   : > { %v2739_v21 = vadd.f32 %v2738_v16, %v2227_v10  ;;  %v1730_v10 = vsub.f32 %v706_v3, %v1218_v4  ;;  %v2241_v16 = vmul.f32 %v1729_v5, %v1729_v5  ;;  %v719_v4 = vld [vmem:[%s3306_s17 + $0xf48] sm:$0xff] }
 0x3f6   : > { %v1231_v5 = vld [vmem:[%s3312_s30 + $0xf48] sm:$0xff] }
 0x3f7   : > { %v2740_v26 = vadd.f32 %v2739_v21, %v2228_v15  ;;  %v1731_v15 = vsub.f32 %v707_v8, %v1219_v9  ;;  %v2242_v21 = vmul.f32 %v1730_v10, %v1730_v10  ;;  %v720_v9 = vld [vmem:[%s3306_s17 + $0xf50] sm:$0xff] }
 0x3f8   : > { %v1232_v10 = vld [vmem:[%s3312_s30 + $0xf50] sm:$0xff] }
 0x3f9   : > { %v2741_v31 = vadd.f32 %v2740_v26, %v2229_v20  ;;  %v1732_v20 = vsub.f32 %v708_v13, %v1220_v14  ;;  %v2243_v26 = vmul.f32 %v1731_v15, %v1731_v15  ;;  %v721_v14 = vld [vmem:[%s3306_s17 + $0xf58] sm:$0xff] }
 0x3fa   : > { %v1233_v15 = vld [vmem:[%s3312_s30 + $0xf58] sm:$0xff] }
 0x3fb   : > { %v2742_v36 = vadd.f32 %v2741_v31, %v2230_v25  ;;  %v1733_v25 = vsub.f32 %v709_v18, %v1221_v19  ;;  %v2244_v31 = vmul.f32 %v1732_v20, %v1732_v20  ;;  %v722_v19 = vld [vmem:[%s3306_s17 + $0xf60] sm:$0xff] }
 0x3fc   : > { %v1234_v20 = vld [vmem:[%s3312_s30 + $0xf60] sm:$0xff] }
 0x3fd   : > { %v2743_v41 = vadd.f32 %v2742_v36, %v2231_v30  ;;  %v1734_v30 = vsub.f32 %v710_v23, %v1222_v24  ;;  %v2245_v36 = vmul.f32 %v1733_v25, %v1733_v25  ;;  %v723_v24 = vld [vmem:[%s3306_s17 + $0xf68] sm:$0xff] }
 0x3fe   : > { %v1235_v25 = vld [vmem:[%s3312_s30 + $0xf68] sm:$0xff] }
 0x3ff   : > { %v2744_v46 = vadd.f32 %v2743_v41, %v2232_v35  ;;  %v1735_v35 = vsub.f32 %v711_v28, %v1223_v29  ;;  %v2246_v41 = vmul.f32 %v1734_v30, %v1734_v30  ;;  %v724_v29 = vld [vmem:[%s3306_s17 + $0xf70] sm:$0xff] }
 0x400   : > { %v1236_v30 = vld [vmem:[%s3312_s30 + $0xf70] sm:$0xff] }
 0x401   : > { %v2745_v51 = vadd.f32 %v2744_v46, %v2233_v40  ;;  %v1736_v40 = vsub.f32 %v712_v33, %v1224_v34  ;;  %v2247_v46 = vmul.f32 %v1735_v35, %v1735_v35  ;;  %v725_v34 = vld [vmem:[%s3306_s17 + $0xf78] sm:$0xff] }
 0x402   : > { %v1237_v35 = vld [vmem:[%s3312_s30 + $0xf78] sm:$0xff] }
 0x403   : > { %v2746_v56 = vadd.f32 %v2745_v51, %v2234_v45  ;;  %v1737_v45 = vsub.f32 %v713_v38, %v1225_v39  ;;  %v2248_v51 = vmul.f32 %v1736_v40, %v1736_v40  ;;  %v726_v39 = vld [vmem:[%s3306_s17 + $0xf80] sm:$0xff] }
 0x404   : > { %v1238_v40 = vld [vmem:[%s3312_s30 + $0xf80] sm:$0xff] }
 0x405   : > { %v2747_v61 = vadd.f32 %v2746_v56, %v2235_v50  ;;  %v1738_v50 = vsub.f32 %v714_v43, %v1226_v44  ;;  %v2249_v56 = vmul.f32 %v1737_v45, %v1737_v45  ;;  %v727_v44 = vld [vmem:[%s3306_s17 + $0xf88] sm:$0xff] }
 0x406   : > { %v1239_v45 = vld [vmem:[%s3312_s30 + $0xf88] sm:$0xff] }
 0x407   : > { %v2748_v2 = vadd.f32 %v2747_v61, %v2236_v55  ;;  %v1739_v55 = vsub.f32 %v715_v48, %v1227_v49  ;;  %v2250_v61 = vmul.f32 %v1738_v50, %v1738_v50  ;;  %v728_v49 = vld [vmem:[%s3306_s17 + $0xf90] sm:$0xff] }
 0x408   : > { %v1240_v50 = vld [vmem:[%s3312_s30 + $0xf90] sm:$0xff] }
 0x409   : > { %v2749_v7 = vadd.f32 %v2748_v2, %v2237_v60  ;;  %v1740_v60 = vsub.f32 %v716_v53, %v1228_v54  ;;  %v2251_v2 = vmul.f32 %v1739_v55, %v1739_v55  ;;  %v729_v54 = vld [vmem:[%s3306_s17 + $0xf98] sm:$0xff] }
 0x40a   : > { %v1241_v55 = vld [vmem:[%s3312_s30 + $0xf98] sm:$0xff] }
 0x40b   : > { %v2750_v12 = vadd.f32 %v2749_v7, %v2238_v1  ;;  %v1741_v1 = vsub.f32 %v717_v58, %v1229_v59  ;;  %v2252_v7 = vmul.f32 %v1740_v60, %v1740_v60  ;;  %v730_v59 = vld [vmem:[%s3306_s17 + $0xfa0] sm:$0xff] }
 0x40c   : > { %v1242_v60 = vld [vmem:[%s3312_s30 + $0xfa0] sm:$0xff] }
 0x40d   : > { %v2751_v17 = vadd.f32 %v2750_v12, %v2239_v6  ;;  %v1742_v6 = vsub.f32 %v718_v63, %v1230_v0  ;;  %v2253_v12 = vmul.f32 %v1741_v1, %v1741_v1  ;;  %v731_v0 = vld [vmem:[%s3306_s17 + $0xfa8] sm:$0xff] }
 0x40e   : > { %v1243_v1 = vld [vmem:[%s3312_s30 + $0xfa8] sm:$0xff] }
 0x40f   : > { %v2752_v22 = vadd.f32 %v2751_v17, %v2240_v11  ;;  %v1743_v11 = vsub.f32 %v719_v4, %v1231_v5  ;;  %v2254_v17 = vmul.f32 %v1742_v6, %v1742_v6  ;;  %v732_v5 = vld [vmem:[%s3306_s17 + $0xfb0] sm:$0xff] }
 0x410   : > { %v1244_v6 = vld [vmem:[%s3312_s30 + $0xfb0] sm:$0xff] }
 0x411   : > { %v2753_v27 = vadd.f32 %v2752_v22, %v2241_v16  ;;  %v1744_v16 = vsub.f32 %v720_v9, %v1232_v10  ;;  %v2255_v22 = vmul.f32 %v1743_v11, %v1743_v11  ;;  %v733_v10 = vld [vmem:[%s3306_s17 + $0xfb8] sm:$0xff] }
 0x412   : > { %v1245_v11 = vld [vmem:[%s3312_s30 + $0xfb8] sm:$0xff] }
 0x413   : > { %v2754_v32 = vadd.f32 %v2753_v27, %v2242_v21  ;;  %v1745_v21 = vsub.f32 %v721_v14, %v1233_v15  ;;  %v2256_v27 = vmul.f32 %v1744_v16, %v1744_v16  ;;  %v734_v15 = vld [vmem:[%s3306_s17 + $0xfc0] sm:$0xff] }
 0x414   : > { %v1246_v16 = vld [vmem:[%s3312_s30 + $0xfc0] sm:$0xff] }
 0x415   : > { %v2755_v37 = vadd.f32 %v2754_v32, %v2243_v26  ;;  %v1746_v26 = vsub.f32 %v722_v19, %v1234_v20  ;;  %v2257_v32 = vmul.f32 %v1745_v21, %v1745_v21  ;;  %v735_v20 = vld [vmem:[%s3306_s17 + $0xfc8] sm:$0xff] }
 0x416   : > { %v1247_v21 = vld [vmem:[%s3312_s30 + $0xfc8] sm:$0xff] }
 0x417   : > { %v2756_v42 = vadd.f32 %v2755_v37, %v2244_v31  ;;  %v1747_v31 = vsub.f32 %v723_v24, %v1235_v25  ;;  %v2258_v37 = vmul.f32 %v1746_v26, %v1746_v26  ;;  %v736_v25 = vld [vmem:[%s3306_s17 + $0xfd0] sm:$0xff] }
 0x418   : > { %v1248_v26 = vld [vmem:[%s3312_s30 + $0xfd0] sm:$0xff] }
 0x419   : > { %v2757_v47 = vadd.f32 %v2756_v42, %v2245_v36  ;;  %v1748_v36 = vsub.f32 %v724_v29, %v1236_v30  ;;  %v2259_v42 = vmul.f32 %v1747_v31, %v1747_v31  ;;  %v737_v30 = vld [vmem:[%s3306_s17 + $0xfd8] sm:$0xff] }
 0x41a   : > { %v1249_v31 = vld [vmem:[%s3312_s30 + $0xfd8] sm:$0xff] }
 0x41b   : > { %v2758_v52 = vadd.f32 %v2757_v47, %v2246_v41  ;;  %v1749_v41 = vsub.f32 %v725_v34, %v1237_v35  ;;  %v2260_v47 = vmul.f32 %v1748_v36, %v1748_v36  ;;  %v738_v35 = vld [vmem:[%s3306_s17 + $0xfe0] sm:$0xff] }
 0x41c   : > { %v1250_v36 = vld [vmem:[%s3312_s30 + $0xfe0] sm:$0xff] }
 0x41d   : > { %v2759_v57 = vadd.f32 %v2758_v52, %v2247_v46  ;;  %v1750_v46 = vsub.f32 %v726_v39, %v1238_v40  ;;  %v2261_v52 = vmul.f32 %v1749_v41, %v1749_v41  ;;  %v739_v40 = vld [vmem:[%s3306_s17 + $0xfe8] sm:$0xff] }
 0x41e   : > { %v1251_v41 = vld [vmem:[%s3312_s30 + $0xfe8] sm:$0xff] }
 0x41f   : > { %v2760_v62 = vadd.f32 %v2759_v57, %v2248_v51  ;;  %v1751_v51 = vsub.f32 %v727_v44, %v1239_v45  ;;  %v2262_v57 = vmul.f32 %v1750_v46, %v1750_v46  ;;  %v740_v45 = vld [vmem:[%s3306_s17 + $0xff0] sm:$0xff] }
 0x420   : > { %v1252_v46 = vld [vmem:[%s3312_s30 + $0xff0] sm:$0xff] }
 0x421   : > { %v2761_v3 = vadd.f32 %v2760_v62, %v2249_v56  ;;  %v1752_v56 = vsub.f32 %v728_v49, %v1240_v50  ;;  %v2263_v62 = vmul.f32 %v1751_v51, %v1751_v51  ;;  %v741_v50 = vld [vmem:[%s3306_s17 + $0xff8] sm:$0xff] }
 0x422   : > { %v1253_v51 = vld [vmem:[%s3312_s30 + $0xff8] sm:$0xff] }
 0x423   : > { %v2762_v8 = vadd.f32 %v2761_v3, %v2250_v61  ;;  %v1753_v61 = vsub.f32 %v729_v54, %v1241_v55  ;;  %v2264_v3 = vmul.f32 %v1752_v56, %v1752_v56  ;;  %v1765_v55 = vsub.f32 %v741_v50, %v1253_v51 }
 0x425   : > { %v2763_v13 = vadd.f32 %v2762_v8, %v2251_v2  ;;  %v1754_v2 = vsub.f32 %v730_v59, %v1242_v60  ;;  %v2265_v8 = vmul.f32 %v1753_v61, %v1753_v61  ;;  %v2277_v60 = vmul.f32 %v1765_v55, %v1765_v55 }
 0x427   : > { %v2764_v18 = vadd.f32 %v2763_v13, %v2252_v7  ;;  %v1755_v7 = vsub.f32 %v731_v0, %v1243_v1  ;;  %v2266_v13 = vmul.f32 %v1754_v2, %v1754_v2 }
 0x429   : > { %v2765_v23 = vadd.f32 %v2764_v18, %v2253_v12  ;;  %v1756_v12 = vsub.f32 %v732_v5, %v1244_v6  ;;  %v2267_v18 = vmul.f32 %v1755_v7, %v1755_v7  ;;  %v2278_v5 = vld [vmem:[#allocation7] sm:$0x1] }
 0x42b   : > { %v2766_v28 = vadd.f32 %v2765_v23, %v2254_v17  ;;  %v1757_v17 = vsub.f32 %v733_v10, %v1245_v11  ;;  %v2268_v23 = vmul.f32 %v1756_v12, %v1756_v12 }
 0x42d   : > { %v2767_v33 = vadd.f32 %v2766_v28, %v2255_v22  ;;  %v1758_v22 = vsub.f32 %v734_v15, %v1246_v16  ;;  %v2269_v28 = vmul.f32 %v1757_v17, %v1757_v17 }
 0x42f   : > { %v2768_v38 = vadd.f32 %v2767_v33, %v2256_v27  ;;  %v1759_v27 = vsub.f32 %v735_v20, %v1247_v21  ;;  %v2270_v33 = vmul.f32 %v1758_v22, %v1758_v22 }
 0x431   : > { %v2769_v43 = vadd.f32 %v2768_v38, %v2257_v32  ;;  %v1760_v32 = vsub.f32 %v736_v25, %v1248_v26  ;;  %v2271_v38 = vmul.f32 %v1759_v27, %v1759_v27 }
 0x433   : > { %v2770_v48 = vadd.f32 %v2769_v43, %v2258_v37  ;;  %v1761_v37 = vsub.f32 %v737_v30, %v1249_v31  ;;  %v2272_v43 = vmul.f32 %v1760_v32, %v1760_v32 }
 0x435   : > { %v2771_v53 = vadd.f32 %v2770_v48, %v2259_v42  ;;  %v1762_v42 = vsub.f32 %v738_v35, %v1250_v36  ;;  %v2273_v48 = vmul.f32 %v1761_v37, %v1761_v37 }
 0x437   : > { %v2772_v58 = vadd.f32 %v2771_v53, %v2260_v47  ;;  %v1763_v47 = vsub.f32 %v739_v40, %v1251_v41  ;;  %v2274_v53 = vmul.f32 %v1762_v42, %v1762_v42 }
 0x439   : > { %v2773_v63 = vadd.f32 %v2772_v58, %v2261_v52  ;;  %v1764_v52 = vsub.f32 %v740_v45, %v1252_v46  ;;  %v2275_v56 = vmul.f32 %v1763_v47, %v1763_v47 }
 0x43b   : > { %v2774_v4 = vadd.f32 %v2773_v63, %v2262_v57  ;;  %v2276_v58 = vmul.f32 %v1764_v52, %v1764_v52 }
 0x43d   : > { %v2775_v9 = vadd.f32 %v2774_v4, %v2263_v62 }
 0x43f   : > { %v2776_v14 = vadd.f32 %v2775_v9, %v2264_v3 }
 0x441   : > { %v2777_v19 = vadd.f32 %v2776_v14, %v2265_v8 }
 0x443   : > { %v2778_v24 = vadd.f32 %v2777_v19, %v2266_v13 }
 0x445   : > { %v2779_v29 = vadd.f32 %v2778_v24, %v2267_v18 }
 0x447   : > { %v2780_v34 = vadd.f32 %v2779_v29, %v2268_v23 }
 0x449   : > { %v2781_v39 = vadd.f32 %v2780_v34, %v2269_v28 }
 0x44b   : > { %v2782_v44 = vadd.f32 %v2781_v39, %v2270_v33 }
 0x44d   : > { %v2783_v49 = vadd.f32 %v2782_v44, %v2271_v38 }
 0x44f   : > { %v2784_v54 = vadd.f32 %v2783_v49, %v2272_v43 }
 0x451   : > { %v2785_v57 = vadd.f32 %v2784_v54, %v2273_v48 }
 0x453   : > { %v2786_v59 = vadd.f32 %v2785_v57, %v2274_v53 }
 0x455   : > { %v2787_v61 = vadd.f32 %v2786_v59, %v2275_v56 }
 0x457   : > { %v2788_v62 = vadd.f32 %v2787_v61, %v2276_v58 }
 0x459   : > { %v2789_v63 = vadd.f32 %v2788_v62, %v2277_v60 }
 0x45b   : > { %v2790_v0 = vrot.slane %v2789_v63, 4 }
 0x45d   : > { %v2791_v1 = vadd.f32 %v2790_v0, %v2789_v63 }
 0x45f   : > { %v2792_v2 = vrot.slane %v2791_v1, 2 }
 0x461   : > { %v2793_v3 = vadd.f32 %v2792_v2, %v2791_v1 }
 0x463   : > { %v2794_v4 = vrot.slane %v2793_v3, 1 }
 0x465   : > { %v2795_v6 = vadd.f32 %v2794_v4, %v2793_v3 }
 0x467   : > { %v2796_v7 = vadd.f32 %v2795_v6, %v2278_v5 }
 0x469   : > { %2797 = vst [vmem:[#allocation7] sm:$0x1] %v2796_v7 }
 0x46a   : > { %3057 = shalt.err (!%p3054_p5)
}
 0x46b   : > { %s3058_s9 = scalar_lea.hbm %s4391_s2, 16 }
 0x46c   : > { %p3059_p6 = scmp.ne.s32.totalorder %s4391_s2, %s3058_s9  ;;  %p3064_p0 = scmp.lt.u32.totalorder %s3058_s9, %s4391_s2 }
 0x46e   : > { %p3060_p10 = pnand %p3059_p6, %p4345_p11 }
 0x470   : > { %p3061_p12 = pneg %p3060_p10 }
 0x472   : > { %p3066_p7 = pnand %p3064_p0, %p3061_p12 }
 0x474   : > { %3069 = shalt.err (!%p3066_p7)
}
 0x475   : > { %2919 = dma.vmem_to_hbm [thread:$0]  (%p4345_p11), %s2808_s20, 16, %s4391_s2, [#allocation4]  }
 0x476   : > { %3103 = dma.done.wait (%p4345_p11), [#allocation4], 16  }
 0x477   : > { %3105 = vsyncadd (%p4345_p11), [#allocation4], 4294967280 }
 0x478 PF: > { %s19_s14 = sadd.s32 1, %s3128_s14   ;;  %s4399_s9 = smov %s3112_s10 }
 0x479   : > { %p16_p9 = scmp.ge.s32.totalorder %s19_s14, 4   ;;  %s4400_s10 = smov %s3116_s11 }
 0x47a   : > { %s4401_s11 = smov %s3202_s21  ;;  %s4402_s12 = smov %s3124_s13 }
 0x47b   : > { %s4403_s13 = smov %s4405_s16  ;;  %18 = sbr.rel (!%p16_p9) target bundleno = 7 (0x7), region = 83 }
 0x482   :  { %2820 = vsyncpa [#allocation3], 1 }
 0x483   :  { %2822 = vsyncpa [#allocation3 + $0x1], 1 }
 0x484   :  { %2823 = vsyncpa [#allocation6], 1 }
 0x485   :  { %2825 = vsyncpa [#allocation6 + $0x1], 1 }
 0x486   :  { %2826 = vsyncpa [#allocation4], 1 }
 0x487   :  { %2828 = vsyncpa [#allocation4 + $0x1], 1 }

</bundles_post_ra>
